<compile_context>
chip_gen: v6e
topology: v6e:2x2x1
jax: 0.10.0
libtpu: 0.0.40
codegen_flags: <defaults>
</compile_context>

<pallas_src>
import jax
import jax.numpy as jnp
import numpy as np
from jax.experimental import pallas as pl
from jax.experimental.pallas import tpu as pltpu


# ----------------------------------------------------------------------------
# Activation layouts (f32 2-D slabs; each image occupies a 32-row block,
# R = B_TILE*32; row index inside a block is the spatial row):
#   x   : (R+24, 96)   lane = w*3  + ci              (rows >= R are zero pad)
#   y1  : (R+16, 168)  lane = ow*6 + co              (valid block rows 0..27)
#   p1  : (R+ 8, 162)  valid at [2*ph, 12*pw + c]    (sparse in place)
#   y2  : (R,    160)  valid at [2*oh, 16*ow + co]
#   p2  : (R- 8, 144)  valid at [4*ph, 32*pw + c]
#   fc  : (R-24, 128)  valid at block row 0 only
# The repacked weights (prepare_params) read exactly these layouts; zero rows
# in W2/WF1 make the garbage lanes of the sparse pooled layouts inert.
# ----------------------------------------------------------------------------
def _make_lenet5_kernel(b_tile):
    R = b_tile * 32
    NX, N1, NP1, N2, NP2, NF = R + 24, R + 16, R + 8, R, R - 8, R - 24

    def kernel(x_ref, w1_ref, b1_ref, w2_ref, b2_ref,
               wf1_ref, bf1_ref, wf2_ref, bf2_ref, wf3_ref, bf3_ref, o_ref):
        f32 = jnp.float32
        # Zero-pad the stacked input slab so every banded slice stays in-bounds
        # (pad rows never feed a valid output row).
        x = jnp.concatenate(
            [x_ref[...], jnp.zeros((NX - R, 96), f32)], axis=0)       # (NX, 96)

        # conv1 + relu: 5 banded matmuls over the whole batch tile at once.
        acc1 = jnp.dot(x[0:N1], w1_ref[0], preferred_element_type=f32)
        for i in range(1, 5):
            acc1 = acc1 + jnp.dot(x[i:i + N1], w1_ref[i],
                                  preferred_element_type=f32)
        y1 = jnp.maximum(acc1 + b1_ref[...], 0.0)                      # (N1, 168)

        # pool1 (2x2 / stride 2), non-compacting (sparse in place).
        y1w = jnp.maximum(y1[:, 0:162], y1[:, 6:168])
        p1 = jnp.maximum(y1w[0:NP1], y1w[1:NP1 + 1])                   # (NP1, 162)

        # conv2 + relu on the sparse pooled layout.
        acc2 = jnp.dot(p1[0:N2], w2_ref[0], preferred_element_type=f32)
        for i in range(1, 5):
            acc2 = acc2 + jnp.dot(p1[2 * i:2 * i + N2], w2_ref[i],
                                  preferred_element_type=f32)
        y2 = jnp.maximum(acc2 + b2_ref[...], 0.0)                      # (N2, 160)

        # pool2, non-compacting.
        y2w = jnp.maximum(y2[:, 0:144], y2[:, 16:160])
        p2 = jnp.maximum(y2w[0:NP2], y2w[2:NP2 + 2])                   # (NP2, 144)

        # fc1 + relu: banded over the 5 valid pooled rows; NCHW flatten is
        # folded into WF1.  Valid result lives at block row 0 of each image.
        f1 = jnp.dot(p2[0:NF], wf1_ref[0], preferred_element_type=f32)
        for ph in range(1, 5):
            f1 = f1 + jnp.dot(p2[4 * ph:4 * ph + NF], wf1_ref[ph],
                              preferred_element_type=f32)
        f1 = jnp.maximum(f1 + bf1_ref[...], 0.0)                       # (NF, 128)

        # fc2 + relu, fc3 (garbage rows just compute garbage, ignored below).
        f2 = jnp.maximum(jnp.dot(f1, wf2_ref[...], preferred_element_type=f32)
                         + bf2_ref[...], 0.0)
        f3 = jnp.dot(f2, wf3_ref[...], preferred_element_type=f32) + bf3_ref[...]

        # Compact the one valid row per image (row b*32) into a lane-dense
        # (b_tile, 128) block with a tiny selection matmul.
        rows = jax.lax.broadcasted_iota(jnp.int32, (b_tile, NF), 0)
        cols = jax.lax.broadcasted_iota(jnp.int32, (b_tile, NF), 1)
        sel = (cols == rows * 32).astype(f32)
        o_ref[0] = jnp.dot(sel, f3, preferred_element_type=f32)        # (b_tile, 128)

    return kernel


# ----------------------------------------------------------------------------
# One-time host-side weight repacking (outside jit).
# ----------------------------------------------------------------------------
def prepare_params(params):
    w1 = np.asarray(params["conv1_w"], np.float32)   # (6, 3, 5, 5)
    b1 = np.asarray(params["conv1_b"], np.float32)
    w2 = np.asarray(params["conv2_w"], np.float32)   # (16, 6, 5, 5)
    b2 = np.asarray(params["conv2_b"], np.float32)
    f1w = np.asarray(params["fc1_w"], np.float32)    # (120, 400)
    f1b = np.asarray(params["fc1_b"], np.float32)
    f2w = np.asarray(params["fc2_w"], np.float32)    # (84, 120)
    f2b = np.asarray(params["fc2_b"], np.float32)
    f3w = np.asarray(params["fc3_w"], np.float32)    # (10, 84)
    f3b = np.asarray(params["fc3_b"], np.float32)

    # conv1: banded weight per kernel row i; reads lane (w*3+ci), writes
    # lane (ow*6+co).
    W1 = np.zeros((5, 96, 168), np.float32)
    for i in range(5):
        for j in range(5):
            wij = w1[:, :, i, j].T                   # (ci=3, co=6)
            for ow in range(28):
                W1[i, (ow + j) * 3:(ow + j) * 3 + 3, ow * 6:ow * 6 + 6] = wij
    B1 = np.tile(b1, 28).reshape(1, 168)

    # conv2: reads the sparse pool1 layout (valid ci at lane 12*pw+ci),
    # writes lane (ow*16+co).  Zero rows keep garbage lanes inert.
    W2 = np.zeros((5, 162, 160), np.float32)
    for i in range(5):
        for j in range(5):
            wij = w2[:, :, i, j].T                   # (ci=6, co=16)
            for ow in range(10):
                W2[i, 12 * (ow + j):12 * (ow + j) + 6, ow * 16:ow * 16 + 16] = wij
    B2 = np.tile(b2, 10).reshape(1, 160)

    # fc1: one (144, 128) weight per pooled row ph; reads the sparse pool2
    # layout (valid c at lane 32*pw+c) and folds PyTorch's NCHW flatten
    # index c*25 + h*5 + w.  N padded 120 -> 128 with zeros.
    WF1 = np.zeros((5, 144, 128), np.float32)
    for ph in range(5):
        for pw in range(5):
            for c in range(16):
                WF1[ph, 32 * pw + c, :120] = f1w[:, c * 25 + ph * 5 + pw]
    BF1 = np.zeros((1, 128), np.float32)
    BF1[0, :120] = f1b

    WF2 = np.zeros((128, 128), np.float32)
    WF2[:120, :84] = f2w.T
    BF2 = np.zeros((1, 128), np.float32)
    BF2[0, :84] = f2b

    # fc3 padded to a lane-dense 128-wide output (valid logits in lanes 0..9).
    WF3 = np.zeros((128, 128), np.float32)
    WF3[:84, :10] = f3w.T
    BF3 = np.zeros((1, 128), np.float32)
    BF3[0, :10] = f3b

    packed = dict(W1=W1, B1=B1, W2=W2, B2=B2, WF1=WF1, BF1=BF1,
                  WF2=WF2, BF2=BF2, WF3=WF3, BF3=BF3)
    return {k: jnp.asarray(v) for k, v in packed.items()}


# ----------------------------------------------------------------------------
# Forward wrapper: single pallas_call, grid over batch tiles.
# ----------------------------------------------------------------------------
def lenet5_forward(x_nchw, prep, b_tile=None):
    B = x_nchw.shape[0]
    if b_tile is None:
        # Whole batch per step for small B (v5e/v6e: no per-step overhead);
        # cap at 8 images/step for large B so the grid still parallelizes on
        # v7x and VMEM stays well under its 64 MiB cap.
        b_tile = B if B <= 8 else 8
    assert B % b_tile == 0, "batch must be divisible by the batch tile"
    n_steps = B // b_tile

    # NCHW -> NHWC -> stacked (B*32, 96) slab.  Tiny at this batch size; at
    # serving batch sizes feed inputs pre-laid-out to skip this HBM round-trip.
    x_slab = jnp.transpose(x_nchw, (0, 2, 3, 1)).reshape(B * 32, 96)

    kernel = _make_lenet5_kernel(b_tile)
    out = pl.pallas_call(
        kernel,
        out_shape=jax.ShapeDtypeStruct((n_steps, b_tile, 128), jnp.float32),
        grid=(n_steps,),
        in_specs=[
            pl.BlockSpec((b_tile * 32, 96), lambda b: (b, 0)),   # stacked images
            pl.BlockSpec((5, 96, 168), lambda b: (0, 0, 0)),     # W1
            pl.BlockSpec((1, 168), lambda b: (0, 0)),            # B1
            pl.BlockSpec((5, 162, 160), lambda b: (0, 0, 0)),    # W2
            pl.BlockSpec((1, 160), lambda b: (0, 0)),            # B2
            pl.BlockSpec((5, 144, 128), lambda b: (0, 0, 0)),    # WF1
            pl.BlockSpec((1, 128), lambda b: (0, 0)),            # BF1
            pl.BlockSpec((128, 128), lambda b: (0, 0)),          # WF2
            pl.BlockSpec((1, 128), lambda b: (0, 0)),            # BF2
            pl.BlockSpec((128, 128), lambda b: (0, 0)),          # WF3 (padded)
            pl.BlockSpec((1, 128), lambda b: (0, 0)),            # BF3 (padded)
        ],
        out_specs=pl.BlockSpec((1, b_tile, 128), lambda b: (b, 0, 0)),
        compiler_params=pltpu.CompilerParams(
            dimension_semantics=("parallel",)),
    )(x_slab, prep["W1"], prep["B1"], prep["W2"], prep["B2"],
      prep["WF1"], prep["BF1"], prep["WF2"], prep["BF2"],
      prep["WF3"], prep["BF3"])
    return out.reshape(B, 128)[:, :10]


# ----------------------------------------------------------------------------
# Pure-JAX reference (PyTorch semantics) for the correctness check.
# ----------------------------------------------------------------------------
def lenet5_reference(x_nchw, params):
    hp = jax.lax.Precision.HIGHEST

    def conv(x, w, b):
        y = jax.lax.conv_general_dilated(
            x, w, (1, 1), "VALID",
            dimension_numbers=("NCHW", "OIHW", "NCHW"), precision=hp)
        return jnp.maximum(y + b[None, :, None, None], 0.0)

    def pool(x):
        B, C, H, W = x.shape
        return jnp.max(x.reshape(B, C, H // 2, 2, W // 2, 2), axis=(3, 5))

    x = pool(conv(x_nchw, params["conv1_w"], params["conv1_b"]))
    x = pool(conv(x, params["conv2_w"], params["conv2_b"]))
    x = x.reshape(x.shape[0], 16 * 5 * 5)                   # NCHW flatten
    x = jnp.maximum(jnp.dot(x, params["fc1_w"].T, precision=hp) + params["fc1_b"], 0.0)
    x = jnp.maximum(jnp.dot(x, params["fc2_w"].T, precision=hp) + params["fc2_b"], 0.0)
    return jnp.dot(x, params["fc3_w"].T, precision=hp) + params["fc3_b"]


# ----------------------------------------------------------------------------
# Deterministic parameter init (PyTorch default-style uniform bounds).
# ----------------------------------------------------------------------------
def init_params(key):
    def uni(k, shape, fan_in):
        bound = 1.0 / np.sqrt(fan_in)
        return jax.random.uniform(k, shape, jnp.float32, -bound, bound)

    ks = jax.random.split(key, 10)
    return {
        "conv1_w": uni(ks[0], (6, 3, 5, 5), 3 * 25),
        "conv1_b": uni(ks[1], (6,), 3 * 25),
        "conv2_w": uni(ks[2], (16, 6, 5, 5), 6 * 25),
        "conv2_b": uni(ks[3], (16,), 6 * 25),
        "fc1_w":   uni(ks[4], (120, 400), 400),
        "fc1_b":   uni(ks[5], (120,), 400),
        "fc2_w":   uni(ks[6], (84, 120), 120),
        "fc2_b":   uni(ks[7], (84,), 120),
        "fc3_w":   uni(ks[8], (10, 84), 84),
        "fc3_b":   uni(ks[9], (10,), 84),
    }


if __name__ == "__main__":
    key = jax.random.PRNGKey(0)
    kx, kp = jax.random.split(key)
    # SVHN-style input implied by the module: 3x32x32 NCHW, small batch of 2.
    x = jax.random.normal(kx, (2, 3, 32, 32), jnp.float32)
    params = init_params(kp)

    prep = prepare_params(params)            # one-time host-side repacking
    out = jax.jit(lenet5_forward)(x, prep)
    out = jax.block_until_ready(out)

    ref = lenet5_reference(x, params)
    assert out.shape == (2, 10), out.shape
    assert bool(jnp.all(jnp.isfinite(out)))
    assert bool(jnp.allclose(out, ref, rtol=1e-2, atol=1e-2)), "mismatch vs reference"
    print("KERNEL_OK")
</pallas_src>

<mosaic_0001>
module attributes {stable_mosaic.version = 11 : i64} {
  func.func @kernel(%arg0: i32, %arg1: memref<64x96xf32, #tpu.memory_space<vmem>>, %arg2: memref<5x96x168xf32, #tpu.memory_space<vmem>>, %arg3: memref<1x168xf32, #tpu.memory_space<vmem>>, %arg4: memref<5x162x160xf32, #tpu.memory_space<vmem>>, %arg5: memref<1x160xf32, #tpu.memory_space<vmem>>, %arg6: memref<5x144x128xf32, #tpu.memory_space<vmem>>, %arg7: memref<1x128xf32, #tpu.memory_space<vmem>>, %arg8: memref<128x128xf32, #tpu.memory_space<vmem>>, %arg9: memref<1x128xf32, #tpu.memory_space<vmem>>, %arg10: memref<128x128xf32, #tpu.memory_space<vmem>>, %arg11: memref<1x128xf32, #tpu.memory_space<vmem>>, %arg12: memref<1x2x128xf32, #tpu.memory_space<vmem>>) attributes {dimension_semantics = [#tpu.dimension_semantics<parallel>], iteration_bounds = array<i64: 1>, scalar_prefetch = 0 : i64, scratch_operands = 0 : i64, tpu.core_type = #tpu.core_type<tc>, window_params = [{transform_indices = @transform_0, window_bounds = array<i64: 64, 96>}, {pipeline_mode = #tpu.pipeline_mode<synchronous>, transform_indices = @transform_1, window_bounds = array<i64: 5, 96, 168>}, {pipeline_mode = #tpu.pipeline_mode<synchronous>, transform_indices = @transform_2, window_bounds = array<i64: 1, 168>}, {pipeline_mode = #tpu.pipeline_mode<synchronous>, transform_indices = @transform_3, window_bounds = array<i64: 5, 162, 160>}, {pipeline_mode = #tpu.pipeline_mode<synchronous>, transform_indices = @transform_4, window_bounds = array<i64: 1, 160>}, {pipeline_mode = #tpu.pipeline_mode<synchronous>, transform_indices = @transform_5, window_bounds = array<i64: 5, 144, 128>}, {pipeline_mode = #tpu.pipeline_mode<synchronous>, transform_indices = @transform_6, window_bounds = array<i64: 1, 128>}, {pipeline_mode = #tpu.pipeline_mode<synchronous>, transform_indices = @transform_7, window_bounds = array<i64: 128, 128>}, {pipeline_mode = #tpu.pipeline_mode<synchronous>, transform_indices = @transform_8, window_bounds = array<i64: 1, 128>}, {pipeline_mode = #tpu.pipeline_mode<synchronous>, transform_indices = @transform_9, window_bounds = array<i64: 128, 128>}, {pipeline_mode = #tpu.pipeline_mode<synchronous>, transform_indices = @transform_10, window_bounds = array<i64: 1, 128>}, {transform_indices = @transform_11, window_bounds = array<i64: 1, 2, 128>}]} {
    %c0 = arith.constant 0 : index
    %c0_0 = arith.constant 0 : index
    %0 = vector.load %arg1[%c0, %c0_0] : memref<64x96xf32, #tpu.memory_space<vmem>>, vector<64x96xf32>
    %cst = arith.constant 0.000000e+00 : f32
    %1 = vector.broadcast %cst : f32 to vector<24x96xf32>
    %2 = tpu.concatenate %0, %1 in 0 : vector<64x96xf32>, vector<24x96xf32> -> vector<88x96xf32>
    %3 = vector.extract_strided_slice %2 {offsets = [0, 0], sizes = [80, 96], strides = [1, 1]} : vector<88x96xf32> to vector<80x96xf32>
    %c0_1 = arith.constant 0 : index
    %c0_2 = arith.constant 0 : index
    %c0_3 = arith.constant 0 : index
    %4 = vector.load %arg2[%c0_1, %c0_2, %c0_3] : memref<5x96x168xf32, #tpu.memory_space<vmem>>, vector<1x96x168xf32>
    %5 = vector.shape_cast %4 : vector<1x96x168xf32> to vector<96x168xf32>
    %cst_4 = arith.constant dense<0.000000e+00> : vector<80x168xf32>
    %6 = tpu.matmul %3, %5, %cst_4 {dimension_numbers = #tpu.dot_dimension_numbers<[1], [0], [0], [1], [0, 0, 1, 1], [], []>} : vector<80x96xf32>, vector<96x168xf32>, vector<80x168xf32> -> vector<80x168xf32>
    %7 = vector.extract_strided_slice %2 {offsets = [1, 0], sizes = [80, 96], strides = [1, 1]} : vector<88x96xf32> to vector<80x96xf32>
    %c1 = arith.constant 1 : index
    %c0_5 = arith.constant 0 : index
    %c0_6 = arith.constant 0 : index
    %8 = vector.load %arg2[%c1, %c0_5, %c0_6] : memref<5x96x168xf32, #tpu.memory_space<vmem>>, vector<1x96x168xf32>
    %9 = vector.shape_cast %8 : vector<1x96x168xf32> to vector<96x168xf32>
    %cst_7 = arith.constant dense<0.000000e+00> : vector<80x168xf32>
    %10 = tpu.matmul %7, %9, %cst_7 {dimension_numbers = #tpu.dot_dimension_numbers<[1], [0], [0], [1], [0, 0, 1, 1], [], []>} : vector<80x96xf32>, vector<96x168xf32>, vector<80x168xf32> -> vector<80x168xf32>
    %11 = arith.addf %6, %10 : vector<80x168xf32>
    %12 = vector.extract_strided_slice %2 {offsets = [2, 0], sizes = [80, 96], strides = [1, 1]} : vector<88x96xf32> to vector<80x96xf32>
    %c2 = arith.constant 2 : index
    %c0_8 = arith.constant 0 : index
    %c0_9 = arith.constant 0 : index
    %13 = vector.load %arg2[%c2, %c0_8, %c0_9] : memref<5x96x168xf32, #tpu.memory_space<vmem>>, vector<1x96x168xf32>
    %14 = vector.shape_cast %13 : vector<1x96x168xf32> to vector<96x168xf32>
    %cst_10 = arith.constant dense<0.000000e+00> : vector<80x168xf32>
    %15 = tpu.matmul %12, %14, %cst_10 {dimension_numbers = #tpu.dot_dimension_numbers<[1], [0], [0], [1], [0, 0, 1, 1], [], []>} : vector<80x96xf32>, vector<96x168xf32>, vector<80x168xf32> -> vector<80x168xf32>
    %16 = arith.addf %11, %15 : vector<80x168xf32>
    %17 = vector.extract_strided_slice %2 {offsets = [3, 0], sizes = [80, 96], strides = [1, 1]} : vector<88x96xf32> to vector<80x96xf32>
    %c3 = arith.constant 3 : index
    %c0_11 = arith.constant 0 : index
    %c0_12 = arith.constant 0 : index
    %18 = vector.load %arg2[%c3, %c0_11, %c0_12] : memref<5x96x168xf32, #tpu.memory_space<vmem>>, vector<1x96x168xf32>
    %19 = vector.shape_cast %18 : vector<1x96x168xf32> to vector<96x168xf32>
    %cst_13 = arith.constant dense<0.000000e+00> : vector<80x168xf32>
    %20 = tpu.matmul %17, %19, %cst_13 {dimension_numbers = #tpu.dot_dimension_numbers<[1], [0], [0], [1], [0, 0, 1, 1], [], []>} : vector<80x96xf32>, vector<96x168xf32>, vector<80x168xf32> -> vector<80x168xf32>
    %21 = arith.addf %16, %20 : vector<80x168xf32>
    %22 = vector.extract_strided_slice %2 {offsets = [4, 0], sizes = [80, 96], strides = [1, 1]} : vector<88x96xf32> to vector<80x96xf32>
    %c4 = arith.constant 4 : index
    %c0_14 = arith.constant 0 : index
    %c0_15 = arith.constant 0 : index
    %23 = vector.load %arg2[%c4, %c0_14, %c0_15] : memref<5x96x168xf32, #tpu.memory_space<vmem>>, vector<1x96x168xf32>
    %24 = vector.shape_cast %23 : vector<1x96x168xf32> to vector<96x168xf32>
    %cst_16 = arith.constant dense<0.000000e+00> : vector<80x168xf32>
    %25 = tpu.matmul %22, %24, %cst_16 {dimension_numbers = #tpu.dot_dimension_numbers<[1], [0], [0], [1], [0, 0, 1, 1], [], []>} : vector<80x96xf32>, vector<96x168xf32>, vector<80x168xf32> -> vector<80x168xf32>
    %26 = arith.addf %21, %25 : vector<80x168xf32>
    %c0_17 = arith.constant 0 : index
    %c0_18 = arith.constant 0 : index
    %27 = vector.load %arg3[%c0_17, %c0_18] : memref<1x168xf32, #tpu.memory_space<vmem>>, vector<1x168xf32>
    %28 = vector.broadcast %27 : vector<1x168xf32> to vector<80x168xf32>
    %29 = arith.addf %26, %28 : vector<80x168xf32>
    %cst_19 = arith.constant 0.000000e+00 : f32
    %30 = vector.broadcast %cst_19 : f32 to vector<80x168xf32>
    %31 = arith.maximumf %29, %30 : vector<80x168xf32>
    %32 = vector.extract_strided_slice %31 {offsets = [0, 0], sizes = [80, 162], strides = [1, 1]} : vector<80x168xf32> to vector<80x162xf32>
    %33 = vector.extract_strided_slice %31 {offsets = [0, 6], sizes = [80, 162], strides = [1, 1]} : vector<80x168xf32> to vector<80x162xf32>
    %34 = arith.maximumf %32, %33 : vector<80x162xf32>
    %35 = vector.extract_strided_slice %34 {offsets = [0, 0], sizes = [72, 162], strides = [1, 1]} : vector<80x162xf32> to vector<72x162xf32>
    %36 = vector.extract_strided_slice %34 {offsets = [1, 0], sizes = [72, 162], strides = [1, 1]} : vector<80x162xf32> to vector<72x162xf32>
    %37 = arith.maximumf %35, %36 : vector<72x162xf32>
    %38 = vector.extract_strided_slice %37 {offsets = [0, 0], sizes = [64, 162], strides = [1, 1]} : vector<72x162xf32> to vector<64x162xf32>
    %c0_20 = arith.constant 0 : index
    %c0_21 = arith.constant 0 : index
    %c0_22 = arith.constant 0 : index
    %39 = vector.load %arg4[%c0_20, %c0_21, %c0_22] : memref<5x162x160xf32, #tpu.memory_space<vmem>>, vector<1x162x160xf32>
    %40 = vector.shape_cast %39 : vector<1x162x160xf32> to vector<162x160xf32>
    %cst_23 = arith.constant dense<0.000000e+00> : vector<64x160xf32>
    %41 = tpu.matmul %38, %40, %cst_23 {dimension_numbers = #tpu.dot_dimension_numbers<[1], [0], [0], [1], [0, 0, 1, 1], [], []>} : vector<64x162xf32>, vector<162x160xf32>, vector<64x160xf32> -> vector<64x160xf32>
    %42 = vector.extract_strided_slice %37 {offsets = [2, 0], sizes = [64, 162], strides = [1, 1]} : vector<72x162xf32> to vector<64x162xf32>
    %c1_24 = arith.constant 1 : index
    %c0_25 = arith.constant 0 : index
    %c0_26 = arith.constant 0 : index
    %43 = vector.load %arg4[%c1_24, %c0_25, %c0_26] : memref<5x162x160xf32, #tpu.memory_space<vmem>>, vector<1x162x160xf32>
    %44 = vector.shape_cast %43 : vector<1x162x160xf32> to vector<162x160xf32>
    %cst_27 = arith.constant dense<0.000000e+00> : vector<64x160xf32>
    %45 = tpu.matmul %42, %44, %cst_27 {dimension_numbers = #tpu.dot_dimension_numbers<[1], [0], [0], [1], [0, 0, 1, 1], [], []>} : vector<64x162xf32>, vector<162x160xf32>, vector<64x160xf32> -> vector<64x160xf32>
    %46 = arith.addf %41, %45 : vector<64x160xf32>
    %47 = vector.extract_strided_slice %37 {offsets = [4, 0], sizes = [64, 162], strides = [1, 1]} : vector<72x162xf32> to vector<64x162xf32>
    %c2_28 = arith.constant 2 : index
    %c0_29 = arith.constant 0 : index
    %c0_30 = arith.constant 0 : index
    %48 = vector.load %arg4[%c2_28, %c0_29, %c0_30] : memref<5x162x160xf32, #tpu.memory_space<vmem>>, vector<1x162x160xf32>
    %49 = vector.shape_cast %48 : vector<1x162x160xf32> to vector<162x160xf32>
    %cst_31 = arith.constant dense<0.000000e+00> : vector<64x160xf32>
    %50 = tpu.matmul %47, %49, %cst_31 {dimension_numbers = #tpu.dot_dimension_numbers<[1], [0], [0], [1], [0, 0, 1, 1], [], []>} : vector<64x162xf32>, vector<162x160xf32>, vector<64x160xf32> -> vector<64x160xf32>
    %51 = arith.addf %46, %50 : vector<64x160xf32>
    %52 = vector.extract_strided_slice %37 {offsets = [6, 0], sizes = [64, 162], strides = [1, 1]} : vector<72x162xf32> to vector<64x162xf32>
    %c3_32 = arith.constant 3 : index
    %c0_33 = arith.constant 0 : index
    %c0_34 = arith.constant 0 : index
    %53 = vector.load %arg4[%c3_32, %c0_33, %c0_34] : memref<5x162x160xf32, #tpu.memory_space<vmem>>, vector<1x162x160xf32>
    %54 = vector.shape_cast %53 : vector<1x162x160xf32> to vector<162x160xf32>
    %cst_35 = arith.constant dense<0.000000e+00> : vector<64x160xf32>
    %55 = tpu.matmul %52, %54, %cst_35 {dimension_numbers = #tpu.dot_dimension_numbers<[1], [0], [0], [1], [0, 0, 1, 1], [], []>} : vector<64x162xf32>, vector<162x160xf32>, vector<64x160xf32> -> vector<64x160xf32>
    %56 = arith.addf %51, %55 : vector<64x160xf32>
    %57 = vector.extract_strided_slice %37 {offsets = [8, 0], sizes = [64, 162], strides = [1, 1]} : vector<72x162xf32> to vector<64x162xf32>
    %c4_36 = arith.constant 4 : index
    %c0_37 = arith.constant 0 : index
    %c0_38 = arith.constant 0 : index
    %58 = vector.load %arg4[%c4_36, %c0_37, %c0_38] : memref<5x162x160xf32, #tpu.memory_space<vmem>>, vector<1x162x160xf32>
    %59 = vector.shape_cast %58 : vector<1x162x160xf32> to vector<162x160xf32>
    %cst_39 = arith.constant dense<0.000000e+00> : vector<64x160xf32>
    %60 = tpu.matmul %57, %59, %cst_39 {dimension_numbers = #tpu.dot_dimension_numbers<[1], [0], [0], [1], [0, 0, 1, 1], [], []>} : vector<64x162xf32>, vector<162x160xf32>, vector<64x160xf32> -> vector<64x160xf32>
    %61 = arith.addf %56, %60 : vector<64x160xf32>
    %c0_40 = arith.constant 0 : index
    %c0_41 = arith.constant 0 : index
    %62 = vector.load %arg5[%c0_40, %c0_41] : memref<1x160xf32, #tpu.memory_space<vmem>>, vector<1x160xf32>
    %63 = vector.broadcast %62 : vector<1x160xf32> to vector<64x160xf32>
    %64 = arith.addf %61, %63 : vector<64x160xf32>
    %cst_42 = arith.constant 0.000000e+00 : f32
    %65 = vector.broadcast %cst_42 : f32 to vector<64x160xf32>
    %66 = arith.maximumf %64, %65 : vector<64x160xf32>
    %67 = vector.extract_strided_slice %66 {offsets = [0, 0], sizes = [64, 144], strides = [1, 1]} : vector<64x160xf32> to vector<64x144xf32>
    %68 = vector.extract_strided_slice %66 {offsets = [0, 16], sizes = [64, 144], strides = [1, 1]} : vector<64x160xf32> to vector<64x144xf32>
    %69 = arith.maximumf %67, %68 : vector<64x144xf32>
    %70 = vector.extract_strided_slice %69 {offsets = [0, 0], sizes = [56, 144], strides = [1, 1]} : vector<64x144xf32> to vector<56x144xf32>
    %71 = vector.extract_strided_slice %69 {offsets = [2, 0], sizes = [56, 144], strides = [1, 1]} : vector<64x144xf32> to vector<56x144xf32>
    %72 = arith.maximumf %70, %71 : vector<56x144xf32>
    %73 = vector.extract_strided_slice %72 {offsets = [0, 0], sizes = [40, 144], strides = [1, 1]} : vector<56x144xf32> to vector<40x144xf32>
    %c0_43 = arith.constant 0 : index
    %c0_44 = arith.constant 0 : index
    %c0_45 = arith.constant 0 : index
    %74 = vector.load %arg6[%c0_43, %c0_44, %c0_45] : memref<5x144x128xf32, #tpu.memory_space<vmem>>, vector<1x144x128xf32>
    %75 = vector.shape_cast %74 : vector<1x144x128xf32> to vector<144x128xf32>
    %cst_46 = arith.constant dense<0.000000e+00> : vector<40x128xf32>
    %76 = tpu.matmul %73, %75, %cst_46 {dimension_numbers = #tpu.dot_dimension_numbers<[1], [0], [0], [1], [0, 0, 1, 1], [], []>} : vector<40x144xf32>, vector<144x128xf32>, vector<40x128xf32> -> vector<40x128xf32>
    %77 = vector.extract_strided_slice %72 {offsets = [4, 0], sizes = [40, 144], strides = [1, 1]} : vector<56x144xf32> to vector<40x144xf32>
    %c1_47 = arith.constant 1 : index
    %c0_48 = arith.constant 0 : index
    %c0_49 = arith.constant 0 : index
    %78 = vector.load %arg6[%c1_47, %c0_48, %c0_49] : memref<5x144x128xf32, #tpu.memory_space<vmem>>, vector<1x144x128xf32>
    %79 = vector.shape_cast %78 : vector<1x144x128xf32> to vector<144x128xf32>
    %cst_50 = arith.constant dense<0.000000e+00> : vector<40x128xf32>
    %80 = tpu.matmul %77, %79, %cst_50 {dimension_numbers = #tpu.dot_dimension_numbers<[1], [0], [0], [1], [0, 0, 1, 1], [], []>} : vector<40x144xf32>, vector<144x128xf32>, vector<40x128xf32> -> vector<40x128xf32>
    %81 = arith.addf %76, %80 : vector<40x128xf32>
    %82 = vector.extract_strided_slice %72 {offsets = [8, 0], sizes = [40, 144], strides = [1, 1]} : vector<56x144xf32> to vector<40x144xf32>
    %c2_51 = arith.constant 2 : index
    %c0_52 = arith.constant 0 : index
    %c0_53 = arith.constant 0 : index
    %83 = vector.load %arg6[%c2_51, %c0_52, %c0_53] : memref<5x144x128xf32, #tpu.memory_space<vmem>>, vector<1x144x128xf32>
    %84 = vector.shape_cast %83 : vector<1x144x128xf32> to vector<144x128xf32>
    %cst_54 = arith.constant dense<0.000000e+00> : vector<40x128xf32>
    %85 = tpu.matmul %82, %84, %cst_54 {dimension_numbers = #tpu.dot_dimension_numbers<[1], [0], [0], [1], [0, 0, 1, 1], [], []>} : vector<40x144xf32>, vector<144x128xf32>, vector<40x128xf32> -> vector<40x128xf32>
    %86 = arith.addf %81, %85 : vector<40x128xf32>
    %87 = vector.extract_strided_slice %72 {offsets = [12, 0], sizes = [40, 144], strides = [1, 1]} : vector<56x144xf32> to vector<40x144xf32>
    %c3_55 = arith.constant 3 : index
    %c0_56 = arith.constant 0 : index
    %c0_57 = arith.constant 0 : index
    %88 = vector.load %arg6[%c3_55, %c0_56, %c0_57] : memref<5x144x128xf32, #tpu.memory_space<vmem>>, vector<1x144x128xf32>
    %89 = vector.shape_cast %88 : vector<1x144x128xf32> to vector<144x128xf32>
    %cst_58 = arith.constant dense<0.000000e+00> : vector<40x128xf32>
    %90 = tpu.matmul %87, %89, %cst_58 {dimension_numbers = #tpu.dot_dimension_numbers<[1], [0], [0], [1], [0, 0, 1, 1], [], []>} : vector<40x144xf32>, vector<144x128xf32>, vector<40x128xf32> -> vector<40x128xf32>
    %91 = arith.addf %86, %90 : vector<40x128xf32>
    %92 = vector.extract_strided_slice %72 {offsets = [16, 0], sizes = [40, 144], strides = [1, 1]} : vector<56x144xf32> to vector<40x144xf32>
    %c4_59 = arith.constant 4 : index
    %c0_60 = arith.constant 0 : index
    %c0_61 = arith.constant 0 : index
    %93 = vector.load %arg6[%c4_59, %c0_60, %c0_61] : memref<5x144x128xf32, #tpu.memory_space<vmem>>, vector<1x144x128xf32>
    %94 = vector.shape_cast %93 : vector<1x144x128xf32> to vector<144x128xf32>
    %cst_62 = arith.constant dense<0.000000e+00> : vector<40x128xf32>
    %95 = tpu.matmul %92, %94, %cst_62 {dimension_numbers = #tpu.dot_dimension_numbers<[1], [0], [0], [1], [0, 0, 1, 1], [], []>} : vector<40x144xf32>, vector<144x128xf32>, vector<40x128xf32> -> vector<40x128xf32>
    %96 = arith.addf %91, %95 : vector<40x128xf32>
    %c0_63 = arith.constant 0 : index
    %c0_64 = arith.constant 0 : index
    %97 = vector.load %arg7[%c0_63, %c0_64] : memref<1x128xf32, #tpu.memory_space<vmem>>, vector<1x128xf32>
    %98 = vector.broadcast %97 : vector<1x128xf32> to vector<40x128xf32>
    %99 = arith.addf %96, %98 : vector<40x128xf32>
    %cst_65 = arith.constant 0.000000e+00 : f32
    %100 = vector.broadcast %cst_65 : f32 to vector<40x128xf32>
    %101 = arith.maximumf %99, %100 : vector<40x128xf32>
    %c0_66 = arith.constant 0 : index
    %c0_67 = arith.constant 0 : index
    %102 = vector.load %arg8[%c0_66, %c0_67] : memref<128x128xf32, #tpu.memory_space<vmem>>, vector<128x128xf32>
    %cst_68 = arith.constant dense<0.000000e+00> : vector<40x128xf32>
    %103 = tpu.matmul %101, %102, %cst_68 {dimension_numbers = #tpu.dot_dimension_numbers<[1], [0], [0], [1], [0, 0, 1, 1], [], []>} : vector<40x128xf32>, vector<128x128xf32>, vector<40x128xf32> -> vector<40x128xf32>
    %c0_69 = arith.constant 0 : index
    %c0_70 = arith.constant 0 : index
    %104 = vector.load %arg9[%c0_69, %c0_70] : memref<1x128xf32, #tpu.memory_space<vmem>>, vector<1x128xf32>
    %105 = vector.broadcast %104 : vector<1x128xf32> to vector<40x128xf32>
    %106 = arith.addf %103, %105 : vector<40x128xf32>
    %cst_71 = arith.constant 0.000000e+00 : f32
    %107 = vector.broadcast %cst_71 : f32 to vector<40x128xf32>
    %108 = arith.maximumf %106, %107 : vector<40x128xf32>
    %c0_72 = arith.constant 0 : index
    %c0_73 = arith.constant 0 : index
    %109 = vector.load %arg10[%c0_72, %c0_73] : memref<128x128xf32, #tpu.memory_space<vmem>>, vector<128x128xf32>
    %cst_74 = arith.constant dense<0.000000e+00> : vector<40x128xf32>
    %110 = tpu.matmul %108, %109, %cst_74 {dimension_numbers = #tpu.dot_dimension_numbers<[1], [0], [0], [1], [0, 0, 1, 1], [], []>} : vector<40x128xf32>, vector<128x128xf32>, vector<40x128xf32> -> vector<40x128xf32>
    %c0_75 = arith.constant 0 : index
    %c0_76 = arith.constant 0 : index
    %111 = vector.load %arg11[%c0_75, %c0_76] : memref<1x128xf32, #tpu.memory_space<vmem>>, vector<1x128xf32>
    %112 = vector.broadcast %111 : vector<1x128xf32> to vector<40x128xf32>
    %113 = arith.addf %110, %112 : vector<40x128xf32>
    %114 = tpu.iota {dimensions = array<i32: 0>} : vector<2x40xi32>
    %115 = tpu.iota {dimensions = array<i32: 1>} : vector<2x40xi32>
    %c32_i32 = arith.constant 32 : i32
    %116 = vector.broadcast %c32_i32 : i32 to vector<2x40xi32>
    %117 = arith.muli %114, %116 : vector<2x40xi32>
    %118 = arith.cmpi eq, %115, %117 : vector<2x40xi32>
    %119 = arith.extui %118 : vector<2x40xi1> to vector<2x40xi32>
    %120 = arith.sitofp %119 : vector<2x40xi32> to vector<2x40xf32>
    %cst_77 = arith.constant dense<0.000000e+00> : vector<2x128xf32>
    %121 = tpu.matmul %120, %113, %cst_77 {dimension_numbers = #tpu.dot_dimension_numbers<[1], [0], [0], [1], [0, 0, 1, 1], [], []>} : vector<2x40xf32>, vector<40x128xf32>, vector<2x128xf32> -> vector<2x128xf32>
    %c0_78 = arith.constant 0 : index
    %c0_79 = arith.constant 0 : index
    %c0_80 = arith.constant 0 : index
    %122 = vector.load %arg12[%c0_78, %c0_79, %c0_80] : memref<1x2x128xf32, #tpu.memory_space<vmem>>, vector<1x2x128xf32>
    %123 = vector.shape_cast %122 : vector<1x2x128xf32> to vector<2x128xf32>
    %124 = vector.shape_cast %121 : vector<2x128xf32> to vector<1x2x128xf32>
    tpu.vector_store %arg12[%c0_78, %c0_79, %c0_80], %124 {strides = array<i32>} : memref<1x2x128xf32, #tpu.memory_space<vmem>>, vector<1x2x128xf32>,
    return
  }
  func.func @transform_0(%arg0: i32) -> (i32, i32) {
    %c0_i32 = arith.constant 0 : i32
    %c0_i32_0 = arith.constant 0 : i32
    return %arg0, %c0_i32 : i32, i32
  }
  func.func @transform_1(%arg0: i32) -> (i32, i32, i32) {
    %c0_i32 = arith.constant 0 : i32
    %c0_i32_0 = arith.constant 0 : i32
    %c0_i32_1 = arith.constant 0 : i32
    %c0_i32_2 = arith.constant 0 : i32
    return %c0_i32, %c0_i32_0, %c0_i32_1 : i32, i32, i32
  }
  func.func @transform_2(%arg0: i32) -> (i32, i32) {
    %c0_i32 = arith.constant 0 : i32
    %c0_i32_0 = arith.constant 0 : i32
    %c0_i32_1 = arith.constant 0 : i32
    return %c0_i32, %c0_i32_0 : i32, i32
  }
  func.func @transform_3(%arg0: i32) -> (i32, i32, i32) {
    %c0_i32 = arith.constant 0 : i32
    %c0_i32_0 = arith.constant 0 : i32
    %c0_i32_1 = arith.constant 0 : i32
    %c0_i32_2 = arith.constant 0 : i32
    return %c0_i32, %c0_i32_0, %c0_i32_1 : i32, i32, i32
  }
  func.func @transform_4(%arg0: i32) -> (i32, i32) {
    %c0_i32 = arith.constant 0 : i32
    %c0_i32_0 = arith.constant 0 : i32
    %c0_i32_1 = arith.constant 0 : i32
    return %c0_i32, %c0_i32_0 : i32, i32
  }
  func.func @transform_5(%arg0: i32) -> (i32, i32, i32) {
    %c0_i32 = arith.constant 0 : i32
    %c0_i32_0 = arith.constant 0 : i32
    %c0_i32_1 = arith.constant 0 : i32
    %c0_i32_2 = arith.constant 0 : i32
    return %c0_i32, %c0_i32_0, %c0_i32_1 : i32, i32, i32
  }
  func.func @transform_6(%arg0: i32) -> (i32, i32) {
    %c0_i32 = arith.constant 0 : i32
    %c0_i32_0 = arith.constant 0 : i32
    %c0_i32_1 = arith.constant 0 : i32
    return %c0_i32, %c0_i32_0 : i32, i32
  }
  func.func @transform_7(%arg0: i32) -> (i32, i32) {
    %c0_i32 = arith.constant 0 : i32
    %c0_i32_0 = arith.constant 0 : i32
    %c0_i32_1 = arith.constant 0 : i32
    return %c0_i32, %c0_i32_0 : i32, i32
  }
  func.func @transform_8(%arg0: i32) -> (i32, i32) {
    %c0_i32 = arith.constant 0 : i32
    %c0_i32_0 = arith.constant 0 : i32
    %c0_i32_1 = arith.constant 0 : i32
    return %c0_i32, %c0_i32_0 : i32, i32
  }
  func.func @transform_9(%arg0: i32) -> (i32, i32) {
    %c0_i32 = arith.constant 0 : i32
    %c0_i32_0 = arith.constant 0 : i32
    %c0_i32_1 = arith.constant 0 : i32
    return %c0_i32, %c0_i32_0 : i32, i32
  }
  func.func @transform_10(%arg0: i32) -> (i32, i32) {
    %c0_i32 = arith.constant 0 : i32
    %c0_i32_0 = arith.constant 0 : i32
    %c0_i32_1 = arith.constant 0 : i32
    return %c0_i32, %c0_i32_0 : i32, i32
  }
  func.func @transform_11(%arg0: i32) -> (i32, i32, i32) {
    %c0_i32 = arith.constant 0 : i32
    %c0_i32_0 = arith.constant 0 : i32
    %c0_i32_1 = arith.constant 0 : i32
    return %arg0, %c0_i32, %c0_i32_0 : i32, i32, i32
  }
}

</mosaic_0001>

<bundles_post_ra>
// kernel: lenet5_forward.1
= control target key start
LH: loop header
LB: loop body
LE: loop exit
PB: predicated region body
PF: predicated region fallthrough
CT: control target
= control target key end

     0   :  { %v7367_v4 = vmov 0.0   ;;  %vm436_vm0 = vcmask 1045504   ;;  %vm105_vm1 = vcmask 1046528   ;;  %vm850_vm2 = vcmask 1043456   ;;  %s7355_s0 = inlined_call_operand.vmem [shape: f32[64,96], index: 0, kind: input, shape index: {}]   ;;  %s7356_s1 = inlined_call_operand.vmem [shape: f32[5,96,168], index: 1, kind: input, shape index: {}]   ;;  %s7357_s2 = inlined_call_operand.vmem [shape: f32[1,168], index: 2, kind: input, shape index: {}]   ;;  %s7358_s3 = inlined_call_operand.vmem [shape: f32[5,162,160], index: 3, kind: input, shape index: {}]   ;;  %s7359_s4 = inlined_call_operand.vmem [shape: f32[1,160], index: 4, kind: input, shape index: {}]   ;;  %s7360_s5 = inlined_call_operand.vmem [shape: f32[5,144,128], index: 5, kind: input, shape index: {}]   ;;  %s7361_s6 = inlined_call_operand.vmem [shape: f32[1,128], index: 6, kind: input, shape index: {}]   ;;  %s7362_s7 = inlined_call_operand.vmem [shape: f32[128,128], index: 7, kind: input, shape index: {}]   ;;  %s7363_s8 = inlined_call_operand.vmem [shape: f32[1,128], index: 8, kind: input, shape index: {}]   ;;  %s7364_s9 = inlined_call_operand.vmem [shape: f32[128,128], index: 9, kind: input, shape index: {}]   ;;  %s7365_s10 = inlined_call_operand.vmem [shape: f32[1,128], index: 10, kind: input, shape index: {}]   ;;  %s7366_s11 = inlined_call_operand.hbm [shape: f32[1,2,128], index: 11, kind: output, shape index: {}]  }
   0x1   :  { %v3565_v0 = vld [vmem:[%s7356_s1 + $0x178] sm:$0xff]  ;;  %v3564_v1 = vld [vmem:[%s7356_s1 + $0x170] sm:$0xff]  ;;  %v3563_v2 = vld [vmem:[%s7356_s1 + $0x168] sm:$0xff]  ;;  %207 = vmatprep.mubr.f32.mxu0 %v7367_v4  ;;  %374 = vmatprep.mubr.f32.mxu1 %v7367_v4  ;;  %vm124_vm3 = vcmask 785408  }
   0x2   :  { %151 = vmatprep.subr.mxu0 %v3565_v0  ;;  %v3562_v3 = vld [vmem:[%s7356_s1 + $0x160] sm:$0xff]  ;;  %v3561_v5 = vld [vmem:[%s7356_s1 + $0x158] sm:$0xff]  ;;  %v3560_v6 = vld [vmem:[%s7356_s1 + $0x150] sm:$0xff] }
   0x3   :  { %152 = vmatpush1.msra.mxu0 %v3564_v1  ;;  %v3559_v7 = vld [vmem:[%s7356_s1 + $0x148] sm:$0xff]  ;;  %v3558_v8 = vld [vmem:[%s7356_s1 + $0x140] sm:$0xff]  ;;  %v4316_v9 = vld [vmem:[%s7356_s1 + $0xb8] sm:$0xff] }
   0x4   :  { %153 = vmatprep.subr.mxu0 %v3563_v2  ;;  %v3557_v10 = vld [vmem:[%s7356_s1 + $0x138] sm:$0xff]  ;;  %4161 = vmatprep.subr.mxu1 %v4316_v9  ;;  %v4325_v11 = vld [vmem:[%s7356_s1 + $0xb0] sm:$0xff]  ;;  %v4334_v13 = vld [vmem:[%s7356_s1 + $0xa8] sm:$0xff] }
   0x5   :  { %154 = vmatpush1.msra.mxu0 %v3562_v3  ;;  %v3556_v12 = vld [vmem:[%s7356_s1 + $0x130] sm:$0xff]  ;;  %4173 = vmatpush1.msra.mxu1 %v4325_v11  ;;  %v4339_v14 = vld [vmem:[%s7356_s1 + $0xa0] sm:$0xff]  ;;  %v3555_v15 = vld [vmem:[%s7356_s1 + $0x128] sm:$0xff] }
   0x6   :  { %155 = vmatprep.subr.mxu0 %v3561_v5  ;;  %4162 = vmatprep.subr.mxu1 %v4334_v13  ;;  %v4348_v16 = vld [vmem:[%s7356_s1 + $0x98] sm:$0xff]  ;;  %v3554_v17 = vld [vmem:[%s7356_s1 + $0x120] sm:$0xff]  ;;  %v4357_v18 = vld [vmem:[%s7356_s1 + $0x90] sm:$0xff] }
   0x7   :  { %156 = vmatpush1.msra.mxu0 %v3560_v6  ;;  %4174 = vmatpush1.msra.mxu1 %v4339_v14  ;;  %v4362_v19 = vld [vmem:[%s7356_s1 + $0x88] sm:$0xff]  ;;  %v3553_v20 = vld [vmem:[%s7356_s1 + $0x118] sm:$0xff]  ;;  %v4371_v21 = vld [vmem:[%s7356_s1 + $0x80] sm:$0xff] }
   0x8   :  { %157 = vmatprep.subr.mxu0 %v3559_v7  ;;  %4163 = vmatprep.subr.mxu1 %v4348_v16  ;;  %v4376_v22 = vld [vmem:[%s7355_s0] sm:$0xff]  ;;  %v3552_v23 = vld [vmem:[%s7356_s1 + $0x110] sm:$0xff]  ;;  %v4385_v24 = vld [vmem:[%s7355_s0 + $0x8] sm:$0xff] }
   0x9   :  { %158 = vmatpush1.msra.mxu0 %v3558_v8  ;;  %4175 = vmatpush1.msra.mxu1 %v4357_v18  ;;  %v4390_v25 = vld [vmem:[%s7356_s1 + $0x78] sm:$0xff]  ;;  %v437_v26 = vrot.slane %v4376_v22, 2  ;;  %v3551_v27 = vld [vmem:[%s7356_s1 + $0x108] sm:$0xff]  ;;  %v4400_v28 = vld [vmem:[%s7356_s1 + $0x70] sm:$0xff]  ;;  %v438_v30 = vrot.slane %v4385_v24, 2  ;;  %v106_v50 = vrot.slane %v4376_v22, 1 }
   0xa   :  { %159 = vmatprep.subr.mxu0 %v3557_v10  ;;  %4164 = vmatprep.subr.mxu1 %v4362_v19  ;;  %v4405_v29 = vld [vmem:[%s7355_s0 + $0x10] sm:$0xff]  ;;  %v3550_v31 = vld [vmem:[%s7356_s1 + $0x100] sm:$0xff]  ;;  %v4415_v32 = vld [vmem:[%s7356_s1 + $0x68] sm:$0xff]  ;;  %v107_v51 = vrot.slane %v4385_v24, 1  ;;  %v851_v58 = vrot.slane %v4376_v22, 4  ;;  %v852_v59 = vrot.slane %v4385_v24, 4 }
   0xb   :  { %160 = vmatpush1.msra.mxu0 %v3556_v12  ;;  %4176 = vmatpush1.msra.mxu1 %v4371_v21  ;;  %v440_v33 = vrot.slane %v4405_v29, 2  ;;  %v3549_v34 = vld [vmem:[%s7356_s1 + $0xf8] sm:$0xff]  ;;  %v4425_v35 = vld [vmem:[%s7356_s1 + $0x60] sm:$0xff]  ;;  %v4428_v36 = vsel %vm436_vm0, %v437_v26, %v438_v30  ;;  %v3548_v37 = vld [vmem:[%s7356_s1 + $0xf0] sm:$0xff]  ;;  %v109_v1 = vrot.slane %v4405_v29, 1  ;;  %v854_v12 = vrot.slane %v4405_v29, 4 }
   0xc   :  { %161 = vmatprep.subr.mxu0 %v3555_v15  ;;  %4165 = vmatprep.subr.mxu1 %v4390_v25  ;;  %v4437_v38 = vld [vmem:[%s7356_s1 + $0x58] sm:$0xff]  ;;  %v3547_v41 = vld [vmem:[%s7356_s1 + $0xe8] sm:$0xff]  ;;  %v4454_v42 = vld [vmem:[%s7356_s1 + $0x50] sm:$0xff]  ;;  %v108_v6 = vsel %vm105_vm1, %v106_v50, %v107_v51  ;;  %v4547_v10 = vsel %vm850_vm2, %v851_v58, %v852_v59 }
   0xd   :  { %162 = vmatpush1.msra.mxu0 %v3554_v17  ;;  %4177 = vmatpush1.msra.mxu1 %v4400_v28  ;;  %v4442_v39 = vld [vmem:[%s7355_s0 + $0x18] sm:$0xff]  ;;  %v4445_v40 = vsel %vm436_vm0, %v438_v30, %v440_v33  ;;  %v4459_v43 = vld [vmem:[%s7355_s0 + $0x20] sm:$0xff]  ;;  %v4469_v46 = vld [vmem:[%s7356_s1 + $0x48] sm:$0xff]  ;;  %v110_v26 = vsel %vm105_vm1, %v107_v51, %v109_v1 }
   0xe   :  { %163 = vmatprep.subr.mxu0 %v3553_v20  ;;  %4166 = vmatprep.subr.mxu1 %v4415_v32  ;;  %v442_v44 = vrot.slane %v4442_v39, 2  ;;  %v3546_v45 = vld [vmem:[%s7356_s1 + $0xe0] sm:$0xff]  ;;  %v4474_v47 = vld [vmem:[%s7355_s0 + $0x28] sm:$0xff]  ;;  %v444_v48 = vrot.slane %v4459_v43, 2  ;;  %v3545_v49 = vld [vmem:[%s7356_s1 + $0xd8] sm:$0xff]  ;;  %v856_v15 = vrot.slane %v4442_v39, 4 }
   0xf   :  { %164 = vmatpush1.msra.mxu0 %v3552_v23  ;;  %4178 = vmatpush1.msra.mxu1 %v4425_v35  ;;  %v4486_v52 = vld [vmem:[%s7356_s1 + $0x40] sm:$0xff]  ;;  %v446_v54 = vrot.slane %v4474_v47, 2  ;;  %v3544_v55 = vld [vmem:[%s7356_s1 + $0xd0] sm:$0xff]  ;;  %v4499_v56 = vld [vmem:[%s7356_s1 + $0x38] sm:$0xff]  ;;  %v858_v23 = vrot.slane %v4459_v43, 4  ;;  %v113_v50 = vrot.slane %v4459_v43, 1 }
  0x10   :  { %165 = vmatprep.subr.mxu0 %v3551_v27  ;;  %4167 = vmatprep.subr.mxu1 %v4437_v38  ;;  %v4489_v53 = vsel %vm436_vm0, %v440_v33, %v442_v44  ;;  %v4502_v57 = vsel %vm436_vm0, %v442_v44, %v444_v48  ;;  %v3543_v60 = vld [vmem:[%s7356_s1 + $0xc8] sm:$0xff]  ;;  %v4513_v61 = vld [vmem:[%s7356_s1 + $0x30] sm:$0xff]  ;;  %v3542_v0 = vld [vmem:[%s7356_s1 + $0xc0] sm:$0xff]  ;;  %v111_v27 = vrot.slane %v4442_v39, 1  ;;  %v860_v33 = vrot.slane %v4474_v47, 4 }
  0x11   :  { %166 = vmatpush1.msra.mxu0 %v3550_v31  ;;  %4179 = vmatpush1.msra.mxu1 %v4454_v42  ;;  %v4518_v62 = vld [vmem:[%s7355_s0 + $0x30] sm:$0xff]  ;;  %v4521_v63 = vsel %vm436_vm0, %v444_v48, %v446_v54  ;;  %v4531_v2 = vld [vmem:[%s7356_s1 + $0x28] sm:$0xff]  ;;  %v4536_v3 = vld [vmem:[%s7355_s0 + $0x38] sm:$0xff]  ;;  %v4573_v31 = vsel %vm850_vm2, %v852_v59, %v854_v12 }
  0x12   :  { %167 = vmatprep.subr.mxu0 %v3549_v34  ;;  %4168 = vmatprep.subr.mxu1 %v4469_v46  ;;  %v448_v5 = vrot.slane %v4518_v62, 2  ;;  %v450_v7 = vrot.slane %v4536_v3, 2  ;;  %v4555_v17 = vld [vmem:[%s7356_s1 + $0x20] sm:$0xff]  ;;  %v4570_v30 = vld [vmem:[%s7356_s1 + $0x18] sm:$0xff]  ;;  %v4581_v34 = vld [vmem:[%s7356_s1 + $0x10] sm:$0xff]  ;;  %v864_v44 = vrot.slane %v4536_v3, 4 }
  0x13   :  { %168 = vmatpush1.msra.mxu0 %v3548_v37  ;;  %4180 = vmatpush1.msra.mxu1 %v4486_v52  ;;  %v4587_v37 = vsel %vm850_vm2, %v856_v15, %v858_v23  ;;  %v4606_v48 = vld [vmem:[%s7356_s1] sm:$0xff]  ;;  %v3641_v51 = vld [vmem:[%s7356_s1 + $0x2f8] sm:$0xff] }
  0x14   :  { %169 = vmatprep.subr.mxu0 %v3547_v41  ;;  %4169 = vmatprep.subr.mxu1 %v4499_v56  ;;  %v4544_v8 = vsel %vm436_vm0, %v446_v54, %v448_v5  ;;  %v4560_v20 = vsel %vm436_vm0, %v448_v5, %v450_v7  ;;  %v862_v41 = vrot.slane %v4518_v62, 4  ;;  %v114_v54 = vsel %vm105_vm1, %v111_v27, %v113_v50 }
  0x15   :  { %170 = vmatpush1.msra.mxu0 %v3546_v45  ;;  %4181 = vmatpush1.msra.mxu1 %v4513_v61  ;;  %v4599_v45 = vsel %vm850_vm2, %v858_v23, %v860_v33 }
  0x16   :  { %171 = vmatprep.subr.mxu0 %v3545_v49  ;;  %4170 = vmatprep.subr.mxu1 %v4531_v2  ;;  %v4609_v49 = vsel %vm850_vm2, %v860_v33, %v862_v41 }
  0x17   :  { %172 = vmatpush1.msra.mxu0 %v3544_v55  ;;  %4182 = vmatpush1.msra.mxu1 %v4555_v17  ;;  %v115_v55 = vrot.slane %v4474_v47, 1 }
  0x18   :  { %173 = vmatprep.subr.mxu0 %v3543_v60  ;;  %4171 = vmatprep.subr.mxu1 %v4570_v30 }
  0x19   :  { %174 = vmatpush1.msra.mxu0 %v3542_v0  ;;  %4183 = vmatpush1.msra.mxu1 %v4581_v34 }
  0x1a   :  { %3566 = vmatmul.mubr.msk.f32.vlgmr.msra.gmra.mxu0 %vm124_vm3, %v108_v6  ;;  %294 = vmatprep.subr.mxu0 %v4316_v9  ;;  %v4584_v9 = vsel %vm850_vm2, %v854_v12, %v856_v15 }
  0x1b   :  { %213 = vmatprep.mubr.f32.mxu0 %v7367_v4  ;;  %295 = vmatpush1.msra.mxu0 %v4325_v11  ;;  %v4596_v11 = vld [vmem:[%s7356_s1 + $0x8] sm:$0xff] }
  0x1c   :  { %296 = vmatprep.subr.mxu0 %v4334_v13  ;;  %v4614_v13 = vsel %vm850_vm2, %v862_v41, %v864_v44  ;;  %4172 = vmatprep.subr.mxu1 %v4596_v11 }
  0x1d   :  { %297 = vmatpush1.msra.mxu0 %v4339_v14  ;;  %v112_v14 = vsel %vm105_vm1, %v109_v1, %v111_v27  ;;  %4184 = vmatpush1.msra.mxu1 %v4606_v48 }
  0x1e   :  { %3567 = vmatmul.mubr.msk.f32.gmra.mxu0 %vm124_vm3, %v110_v26  ;;  %298 = vmatprep.subr.mxu0 %v4348_v16  ;;  %v3640_v16 = vld [vmem:[%s7356_s1 + $0x2f0] sm:$0xff] }
  0x1f   :  { %219 = vmatprep.mubr.f32.mxu0 %v7367_v4  ;;  %3580 = vmatmul.mubr.msk.f32.vlgmr.msra.gmra.mxu1 %vm124_vm3, %v4459_v43 }
  0x20   :  { %299 = vmatpush1.msra.mxu0 %v4357_v18  ;;  %380 = vmatprep.mubr.f32.mxu1 %v7367_v4  ;;  %v116_v18 = vsel %vm105_vm1, %v113_v50, %v115_v55 }
  0x21   :  { %300 = vmatprep.subr.mxu0 %v4362_v19  ;;  %688 = vmatprep.subr.mxu1 %v3641_v51  ;;  %v117_v19 = vrot.slane %v4518_v62, 1 }
  0x22   :  { %3568 = vmatmul.mubr.msk.f32.gmra.mxu0 %vm124_vm3, %v112_v14  ;;  %689 = vmatpush1.msra.mxu1 %v3640_v16 }
  0x23   :  { %225 = vmatprep.mubr.f32.mxu0 %v7367_v4  ;;  %301 = vmatpush1.msra.mxu0 %v4371_v21  ;;  %v3639_v21 = vld [vmem:[%s7356_s1 + $0x2e8] sm:$0xff] }
  0x24   :  { %3581 = vmatmul.mubr.msk.f32.gmra.mxu1 %vm124_vm3, %v4474_v47  ;;  %302 = vmatprep.subr.mxu0 %v4390_v25  ;;  %v118_v25 = vsel %vm105_vm1, %v115_v55, %v117_v19 }
  0x25   :  { %386 = vmatprep.mubr.f32.mxu1 %v7367_v4  ;;  %303 = vmatpush1.msra.mxu0 %v4400_v28  ;;  %v119_v28 = vrot.slane %v4536_v3, 1 }
  0x26   :  { %3569 = vmatmul.mubr.msk.f32.gmra.mxu0 %vm124_vm3, %v114_v54  ;;  %304 = vmatprep.subr.mxu0 %v4415_v32 }
  0x27   :  { %231 = vmatprep.mubr.f32.mxu0 %v7367_v4  ;;  %305 = vmatpush1.msra.mxu0 %v4425_v35 }
  0x28   :  { %3582 = vmatmul.mubr.msk.f32.gmra.mxu1 %vm124_vm3, %v4518_v62  ;;  %306 = vmatprep.subr.mxu0 %v4437_v38 }
  0x29   :  { %392 = vmatprep.mubr.f32.mxu1 %v7367_v4 }
  0x2a   :  { %3570 = vmatmul.mubr.msk.f32.gmra.mxu0 %vm124_vm3, %v116_v18 }
  0x2b   :  { %237 = vmatprep.mubr.f32.mxu0 %v7367_v4 }
  0x2c   :  { %16 = vsyncpa [#allocation3], 0  ;;  %307 = vmatpush1.msra.mxu0 %v4454_v42  ;;  %690 = vmatprep.subr.mxu1 %v3639_v21  ;;  %v3638_v32 = vld [vmem:[%s7356_s1 + $0x2e0] sm:$0xff]  ;;  %v120_v35 = vsel %vm105_vm1, %v117_v19, %v119_v28  ;;  %v121_v38 = vrot.slane %v7367_v4, 1  ;;  %v3635_v58 = vld [vmem:[%s7356_s1 + $0x2c8] sm:$0xff]  ;;  %v644_v19 = vrot.slane %v4376_v22, 3 }
  0x2d   :  { %3583 = vmatmul.mubr.msk.f32.gmra.mxu1 %vm124_vm3, %v4536_v3  ;;  %308 = vmatprep.subr.mxu0 %v4469_v46  ;;  %v3607_v46 = vld [vmem:[%s7356_s1 + $0x238] sm:$0xff]  ;;  %v3634_v59 = vld [vmem:[%s7356_s1 + $0x2c0] sm:$0xff]  ;;  %v3631_v0 = vld [vmem:[%s7356_s1 + $0x2a8] sm:$0xff]  ;;  %v645_v21 = vrot.slane %v4385_v24, 3  ;;  %vm643_vm4 = vcmask 1044480   ;;  %vm1451_vm5 = vcmask 1041408  }
  0x2e   :  { %3571 = vmatmul.mubr.msk.f32.gmra.mxu0 %vm124_vm3, %v118_v25  ;;  %398 = vmatprep.mubr.f32.mxu1 %v7367_v4  ;;  %v122_v42 = vsel %vm105_vm1, %v119_v28, %v121_v38  ;;  %v3633_v60 = vld [vmem:[%s7356_s1 + $0x2b8] sm:$0xff]  ;;  %v3630_v1 = vld [vmem:[%s7356_s1 + $0x2a0] sm:$0xff]  ;;  %v3628_v5 = vld [vmem:[%s7356_s1 + $0x290] sm:$0xff]  ;;  %vm1144_vm6 = vcmask 998400   ;;  %vm1434_vm7 = vcmask 277504   ;;  %s4224_s16 = smov 112  }
  0x2f   :  { %243 = vmatprep.mubr.f32.mxu0 %v7367_v4  ;;  %309 = vmatpush1.msra.mxu0 %v4486_v52  ;;  %v3637_v52 = vld [vmem:[%s7356_s1 + $0x2d8] sm:$0xff]  ;;  %v3627_v6 = vld [vmem:[%s7356_s1 + $0x288] sm:$0xff]  ;;  %v3606_v12 = vld [vmem:[%s7356_s1 + $0x230] sm:$0xff]  ;;  %vm2450_vm8 = vcmask 916480   ;;  %vm2641_vm9 = vcmask 130048   ;;  %vm4225_vm10 = vmmov 0  }
  0x30   :  { %310 = vmatprep.subr.mxu0 %v4499_v56  ;;  %691 = vmatpush1.msra.mxu1 %v3638_v32  ;;  %v3636_v56 = vld [vmem:[%s7356_s1 + $0x2d0] sm:$0xff]  ;;  %v3605_v15 = vld [vmem:[%s7356_s1 + $0x228] sm:$0xff]  ;;  %v3604_v23 = vld [vmem:[%s7356_s1 + $0x220] sm:$0xff]  ;;  %vm3453_vm12 = vcmask 326656  }
  0x31   :  { %311 = vmatpush1.msra.mxu0 %v4513_v61  ;;  %399 = vmatmul.mubr.f32.gmra.mxu1 %v7367_v4  ;;  %v3632_v61 = vld [vmem:[%s7356_s1 + $0x2b0] sm:$0xff]  ;;  %v3625_v26 = vld [vmem:[%s7356_s1 + $0x278] sm:$0xff]  ;;  %v3601_v33 = vld [vmem:[%s7356_s1 + $0x208] sm:$0xff] }
  0x32   :  { %3572 = vmatmul.mubr.msk.f32.gmra.mxu0 %vm124_vm3, %v120_v35  ;;  %312 = vmatprep.subr.mxu0 %v4531_v2  ;;  %v3629_v2 = vld [vmem:[%s7356_s1 + $0x298] sm:$0xff]  ;;  %v3600_v41 = vld [vmem:[%s7356_s1 + $0x200] sm:$0xff]  ;;  %v3598_v14 = vld [vmem:[%s7356_s1 + $0x1f0] sm:$0xff] }
  0x33   :  { %249 = vmatprep.mubr.f32.mxu0 %v7367_v4  ;;  %313 = vmatpush1.msra.mxu0 %v4555_v17  ;;  %v3626_v17 = vld [vmem:[%s7356_s1 + $0x280] sm:$0xff]  ;;  %v3603_v27 = vld [vmem:[%s7356_s1 + $0x218] sm:$0xff]  ;;  %v3597_v50 = vld [vmem:[%s7356_s1 + $0x1e8] sm:$0xff] }
  0x34   :  { %314 = vmatprep.subr.mxu0 %v4570_v30  ;;  %404 = vmatprep.mubr.f32.mxu1 %v7367_v4  ;;  %v3602_v30 = vld [vmem:[%s7356_s1 + $0x210] sm:$0xff]  ;;  %v3622_v51 = vld [vmem:[%s7356_s1 + $0x260] sm:$0xff]  ;;  %v3621_v55 = vld [vmem:[%s7356_s1 + $0x258] sm:$0xff] }
  0x35   :  { %315 = vmatpush1.msra.mxu0 %v4581_v34  ;;  %405 = vmatmul.mubr.f32.gmra.mxu1 %v7367_v4  ;;  %v3624_v34 = vld [vmem:[%s7356_s1 + $0x270] sm:$0xff]  ;;  %v3596_v54 = vld [vmem:[%s7356_s1 + $0x1e0] sm:$0xff]  ;;  %v3595_v16 = vld [vmem:[%s7356_s1 + $0x1d8] sm:$0xff] }
  0x36   :  { %3573 = vmatmul.mubr.msk.f32.gmra.mxu0 %vm124_vm3, %v122_v42  ;;  %316 = vmatprep.subr.mxu0 %v4596_v11  ;;  %v3623_v11 = vld [vmem:[%s7356_s1 + $0x268] sm:$0xff]  ;;  %v3594_v18 = vld [vmem:[%s7356_s1 + $0x1d0] sm:$0xff]  ;;  %v3591_v32 = vld [vmem:[%s7356_s1 + $0x1b8] sm:$0xff]  ;;  %v646_v42 = vsel %vm643_vm4, %v644_v19, %v645_v21 }
  0x37   :  { %255 = vmatprep.mubr.f32.mxu0 %v7367_v4  ;;  %317 = vmatpush1.msra.mxu0 %v4606_v48  ;;  %v3599_v48 = vld [vmem:[%s7356_s1 + $0x1f8] sm:$0xff]  ;;  %v3593_v25 = vld [vmem:[%s7356_s1 + $0x1c8] sm:$0xff]  ;;  %v3620_v28 = vld [vmem:[%s7356_s1 + $0x250] sm:$0xff] }
  0x38   :  { %481 = vmatprep.subr.mxu0 %v3607_v46  ;;  %692 = vmatprep.subr.mxu1 %v3637_v52  ;;  %v3618_v35 = vld [vmem:[%s7356_s1 + $0x240] sm:$0xff]  ;;  %v647_v46 = vrot.slane %v4405_v29, 3  ;;  %v3589_v52 = vld [vmem:[%s7356_s1 + $0x1a8] sm:$0xff]  ;;  %v3654_v19 = vld [vmem:[%s7356_s1 + $0x310] sm:$0xff] }
  0x39   :  { %693 = vmatpush1.msra.mxu1 %v3636_v56  ;;  %744 = vmatprep.mubr.f32.mxu1 %v7367_v4  ;;  %v3588_v56 = vld [vmem:[%s7356_s1 + $0x1a0] sm:$0xff] }
  0x3a   :  { %3574 = vmatmul.mubr.msk.f32.gmra.mxu0 %vm124_vm3, %v121_v38  ;;  %694 = vmatprep.subr.mxu1 %v3635_v58  ;;  %v3587_v58 = vld [vmem:[%s7356_s1 + $0x198] sm:$0xff] }
  0x3b   :  { %261 = vmatprep.mubr.f32.mxu0 %v7367_v4  ;;  %695 = vmatpush1.msra.mxu1 %v3634_v59  ;;  %v648_v59 = vsel %vm643_vm4, %v645_v21, %v647_v46 }
  0x3c   :  { %696 = vmatprep.subr.mxu1 %v3633_v60  ;;  %v649_v60 = vrot.slane %v4442_v39, 3 }
  0x3d   :  { %697 = vmatpush1.msra.mxu1 %v3632_v61  ;;  %v3585_v61 = vld [vmem:[%s7356_s1 + $0x188] sm:$0xff] }
  0x3e   :  { %3575 = vmatmul.mubr.msk.f32.gmra.mxu0 %vm124_vm3, %v121_v38  ;;  %698 = vmatprep.subr.mxu1 %v3631_v0  ;;  %v3590_v38 = vld [vmem:[%s7356_s1 + $0x1b0] sm:$0xff]  ;;  %v3584_v0 = vld [vmem:[%s7356_s1 + $0x180] sm:$0xff] }
  0x3f   :  { %350 = vmatprep.mubr.f32.mxu0 %v7367_v4  ;;  %699 = vmatpush1.msra.mxu1 %v3630_v1  ;;  %v3675_v1 = vld [vmem:[%s7356_s1 + $0x3b8] sm:$0xff] }
  0x40   :  { %700 = vmatprep.subr.mxu1 %v3629_v2  ;;  %v651_v2 = vrot.slane %v4459_v43, 3 }
  0x41   :  { %701 = vmatpush1.msra.mxu1 %v3628_v5  ;;  %v3674_v5 = vld [vmem:[%s7356_s1 + $0x3b0] sm:$0xff] }
  0x42   :  { %3576 = vmatmul.mubr.msk.f32.vlgmr.msra.gmra.mxu0 %vm124_vm3, %v4376_v22  ;;  %702 = vmatprep.subr.mxu1 %v3627_v6  ;;  %v3592_v22 = vld [vmem:[%s7356_s1 + $0x1c0] sm:$0xff]  ;;  %v3673_v6 = vld [vmem:[%s7356_s1 + $0x3a8] sm:$0xff]  ;;  %v652_v43 = vsel %vm643_vm4, %v649_v60, %v651_v2 }
  0x43   :  { %482 = vmatpush1.msra.mxu0 %v3606_v12  ;;  %356 = vmatprep.mubr.f32.mxu0 %v7367_v4  ;;  %v653_v12 = vrot.slane %v4474_v47, 3 }
  0x44   :  { %483 = vmatprep.subr.mxu0 %v3605_v15  ;;  %703 = vmatpush1.msra.mxu1 %v3626_v17  ;;  %v3671_v15 = vld [vmem:[%s7356_s1 + $0x398] sm:$0xff]  ;;  %v3670_v17 = vld [vmem:[%s7356_s1 + $0x390] sm:$0xff] }
  0x45   :  { %484 = vmatpush1.msra.mxu0 %v3604_v23  ;;  %704 = vmatprep.subr.mxu1 %v3625_v26  ;;  %v654_v47 = vsel %vm643_vm4, %v651_v2, %v653_v12  ;;  %v3669_v23 = vld [vmem:[%s7356_s1 + $0x388] sm:$0xff]  ;;  %v3668_v26 = vld [vmem:[%s7356_s1 + $0x380] sm:$0xff] }
  0x46   :  { %485 = vmatprep.subr.mxu0 %v3603_v27  ;;  %3577 = vmatmul.mubr.msk.f32.gmra.mxu0 %vm124_vm3, %v4385_v24  ;;  %v3619_v24 = vld [vmem:[%s7356_s1 + $0x248] sm:$0xff]  ;;  %v657_v27 = vrot.slane %v4536_v3, 3 }
  0x47   :  { %486 = vmatpush1.msra.mxu0 %v3602_v30  ;;  %362 = vmatprep.mubr.f32.mxu0 %v7367_v4  ;;  %v3666_v30 = vld [vmem:[%s7356_s1 + $0x370] sm:$0xff]  ;;  %v1314_v2 = vld [vmem:[%s7358_s3 + $0xc8] sm:$0xff] }
  0x48   :  { %487 = vmatprep.subr.mxu0 %v3601_v33  ;;  %705 = vmatpush1.msra.mxu1 %v3624_v34  ;;  %v3665_v33 = vld [vmem:[%s7356_s1 + $0x368] sm:$0xff]  ;;  %v3664_v34 = vld [vmem:[%s7356_s1 + $0x360] sm:$0xff] }
  0x49   :  { %488 = vmatpush1.msra.mxu0 %v3600_v41  ;;  %706 = vmatprep.subr.mxu1 %v3623_v11  ;;  %v3663_v41 = vld [vmem:[%s7356_s1 + $0x358] sm:$0xff]  ;;  %v659_v11 = vrot.slane %v7367_v4, 3 }
  0x4a   :  { %489 = vmatprep.subr.mxu0 %v3599_v48  ;;  %3578 = vmatmul.mubr.msk.f32.gmra.mxu0 %vm124_vm3, %v4405_v29  ;;  %v3586_v29 = vld [vmem:[%s7356_s1 + $0x190] sm:$0xff] }
  0x4b   :  { %490 = vmatpush1.msra.mxu0 %v3598_v14  ;;  %368 = vmatprep.mubr.f32.mxu0 %v7367_v4  ;;  %v3662_v48 = vld [vmem:[%s7356_s1 + $0x350] sm:$0xff]  ;;  %v3661_v14 = vld [vmem:[%s7356_s1 + $0x348] sm:$0xff] }
  0x4c   :  { %491 = vmatprep.subr.mxu0 %v3597_v50  ;;  %707 = vmatpush1.msra.mxu1 %v3622_v51  ;;  %v3660_v50 = vld [vmem:[%s7356_s1 + $0x340] sm:$0xff]  ;;  %v3659_v51 = vld [vmem:[%s7356_s1 + $0x338] sm:$0xff] }
  0x4d   :  { %492 = vmatpush1.msra.mxu0 %v3596_v54  ;;  %708 = vmatprep.subr.mxu1 %v3621_v55  ;;  %v3658_v54 = vld [vmem:[%s7356_s1 + $0x330] sm:$0xff]  ;;  %v452_v55 = vrot.slane %v7367_v4, 2 }
  0x4e   :  { %493 = vmatprep.subr.mxu0 %v3595_v16  ;;  %3579 = vmatmul.mubr.msk.f32.gmra.mxu0 %vm124_vm3, %v4442_v39  ;;  %v650_v39 = vsel %vm643_vm4, %v647_v46, %v649_v60  ;;  %v3657_v16 = vld [vmem:[%s7356_s1 + $0x328] sm:$0xff] }
  0x4f   :  { %494 = vmatpush1.msra.mxu0 %v3594_v18  ;;  %537 = vmatprep.mubr.f32.mxu0 %v7367_v4  ;;  %v3655_v18 = vld [vmem:[%s7356_s1 + $0x318] sm:$0xff]  ;;  %v453_v21 = vsel %vm436_vm0, %v450_v7, %v452_v55  ;;  %v866_v7 = vrot.slane %v7367_v4, 4  ;;  %v1318_v46 = vld [vmem:[%s7358_s3 + $0xe8] sm:$0xff] }
  0x50   :  { %495 = vmatprep.subr.mxu0 %v3593_v25  ;;  %709 = vmatpush1.msra.mxu1 %v3620_v28  ;;  %v3653_v25 = vld [vmem:[%s7356_s1 + $0x308] sm:$0xff] }
  0x51   :  { %496 = vmatpush1.msra.mxu0 %v3592_v22  ;;  %710 = vmatprep.subr.mxu1 %v3619_v24 }
  0x52   :  { %497 = vmatprep.subr.mxu0 %v3591_v32  ;;  %711 = vmatpush1.msra.mxu1 %v3618_v35 }
  0x53   :  { %498 = vmatpush1.msra.mxu0 %v3590_v38  ;;  %3642 = vmatmul.mubr.msk.f32.vlgmr.msra.gmra.mxu1 %vm124_vm3, %v646_v42  ;;  %v1320_v38 = vld [vmem:[%s7358_s3 + $0xf8] sm:$0xff]  ;;  %v1319_v42 = vld [vmem:[%s7358_s3 + $0xf0] sm:$0xff] }
  0x54   :  { %499 = vmatprep.subr.mxu0 %v3589_v52  ;;  %750 = vmatprep.mubr.f32.mxu1 %v7367_v4 }
  0x55   :  { %500 = vmatpush1.msra.mxu0 %v3588_v56  ;;  %v1317_v56 = vld [vmem:[%s7358_s3 + $0xe0] sm:$0xff] }
  0x56   :  { %501 = vmatprep.subr.mxu0 %v3587_v58  ;;  %v3717_v58 = vld [vmem:[%s7358_s3 + $0x248] sm:$0xff] }
  0x57   :  { %502 = vmatpush1.msra.mxu0 %v3586_v29  ;;  %3643 = vmatmul.mubr.msk.f32.gmra.mxu1 %vm124_vm3, %v648_v59  ;;  %v1316_v29 = vld [vmem:[%s7358_s3 + $0xd8] sm:$0xff]  ;;  %v3716_v59 = vld [vmem:[%s7358_s3 + $0x240] sm:$0xff] }
  0x58   :  { %503 = vmatprep.subr.mxu0 %v3585_v61  ;;  %756 = vmatprep.mubr.f32.mxu1 %v7367_v4 }
  0x59   :  { %504 = vmatpush1.msra.mxu0 %v3584_v0  ;;  %1458 = vmatprep.subr.mxu1 %v3717_v58  ;;  %v1315_v0 = vld [vmem:[%s7358_s3 + $0xd0] sm:$0xff] }
  0x5a   :  { %3608 = vmatmul.mubr.msk.f32.vlgmr.msra.gmra.mxu0 %vm124_vm3, %v4428_v36  ;;  %895 = vmatprep.subr.mxu0 %v3675_v1  ;;  %v3672_v36 = vld [vmem:[%s7356_s1 + $0x3a0] sm:$0xff]  ;;  %v3715_v1 = vld [vmem:[%s7358_s3 + $0x238] sm:$0xff] }
  0x5b   :  { %543 = vmatprep.mubr.f32.mxu0 %v7367_v4  ;;  %3644 = vmatmul.mubr.msk.f32.gmra.mxu1 %vm124_vm3, %v650_v39  ;;  %v3714_v39 = vld [vmem:[%s7358_s3 + $0x230] sm:$0xff] }
  0x5c   :  { %896 = vmatpush1.msra.mxu0 %v3674_v5  ;;  %762 = vmatprep.mubr.f32.mxu1 %v7367_v4  ;;  %v3713_v5 = vld [vmem:[%s7358_s3 + $0x228] sm:$0xff] }
  0x5d   :  { %897 = vmatprep.subr.mxu0 %v3673_v6  ;;  %1459 = vmatpush1.msra.mxu1 %v3716_v59  ;;  %v1299_v59 = vld [vmem:[%s7358_s3 + $0x50] sm:$0xff] }
  0x5e   :  { %3609 = vmatmul.mubr.msk.f32.gmra.mxu0 %vm124_vm3, %v4445_v40  ;;  %v655_v40 = vrot.slane %v4518_v62, 3  ;;  %1460 = vmatprep.subr.mxu1 %v3715_v1  ;;  %v1298_v1 = vld [vmem:[%s7358_s3 + $0x48] sm:$0xff] }
  0x5f   :  { %549 = vmatprep.mubr.f32.mxu0 %v7367_v4  ;;  %3645 = vmatmul.mubr.msk.f32.gmra.mxu1 %vm124_vm3, %v652_v43  ;;  %v1313_v43 = vld [vmem:[%s7358_s3 + $0xc0] sm:$0xff] }
  0x60   :  { %898 = vmatpush1.msra.mxu0 %v3672_v36  ;;  %768 = vmatprep.mubr.f32.mxu1 %v7367_v4  ;;  %v656_v62 = vsel %vm643_vm4, %v653_v12, %v655_v40  ;;  %v3712_v12 = vld [vmem:[%s7358_s3 + $0x220] sm:$0xff]  ;;  %v3711_v36 = vld [vmem:[%s7358_s3 + $0x218] sm:$0xff] }
  0x61   :  { %899 = vmatprep.subr.mxu0 %v3671_v15  ;;  %1461 = vmatpush1.msra.mxu1 %v3714_v39  ;;  %v1312_v15 = vld [vmem:[%s7358_s3 + $0xb8] sm:$0xff]  ;;  %v3696_v39 = vld [vmem:[%s7358_s3 + $0x1a0] sm:$0xff] }
  0x62   :  { %3610 = vmatmul.mubr.msk.f32.gmra.mxu0 %vm124_vm3, %v4489_v53  ;;  %v3667_v53 = vld [vmem:[%s7356_s1 + $0x378] sm:$0xff]  ;;  %1462 = vmatprep.subr.mxu1 %v3713_v5  ;;  %v1297_v5 = vld [vmem:[%s7358_s3 + $0x40] sm:$0xff] }
  0x63   :  { %555 = vmatprep.mubr.f32.mxu0 %v7367_v4  ;;  %3646 = vmatmul.mubr.msk.f32.gmra.mxu1 %vm124_vm3, %v654_v47  ;;  %v3710_v47 = vld [vmem:[%s7358_s3 + $0x210] sm:$0xff] }
  0x64   :  { %900 = vmatpush1.msra.mxu0 %v3670_v17  ;;  %774 = vmatprep.mubr.f32.mxu1 %v7367_v4 }
  0x65   :  { %901 = vmatprep.subr.mxu0 %v3669_v23  ;;  %v1311_v23 = vld [vmem:[%s7358_s3 + $0xb0] sm:$0xff]  ;;  %1463 = vmatpush1.msra.mxu1 %v3712_v12  ;;  %v1296_v12 = vld [vmem:[%s7358_s3 + $0x38] sm:$0xff] }
  0x66   :  { %3611 = vmatmul.mubr.msk.f32.gmra.mxu0 %vm124_vm3, %v4502_v57  ;;  %v658_v57 = vsel %vm643_vm4, %v655_v40, %v657_v27  ;;  %1464 = vmatprep.subr.mxu1 %v3711_v36  ;;  %v3694_v36 = vld [vmem:[%s7358_s3 + $0x190] sm:$0xff] }
  0x67   :  { %561 = vmatprep.mubr.f32.mxu0 %v7367_v4  ;;  %902 = vmatpush1.msra.mxu0 %v3668_v26  ;;  %v3709_v26 = vld [vmem:[%s7358_s3 + $0x208] sm:$0xff] }
  0x68   :  { %3647 = vmatmul.mubr.msk.f32.gmra.mxu1 %vm124_vm3, %v656_v62  ;;  %903 = vmatprep.subr.mxu0 %v3667_v53  ;;  %v1310_v62 = vld [vmem:[%s7358_s3 + $0xa8] sm:$0xff]  ;;  %v3708_v53 = vld [vmem:[%s7358_s3 + $0x200] sm:$0xff] }
  0x69   :  { %780 = vmatprep.mubr.f32.mxu1 %v7367_v4  ;;  %904 = vmatpush1.msra.mxu0 %v3666_v30  ;;  %v1309_v30 = vld [vmem:[%s7358_s3 + $0xa0] sm:$0xff] }
  0x6a   :  { %3612 = vmatmul.mubr.msk.f32.gmra.mxu0 %vm124_vm3, %v4521_v63  ;;  %905 = vmatprep.subr.mxu0 %v3665_v33  ;;  %v660_v63 = vsel %vm643_vm4, %v657_v27, %v659_v11  ;;  %v3707_v33 = vld [vmem:[%s7358_s3 + $0x1f8] sm:$0xff] }
  0x6b   :  { %567 = vmatprep.mubr.f32.mxu0 %v7367_v4  ;;  %906 = vmatpush1.msra.mxu0 %v3664_v34  ;;  %v1308_v34 = vld [vmem:[%s7358_s3 + $0x98] sm:$0xff] }
  0x6c   :  { %3648 = vmatmul.mubr.msk.f32.gmra.mxu1 %vm124_vm3, %v658_v57  ;;  %907 = vmatprep.subr.mxu0 %v3663_v41  ;;  %v3706_v57 = vld [vmem:[%s7358_s3 + $0x1f0] sm:$0xff] }
  0x6d   :  { %786 = vmatprep.mubr.f32.mxu1 %v7367_v4  ;;  %908 = vmatpush1.msra.mxu0 %v3662_v48  ;;  %v1307_v48 = vld [vmem:[%s7358_s3 + $0x90] sm:$0xff] }
  0x6e   :  { %3613 = vmatmul.mubr.msk.f32.gmra.mxu0 %vm124_vm3, %v4544_v8  ;;  %909 = vmatprep.subr.mxu0 %v3661_v14  ;;  %v3656_v8 = vld [vmem:[%s7356_s1 + $0x320] sm:$0xff]  ;;  %v3705_v14 = vld [vmem:[%s7358_s3 + $0x1e8] sm:$0xff] }
  0x6f   :  { %573 = vmatprep.mubr.f32.mxu0 %v7367_v4  ;;  %910 = vmatpush1.msra.mxu0 %v3660_v50  ;;  %v1306_v50 = vld [vmem:[%s7358_s3 + $0x88] sm:$0xff] }
  0x70   :  { %3649 = vmatmul.mubr.msk.f32.gmra.mxu1 %vm124_vm3, %v660_v63  ;;  %911 = vmatprep.subr.mxu0 %v3659_v51  ;;  %v3704_v63 = vld [vmem:[%s7358_s3 + $0x1e0] sm:$0xff] }
  0x71   :  { %792 = vmatprep.mubr.f32.mxu1 %v7367_v4  ;;  %912 = vmatpush1.msra.mxu0 %v3658_v54  ;;  %v1305_v54 = vld [vmem:[%s7358_s3 + $0x80] sm:$0xff] }
  0x72   :  { %3614 = vmatmul.mubr.msk.f32.gmra.mxu0 %vm124_vm3, %v4560_v20  ;;  %913 = vmatprep.subr.mxu0 %v3657_v16  ;;  %v3652_v20 = vld [vmem:[%s7356_s1 + $0x300] sm:$0xff]  ;;  %v1304_v16 = vld [vmem:[%s7358_s3 + $0x78] sm:$0xff] }
  0x73   :  { %579 = vmatprep.mubr.f32.mxu0 %v7367_v4  ;;  %914 = vmatpush1.msra.mxu0 %v3656_v8  ;;  %v3702_v8 = vld [vmem:[%s7358_s3 + $0x1d0] sm:$0xff] }
  0x74   :  { %3650 = vmatmul.mubr.msk.f32.gmra.mxu1 %vm124_vm3, %v659_v11  ;;  %915 = vmatprep.subr.mxu0 %v3655_v18 }
  0x75   :  { %798 = vmatprep.mubr.f32.mxu1 %v7367_v4  ;;  %916 = vmatpush1.msra.mxu0 %v3654_v19 }
  0x76   :  { %3615 = vmatmul.mubr.msk.f32.gmra.mxu0 %vm124_vm3, %v453_v21  ;;  %917 = vmatprep.subr.mxu0 %v3653_v25  ;;  %v1303_v21 = vld [vmem:[%s7358_s3 + $0x70] sm:$0xff]  ;;  %v3701_v25 = vld [vmem:[%s7358_s3 + $0x1c8] sm:$0xff] }
  0x77   :  { %585 = vmatprep.mubr.f32.mxu0 %v7367_v4  ;;  %918 = vmatpush1.msra.mxu0 %v3652_v20  ;;  %v1302_v20 = vld [vmem:[%s7358_s3 + $0x68] sm:$0xff] }
  0x78   :  { %3651 = vmatmul.mubr.msk.f32.gmra.mxu1 %vm124_vm3, %v659_v11  ;;  %1593 = vmatprep.subr.mxu0 %v1320_v38  ;;  %v1301_v38 = vld [vmem:[%s7358_s3 + $0x60] sm:$0xff] }
  0x79   :  { %1465 = vmatpush1.msra.mxu1 %v3710_v47 }
  0x7a   :  { %3616 = vmatmul.mubr.msk.f32.gmra.mxu0 %vm124_vm3, %v452_v55  ;;  %1466 = vmatprep.subr.mxu1 %v3709_v26  ;;  %v1294_v26 = vld [vmem:[%s7358_s3 + $0x28] sm:$0xff] }
  0x7b   :  { %591 = vmatprep.mubr.f32.mxu0 %v7367_v4  ;;  %1467 = vmatpush1.msra.mxu1 %v3708_v53  ;;  %v1293_v53 = vld [vmem:[%s7358_s3 + $0x20] sm:$0xff] }
  0x7c   :  { %1468 = vmatprep.subr.mxu1 %v3707_v33 }
  0x7d   :  { %1469 = vmatpush1.msra.mxu1 %v3706_v57 }
  0x7e   :  { %3617 = vmatmul.mubr.msk.f32.gmra.mxu0 %vm124_vm3, %v452_v55  ;;  %v3703_v55 = vld [vmem:[%s7358_s3 + $0x1d8] sm:$0xff]  ;;  %1470 = vmatprep.subr.mxu1 %v3705_v14 }
  0x7f   :  { %951 = vmatprep.mubr.f32.mxu0 %v7367_v4  ;;  %1471 = vmatpush1.msra.mxu1 %v3704_v63 }
  0x80   :  { %1472 = vmatprep.subr.mxu1 %v3703_v55 }
  0x81   :  { %1473 = vmatpush1.msra.mxu1 %v3702_v8 }
  0x82   :  { %3676 = vmatmul.mubr.msk.f32.vlgmr.msra.gmra.mxu0 %vm124_vm3, %v4547_v10  ;;  %v867_v10 = vsel %vm850_vm2, %v864_v44, %v866_v7  ;;  %1474 = vmatprep.subr.mxu1 %v3701_v25 }
  0x83   :  { %957 = vmatprep.mubr.f32.mxu0 %v7367_v4  ;;  %1594 = vmatpush1.msra.mxu0 %v1319_v42  ;;  %v3699_v42 = vld [vmem:[%s7358_s3 + $0x1b8] sm:$0xff] }
  0x84   :  { %1595 = vmatprep.subr.mxu0 %v1318_v46  ;;  %v1300_v46 = vld [vmem:[%s7358_s3 + $0x58] sm:$0xff] }
  0x85   :  { %1596 = vmatpush1.msra.mxu0 %v1317_v56  ;;  %v3698_v56 = vld [vmem:[%s7358_s3 + $0x1b0] sm:$0xff] }
  0x86   :  { %3677 = vmatmul.mubr.msk.f32.gmra.mxu0 %vm124_vm3, %v4573_v31  ;;  %1597 = vmatprep.subr.mxu0 %v1316_v29 }
  0x87   :  { %963 = vmatprep.mubr.f32.mxu0 %v7367_v4  ;;  %1598 = vmatpush1.msra.mxu0 %v1315_v0  ;;  %v3697_v0 = vld [vmem:[%s7358_s3 + $0x1a8] sm:$0xff] }
  0x88   :  { %1599 = vmatprep.subr.mxu0 %v1314_v2 }
  0x89   :  { %1600 = vmatpush1.msra.mxu0 %v1313_v43  ;;  %v3695_v43 = vld [vmem:[%s7358_s3 + $0x198] sm:$0xff] }
  0x8a   :  { %3678 = vmatmul.mubr.msk.f32.gmra.mxu0 %vm124_vm3, %v4584_v9  ;;  %1601 = vmatprep.subr.mxu0 %v1312_v15 }
  0x8b   :  { %969 = vmatprep.mubr.f32.mxu0 %v7367_v4  ;;  %1602 = vmatpush1.msra.mxu0 %v1311_v23  ;;  %v1295_v23 = vld [vmem:[%s7358_s3 + $0x30] sm:$0xff] }
  0x8c   :  { %1603 = vmatprep.subr.mxu0 %v1310_v62 }
  0x8d   :  { %1604 = vmatpush1.msra.mxu0 %v1309_v30  ;;  %v1292_v30 = vld [vmem:[%s7358_s3 + $0x18] sm:$0xff] }
  0x8e   :  { %3679 = vmatmul.mubr.msk.f32.gmra.mxu0 %vm124_vm3, %v4587_v37  ;;  %1605 = vmatprep.subr.mxu0 %v1308_v34 }
  0x8f   :  { %975 = vmatprep.mubr.f32.mxu0 %v7367_v4  ;;  %1606 = vmatpush1.msra.mxu0 %v1307_v48 }
  0x90   :  { %1607 = vmatprep.subr.mxu0 %v1306_v50 }
  0x91   :  { %1608 = vmatpush1.msra.mxu0 %v1305_v54 }
  0x92   :  { %3680 = vmatmul.mubr.msk.f32.gmra.mxu0 %vm124_vm3, %v4599_v45  ;;  %1609 = vmatprep.subr.mxu0 %v1304_v16 }
  0x93   :  { %981 = vmatprep.mubr.f32.mxu0 %v7367_v4  ;;  %1610 = vmatpush1.msra.mxu0 %v1303_v21 }
  0x94   :  { %1611 = vmatprep.subr.mxu0 %v1302_v20 }
  0x95   :  { %1612 = vmatpush1.msra.mxu0 %v1301_v38 }
  0x96   :  { %3681 = vmatmul.mubr.msk.f32.gmra.mxu0 %vm124_vm3, %v4609_v49  ;;  %1613 = vmatprep.subr.mxu0 %v1300_v46 }
  0x97   :  { %987 = vmatprep.mubr.f32.mxu0 %v7367_v4  ;;  %1614 = vmatpush1.msra.mxu0 %v1299_v59 }
  0x98   :  { %1615 = vmatprep.subr.mxu0 %v1298_v1 }
  0x99   :  { %1616 = vmatpush1.msra.mxu0 %v1297_v5 }
  0x9a   :  { %3682 = vmatmul.mubr.msk.f32.gmra.mxu0 %vm124_vm3, %v4614_v13  ;;  %1617 = vmatprep.subr.mxu0 %v1296_v12 }
  0x9b   :  { %993 = vmatprep.mubr.f32.mxu0 %v7367_v4  ;;  %1618 = vmatpush1.msra.mxu0 %v1295_v23 }
  0x9c   :  { %1619 = vmatprep.subr.mxu0 %v1294_v26 }
  0x9d   :  { %1620 = vmatpush1.msra.mxu0 %v1293_v53 }
  0x9e   :  { %3683 = vmatmul.mubr.msk.f32.gmra.mxu0 %vm124_vm3, %v867_v10  ;;  %1621 = vmatprep.subr.mxu0 %v1292_v30 }
  0x9f   :  { %999 = vmatprep.mubr.f32.mxu0 %v7367_v4 }
  0xa2   :  { %3684 = vmatmul.mubr.msk.f32.gmra.mxu0 %vm124_vm3, %v866_v7 }
  0xa3   :  { %1005 = vmatprep.mubr.f32.mxu0 %v7367_v4  ;;  %v7369_v4 = vlaneseq }
  0xa6   :  { %3685 = vmatmul.mubr.msk.f32.gmra.mxu0 %vm124_vm3, %v866_v7  ;;  %v3700_v7 = vld [vmem:[%s7358_s3 + $0x1c0] sm:$0xff] }
  0xa7   :  { %1475 = vmatpush1.msra.mxu1 %v3700_v7 }
  0xa8   :  { %1476 = vmatprep.subr.mxu1 %v3699_v42 }
  0xa9   :  { %1477 = vmatpush1.msra.mxu1 %v3698_v56 }
  0xaa   :  { %1478 = vmatprep.subr.mxu1 %v3697_v0 }
  0xab   :  { %1479 = vmatpush1.msra.mxu1 %v3696_v39 }
  0xac   :  { %1480 = vmatprep.subr.mxu1 %v3695_v43 }
  0xad   :  { %1481 = vmatpush1.msra.mxu1 %v3694_v36 }
  0xda   :  { %v5009_v31 = vpop.f32.mrf.mxu0 }
  0xdc   :  { %v5011_v9 = vpop.f32.mrf.mxu0 }
  0xde   :  { %v5013_v37 = vpop.f32.mrf.mxu0 }
  0xdf   :  { %v5027_v22 = vpop.f32.mrf.mxu1 }
  0xe0   :  { %v5015_v45 = vpop.f32.mrf.mxu0 }
  0xe1   :  { %v5031_v32 = vpop.f32.mrf.mxu1 }
  0xe2   :  { %v5017_v3 = vpop.f32.mrf.mxu0 }
  0xe4   :  { %v5019_v44 = vpop.f32.mrf.mxu0  ;;  %v5058_v60 = vpop.f32.mrf.mxu1 }
  0xe6   :  { %v5021_v49 = vpop.f32.mrf.mxu0  ;;  %v5094_v17 = vpop.f32.mrf.mxu1 }
  0xe8   :  { %v5023_v13 = vpop.f32.mrf.mxu0  ;;  %v5124_v41 = vpop.f32.mrf.mxu1 }
  0xea   :  { %v5025_v28 = vpop.f32.mrf.mxu0  ;;  %v5154_v18 = vpop.f32.mrf.mxu1 }
  0xec   :  { %v5029_v24 = vpop.f32.mrf.mxu0 }
  0xed   :  { %v5184_v58 = vpop.f32.mrf.mxu1 }
  0xee   :  { %v5033_v35 = vpop.f32.mrf.mxu0 }
  0xef   :  { %v5214_v15 = vpop.f32.mrf.mxu1 }
  0xf0   :  { %v5044_v52 = vpop.f32.mrf.mxu0 }
  0xf1   :  { %v5232_v33 = vpop.f32.mrf.mxu1 }
  0xf2   :  { %v5060_v61 = vpop.f32.mrf.mxu0  ;;  %7374 = vst [vmem:[#allocation9_spill] sm:$0xff] %v5232_v33 }
  0xf3   :  { %v5236_v57 = vpop.f32.mrf.mxu1 }
  0xf4   :  { %v5077_v6 = vpop.f32.mrf.mxu0  ;;  %7375 = vst [vmem:[#allocation10_spill] sm:$0xff] %v5236_v57 }
  0xf5   :  { %v5240_v14 = vpop.f32.mrf.mxu1 }
  0xf6   :  { %v5096_v40 = vpop.f32.mrf.mxu0  ;;  %7376 = vst [vmem:[#allocation11_spill] sm:$0xff] %v5240_v14 }
  0xf7   :  { %v5244_v63 = vpop.f32.mrf.mxu1 }
  0xf8   :  { %v5110_v27 = vpop.f32.mrf.mxu0  ;;  %7377 = vst [vmem:[#allocation12_spill] sm:$0xff] %v5244_v63 }
  0xfa   :  { %v5126_v11 = vpop.f32.mrf.mxu0 }
  0xfb   :  { %7370 = vst [vmem:[#allocation5_spill] sm:$0xff] %v5126_v11 }
  0xfc   :  { %v5140_v51 = vpop.f32.mrf.mxu0 }
  0xfd   :  { %7371 = vst [vmem:[#allocation6_spill] sm:$0xff] %v5140_v51 }
  0xfe   :  { %v5156_v19 = vpop.f32.mrf.mxu0 }
  0xff   :  { %7372 = vst [vmem:[#allocation7_spill] sm:$0xff] %v5156_v19  ;;  %v5291_v19 = vshrl.u32 %v7369_v4, 7  ;;  %v1291_v4 = vld [vmem:[%s7358_s3 + $0x10] sm:$0xff] }
 0x100   :  { %v5170_v10 = vpop.f32.mrf.mxu0  ;;  %1622 = vmatpush1.msra.mxu0 %v1291_v4  ;;  %v3691_v4 = vld [vmem:[%s7358_s3 + $0x178] sm:$0xff] }
 0x101   :  { %7373 = vst [vmem:[#allocation8_spill] sm:$0xff] %v5170_v10 }
 0x102   :  { %v5186_v29 = vpop.f32.mrf.mxu0 }
 0x103   :  { %v353_v57 = vadd.f32 %v5186_v29, %v5009_v31  ;;  %v1032_v31 = vld [vmem:[%s7357_s2] sm:$0x3]  ;;  %s4223_s2 = smov 122  }
 0x104   :  { %v5200_v2 = vpop.f32.mrf.mxu0 }
 0x105   :  { %v355_v11 = vadd.f32 %v5200_v2, %v5011_v9  ;;  %v3692_v9 = vld [vmem:[%s7358_s3 + $0x180] sm:$0xff]  ;;  %v1290_v2 = vld [vmem:[%s7358_s3 + $0x8] sm:$0xff] }
 0x106   :  { %v5216_v47 = vpop.f32.mrf.mxu0  ;;  %1623 = vmatprep.subr.mxu0 %v1290_v2 }
 0x108   :  { %v5224_v62 = vpop.f32.mrf.mxu0 }
 0x109   :  { %v361_v29 = vadd.f32 %v5224_v62, %v5015_v45  ;;  %v3689_v45 = vld [vmem:[%s7358_s3 + $0x168] sm:$0xff]  ;;  %v1329_v62 = vld [vmem:[%s7358_s3 + $0x140] sm:$0x3] }
 0x10a   :  { %v5234_v34 = vpop.f32.mrf.mxu0 }
 0x10c   :  { %v5238_v48 = vpop.f32.mrf.mxu0 }
 0x10e   :  { %v5242_v50 = vpop.f32.mrf.mxu0 }
 0x110   :  { %v5246_v54 = vpop.f32.mrf.mxu0 }
 0x113   :  { %v746_v55 = vpop.f32.mrf.mxu1 }
 0x115   :  { %v5248_v21 = vpop.f32.mrf.mxu1 }
 0x117   :  { %v5250_v7 = vpop.f32.mrf.mxu1 }
 0x119   :  { %v5254_v42 = vpop.f32.mrf.mxu1 }
 0x11a   :  { %v539_v16 = vpop.f32.mrf.mxu0 }
 0x11b   :  { %v5260_v59 = vpop.f32.mrf.mxu1 }
 0x11c   :  { %v541_v8 = vpop.f32.mrf.mxu0 }
 0x11d   :  { %v5266_v39 = vpop.f32.mrf.mxu1 }
 0x11e   :  { %v545_v25 = vpop.f32.mrf.mxu0 }
 0x11f   :  { %v5272_v12 = vpop.f32.mrf.mxu1 }
 0x120   :  { %v547_v20 = vpop.f32.mrf.mxu0 }
 0x121   :  { %v5278_v26 = vpop.f32.mrf.mxu1  ;;  %v601_v2 = vadd.f32 %v547_v20, %v361_v29  ;;  %v1328_v20 = vld [vmem:[%s7358_s3 + $0x138] sm:$0xff]  ;;  %v365_v29 = vadd.f32 %v5234_v34, %v5017_v3  ;;  %v3686_v3 = vld [vmem:[%s7358_s3 + $0x150] sm:$0xff]  ;;  %v1326_v34 = vld [vmem:[%s7358_s3 + $0x128] sm:$0xff] }
 0x122   :  { %v5252_v38 = vpop.f32.mrf.mxu0 }
 0x123   :  { %v5284_v63 = vpop.f32.mrf.mxu1 }
 0x124   :  { %v5256_v46 = vpop.f32.mrf.mxu0 }
 0x125   :  { %v5295_v51 = vpop.f32.mrf.mxu1 }
 0x126   :  { %v5258_v56 = vpop.f32.mrf.mxu0 }
 0x128   :  { %v5262_v0 = vpop.f32.mrf.mxu0 }
 0x12a   :  { %v5264_v1 = vpop.f32.mrf.mxu0 }
 0x12c   :  { %v5268_v5 = vpop.f32.mrf.mxu0 }
 0x12e   :  { %v5270_v43 = vpop.f32.mrf.mxu0 }
 0x130   :  { %v5274_v36 = vpop.f32.mrf.mxu0 }
 0x132   :  { %v5276_v23 = vpop.f32.mrf.mxu0 }
 0x134   :  { %v5280_v53 = vpop.f32.mrf.mxu0 }
 0x136   :  { %v5282_v30 = vpop.f32.mrf.mxu0 }
 0x137   :  { %7378 = vst [vmem:[#allocation13_spill] sm:$0xff] %v5282_v30  ;;  %v598_v30 = vadd.f32 %v539_v16, %v353_v57  ;;  %v359_v57 = vadd.f32 %v5216_v47, %v5013_v37  ;;  %v599_v16 = vadd.f32 %v541_v8, %v355_v11  ;;  %v3690_v11 = vld [vmem:[%s7358_s3 + $0x170] sm:$0xff]  ;;  %v1330_v47 = vld [vmem:[%s7358_s3 + $0x148] sm:$0x3] }
 0x138   :  { %v5286_v10 = vpop.f32.mrf.mxu0 }
 0x139   :  { %7379 = vst [vmem:[#allocation14_spill] sm:$0xff] %v5286_v10  ;;  %v3693_v10 = vld [vmem:[%s7358_s3 + $0x188] sm:$0xff]  ;;  %v805_v8 = vadd.f32 %v746_v55, %v598_v30  ;;  %v7384_v55 = vsub.s32 1, %v5291_v19  ;;  %v3688_v30 = vld [vmem:[%s7358_s3 + $0x160] sm:$0xff] }
 0x13a   :  { %v5288_v14 = vpop.f32.mrf.mxu0  ;;  %1482 = vmatprep.subr.mxu1 %v3693_v10  ;;  %v1289_v10 = vld [vmem:[%s7358_s3] sm:$0xff] }
 0x13b   :  { %7380 = vst [vmem:[#allocation15_spill] sm:$0xff] %v5288_v14  ;;  %1483 = vmatpush1.msra.mxu1 %v3692_v9  ;;  %1624 = vmatpush1.msra.mxu0 %v1289_v10  ;;  %v600_v9 = vadd.f32 %v545_v25, %v359_v57  ;;  %v7383_v10 = vsub.s32 0, %v5291_v19  ;;  %v5353_v25 = vrot.slane %v1032_v31, %v7384_v55 }
 0x13c   :  { %v5297_v33 = vpop.f32.mrf.mxu0  ;;  %1484 = vmatprep.subr.mxu1 %v3691_v4  ;;  %3738 = vmatprep.subr.msk.mxu0 %vm1451_vm5, %v1330_v47  ;;  %v806_v57 = vadd.f32 %v5248_v21, %v599_v16  ;;  %v1327_v47 = vld [vmem:[%s7358_s3 + $0x130] sm:$0xff]  ;;  %v602_v16 = vadd.f32 %v5252_v38, %v365_v29  ;;  %v808_v55 = vadd.f32 %v5254_v42, %v601_v2  ;;  %v3725_v42 = vld [vmem:[%s7358_s3 + $0x288] sm:$0xff] }
 0x13d   :  { %1485 = vmatpush1.msra.mxu1 %v3690_v11  ;;  %3739 = vmatpush2.msk.msra.mxu0 %vm1451_vm5, %v1329_v62  ;;  %v807_v21 = vadd.f32 %v5250_v7, %v600_v9  ;;  %v3726_v38 = vld [vmem:[%s7358_s3 + $0x290] sm:$0x3]  ;;  %v373_v2 = vadd.f32 %v5246_v54, %v5023_v13 }
 0x13e   :  { %v5307_v14 = vpop.f32.mrf.mxu0  ;;  %1486 = vmatprep.subr.mxu1 %v3689_v45  ;;  %1649 = vmatprep.subr.mxu0 %v1328_v20  ;;  %v367_v45 = vadd.f32 %v5238_v48, %v5019_v44  ;;  %v3727_v44 = vld [vmem:[%s7358_s3 + $0x298] sm:$0x3]  ;;  %v1325_v48 = vld [vmem:[%s7358_s3 + $0x120] sm:$0xff] }
 0x13f   :  { %7381 = vst [vmem:[#allocation16_spill] sm:$0xff] %v5307_v14  ;;  %v5330_v14 = vpop.f32.mrf.mxu1  ;;  %1487 = vmatpush1.msra.mxu1 %v3688_v30  ;;  %1650 = vmatpush2.msra.mxu0 %v1327_v47  ;;  %v1324_v30 = vld [vmem:[%s7358_s3 + $0x118] sm:$0xff]  ;;  %v1322_v47 = vld [vmem:[%s7358_s3 + $0x108] sm:$0xff] }
 0x140   :  { %v5332_v37 = vpop.f32.mrf.mxu0  ;;  %1651 = vmatprep.subr.mxu0 %v1326_v34  ;;  %v603_v7 = vadd.f32 %v5256_v46, %v367_v45  ;;  %v1323_v46 = vld [vmem:[%s7358_s3 + $0x110] sm:$0xff]  ;;  %v809_v45 = vadd.f32 %v5260_v59, %v602_v16  ;;  %v377_v34 = vadd.f32 %v5027_v22, %v5025_v28 }
 0x141   :  { %7382 = vst [vmem:[#allocation17_spill] sm:$0xff] %v5332_v37  ;;  %v5349_v37 = vrot.slane %v1032_v31, %v7383_v10  ;;  %v3687_v31 = vld [vmem:[%s7358_s3 + $0x158] sm:$0xff]  ;;  %v5373_v62 = vpop.f32.mrf.mxu1  ;;  %1652 = vmatpush2.msra.mxu0 %v1325_v48 }
 0x142   :  { %v953_v4 = vpop.f32.mrf.mxu0  ;;  %1488 = vmatprep.subr.mxu1 %v3687_v31  ;;  %1653 = vmatprep.subr.mxu0 %v1324_v30  ;;  %v3724_v31 = vld [vmem:[%s7358_s3 + $0x280] sm:$0xff]  ;;  %v810_v59 = vadd.f32 %v5266_v39, %v603_v7  ;;  %v379_v39 = vadd.f32 %v5031_v32, %v5029_v24  ;;  %v606_v7 = vadd.f32 %v5264_v1, %v377_v34 }
 0x143   :  { %v1012_v11 = vadd.f32 %v953_v4, %v805_v8  ;;  %1489 = vmatpush1.msra.mxu1 %v3686_v3  ;;  %v371_v4 = vadd.f32 %v5242_v50, %v5021_v49  ;;  %1654 = vmatpush2.msra.mxu0 %v1323_v46  ;;  %v1321_v3 = vld [vmem:[%s7358_s3 + $0x100] sm:$0xff]  ;;  %v383_v1 = vadd.f32 %v5058_v60, %v5033_v35  ;;  %v3718_v35 = vld [vmem:[%s7358_s3 + $0x250] sm:$0xff] }
 0x144   :  { %v955_v10 = vpop.f32.mrf.mxu0  ;;  %3728 = vmatprep.subr.msk.mxu1 %vm1451_vm5, %v3727_v44  ;;  %1655 = vmatprep.subr.mxu0 %v1322_v47  ;;  %v3831_v44 = vld [vmem:[%s7358_s3 + $0x4e8] sm:$0xff]  ;;  %v3720_v32 = vld [vmem:[%s7358_s3 + $0x260] sm:$0xff]  ;;  %v385_v60 = vadd.f32 %v5094_v17, %v5044_v52  ;;  %v389_v52 = vadd.f32 %v5124_v41, %v5060_v61  ;;  %v391_v61 = vadd.f32 %v5154_v18, %v5077_v6 }
 0x145   :  { %v1013_v8 = vadd.f32 %v955_v10, %v806_v57  ;;  %v5401_v20 = vadd.f32 %v5349_v37, %v1012_v11  ;;  %3729 = vmatpush2.msk.msra.mxu1 %vm1451_vm5, %v3726_v38  ;;  %v604_v29 = vadd.f32 %v5258_v56, %v371_v4  ;;  %v5416_v57 = vpop.f32.mrf.mxu1  ;;  %v3723_v56 = vld [vmem:[%s7358_s3 + $0x278] sm:$0xff]  ;;  %1656 = vmatpush2.msra.mxu0 %v1321_v3 }
 0x146   :  { %v959_v9 = vpop.f32.mrf.mxu0  ;;  %1514 = vmatprep.subr.mxu1 %v3725_v42  ;;  %2049 = vmatprep.subr.mxu0 %v3831_v44 }
 0x147   :  { %v1014_v49 = vadd.f32 %v959_v9, %v807_v21  ;;  %v5404_v50 = vadd.f32 %v5353_v25, %v1013_v8  ;;  %1515 = vmatpush2.msra.mxu1 %v3724_v31  ;;  %v605_v21 = vadd.f32 %v5262_v0, %v373_v2  ;;  %v3722_v8 = vld [vmem:[%s7358_s3 + $0x270] sm:$0xff]  ;;  %v1064_v48 = vmax.f32 %v5401_v20, 0.0  ;;  %v3721_v0 = vld [vmem:[%s7358_s3 + $0x268] sm:$0xff]  ;;  %v5460_v9 = vpop.f32.mrf.mxu1  ;;  %v3719_v2 = vld [vmem:[%s7358_s3 + $0x258] sm:$0xff] }
 0x148   :  { %v961_v11 = vpop.f32.mrf.mxu0  ;;  %1516 = vmatprep.subr.mxu1 %v3723_v56 }
 0x149   :  { %v5426_v10 = vadd.f32 %v5349_v37, %v1014_v49  ;;  %v1015_v13 = vadd.f32 %v961_v11, %v808_v55  ;;  %v1065_v54 = vmax.f32 %v5404_v50, 0.0  ;;  %1517 = vmatpush2.msra.mxu1 %v3722_v8  ;;  %v811_v55 = vadd.f32 %v5272_v12, %v604_v29  ;;  %v788_v47 = vpop.f32.mrf.mxu1 }
 0x14a   :  { %v965_v16 = vpop.f32.mrf.mxu0  ;;  %1518 = vmatprep.subr.mxu1 %v3721_v0  ;;  %v607_v12 = vadd.f32 %v5268_v5, %v379_v39  ;;  %v812_v29 = vadd.f32 %v5278_v26, %v605_v21  ;;  %v813_v5 = vadd.f32 %v5284_v63, %v606_v7  ;;  %v608_v26 = vadd.f32 %v5270_v43, %v383_v1 }
 0x14b   :  { %v1066_v4 = vmax.f32 %v5426_v10, 0.0  ;;  %v1016_v28 = vadd.f32 %v965_v16, %v809_v45  ;;  %1106 = vrot.lane.b32.xlu0 %v1065_v54, %s4223_s2  ;;  %v5451_v22 = vadd.f32 %v5353_v25, %v1015_v13  ;;  %1519 = vmatpush2.msra.mxu1 %v3720_v32  ;;  %v3779_v13 = vld [vmem:[%s7358_s3 + $0x398] sm:$0xff]  ;;  %v609_v43 = vadd.f32 %v5274_v36, %v385_v60  ;;  %v790_v36 = vpop.f32.mrf.mxu1 }
 0x14c   :  { %v967_v38 = vpop.f32.mrf.mxu0  ;;  %1520 = vmatprep.subr.mxu1 %v3719_v2  ;;  %v814_v17 = vadd.f32 %v5295_v51, %v607_v12  ;;  %v815_v41 = vadd.f32 %v5330_v14, %v608_v26  ;;  %v610_v51 = vadd.f32 %v5276_v23, %v389_v52  ;;  %v611_v7 = vadd.f32 %v5280_v53, %v391_v61  ;;  %v7385_v53 = vld [vmem:[#allocation13_spill] sm:$0xff]  ;;  %v7390_v26 = vld [vmem:[#allocation10_spill] sm:$0xff] }
 0x14d   :  { %v5463_v30 = vadd.f32 %v5349_v37, %v1016_v28  ;;  %v1017_v49 = vadd.f32 %v967_v38, %v810_v59  ;;  %v1067_v42 = vmax.f32 %v5451_v22, 0.0  ;;  %v4190_v24 = vpack.i.bf16 %v1066_v4, %v1064_v48  ;;  %1521 = vmatpush2.msra.mxu1 %v3718_v35  ;;  %v7387_v2 = vld [vmem:[#allocation9_spill] sm:$0xff] }
 0x14e   :  { %v971_v46 = vpop.f32.mrf.mxu0  ;;  %1813 = vmatprep.subr.mxu1 %v3779_v13  ;;  %v816_v18 = vadd.f32 %v5373_v62, %v609_v43  ;;  %v794_v62 = vpop.f32.mrf.mxu1 }
 0x14f   :  { %v5481_v11 = vadd.f32 %v5353_v25, %v1017_v49  ;;  %v1018_v31 = vadd.f32 %v971_v46, %v811_v55  ;;  %1110 = vrot.lane.b32.xlu1 %v1067_v42, %s4223_s2  ;;  %4191 = vrot.lane.b32.xlu0 %v4190_v24, %s4223_s2  ;;  %v1068_v56 = vmax.f32 %v5463_v30, 0.0  ;;  %v395_v55 = vadd.f32 %v5184_v58, %v5096_v40  ;;  %v7386_v46 = vld [vmem:[#allocation5_spill] sm:$0xff] }
 0x150   :  { %v973_v45 = vpop.f32.mrf.mxu0  ;;  %v397_v40 = vadd.f32 %v5214_v15, %v5110_v27  ;;  %v817_v58 = vadd.f32 %v5416_v57, %v610_v51  ;;  %v7388_v15 = vld [vmem:[#allocation14_spill] sm:$0xff]  ;;  %v796_v52 = vpop.f32.mrf.mxu1  ;;  %v7393_v51 = vld [vmem:[#allocation11_spill] sm:$0xff] }
 0x151   :  { %v1069_v3 = vmax.f32 %v5481_v11, 0.0  ;;  %v5500_v34 = vadd.f32 %v5349_v37, %v1018_v31  ;;  %v1019_v59 = vadd.f32 %v973_v45, %v812_v29  ;;  %v612_v38 = vadd.f32 %v7385_v53, %v395_v55  ;;  %v7396_v53 = vld [vmem:[#allocation16_spill] sm:$0xff] }
 0x152   :  { %v977_v63 = vpop.f32.mrf.mxu0  ;;  %v401_v29 = vadd.f32 %v7387_v2, %v7386_v46  ;;  %v818_v31 = vadd.f32 %v5460_v9, %v611_v7  ;;  %v613_v57 = vadd.f32 %v7388_v15, %v397_v40  ;;  %v7391_v9 = vld [vmem:[#allocation15_spill] sm:$0xff] }
 0x153   :  { %v5507_v21 = vadd.f32 %v5353_v25, %v1019_v59  ;;  %v1020_v16 = vadd.f32 %v977_v63, %v813_v5  ;;  %1112 = vrot.lane.b32.xlu1 %v1068_v56, %s4223_s2  ;;  %1114 = vrot.lane.b32.xlu0 %v1069_v3, %s4223_s2  ;;  %v1070_v44 = vmax.f32 %v5500_v34, 0.0  ;;  %v7389_v5 = vld [vmem:[#allocation6_spill] sm:$0xff]  ;;  %v819_v13 = vadd.f32 %v788_v47, %v612_v38  ;;  %v800_v38 = vpop.f32.mrf.mxu1 }
 0x154   :  { %v979_v8 = vpop.f32.mrf.mxu0  ;;  %v403_v45 = vadd.f32 %v7390_v26, %v7389_v5  ;;  %v614_v59 = vadd.f32 %v7391_v9, %v401_v29  ;;  %v820_v7 = vadd.f32 %v790_v36, %v613_v57  ;;  %v3827_v34 = vld [vmem:[%s7358_s3 + $0x4c8] sm:$0xff] }
 0x155   :  { %v1071_v28 = vmax.f32 %v5507_v21, 0.0  ;;  %v5522_v0 = vadd.f32 %v5349_v37, %v1020_v16  ;;  %v1021_v39 = vadd.f32 %v979_v8, %v814_v17  ;;  %v802_v5 = vpop.f32.mrf.mxu1  ;;  %v3828_v21 = vld [vmem:[%s7358_s3 + $0x4d0] sm:$0xff] }
 0x156   :  { %v983_v6 = vpop.f32.mrf.mxu0 }
 0x157   :  { %v5529_v14 = vadd.f32 %v5353_v25, %v1021_v39  ;;  %v1022_v23 = vadd.f32 %v983_v6, %v815_v41  ;;  %1116 = vrot.lane.b32.xlu1 %v1070_v44, %s4223_s2  ;;  %1118 = vrot.lane.b32.xlu0 %v1071_v28, %s4223_s2  ;;  %v1072_v24 = vmax.f32 %v5522_v0, 0.0  ;;  %v7392_v41 = vld [vmem:[#allocation7_spill] sm:$0xff]  ;;  %v615_v39 = vadd.f32 %v5297_v33, %v403_v45 }
 0x158   :  { %v985_v49 = vpop.f32.mrf.mxu0  ;;  %v407_v8 = vadd.f32 %v7393_v51, %v7392_v41  ;;  %v3778_v0 = vld [vmem:[%s7358_s3 + $0x390] sm:$0xff] }
 0x159   :  { %v1073_v32 = vmax.f32 %v5529_v14, 0.0  ;;  %v5544_v1 = vadd.f32 %v5349_v37, %v1022_v23  ;;  %v1023_v12 = vadd.f32 %v985_v49, %v816_v18  ;;  %v7394_v18 = vld [vmem:[#allocation8_spill] sm:$0xff]  ;;  %v822_v29 = vadd.f32 %v796_v52, %v615_v39 }
 0x15a   :  { %v989_v27 = vpop.f32.mrf.mxu0  ;;  %v7395_v23 = vld [vmem:[#allocation12_spill] sm:$0xff]  ;;  %v616_v33 = vadd.f32 %v7396_v53, %v407_v8 }
 0x15b   :  { %v5551_v35 = vadd.f32 %v5353_v25, %v1023_v12  ;;  %v1024_v60 = vadd.f32 %v989_v27, %v817_v58  ;;  %1120 = vrot.lane.b32.xlu1 %v1072_v24, %s4223_s2  ;;  %1122 = vrot.lane.b32.xlu0 %v1073_v32, %s4223_s2  ;;  %v1074_v63 = vmax.f32 %v5544_v1, 0.0  ;;  %v409_v40 = vadd.f32 %v7395_v23, %v7394_v18  ;;  %v7397_v27 = vld [vmem:[#allocation17_spill] sm:$0xff] }
 0x15c   :  { %v991_v17 = vpop.f32.mrf.mxu0  ;;  %v821_v58 = vadd.f32 %v794_v62, %v614_v59  ;;  %v3822_v1 = vld [vmem:[%s7358_s3 + $0x4a0] sm:$0xff] }
 0x15d   :  { %v1075_v43 = vmax.f32 %v5551_v35, 0.0  ;;  %v5565_v16 = vadd.f32 %v5349_v37, %v1024_v60  ;;  %v1025_v61 = vadd.f32 %v991_v17, %v818_v31  ;;  %v617_v15 = vadd.f32 %v7397_v27, %v409_v40 }
 0x15e   :  { %v995_v55 = vpop.f32.mrf.mxu0  ;;  %v823_v60 = vadd.f32 %v800_v38, %v616_v33 }
 0x15f   :  { %v5571_v47 = vadd.f32 %v5353_v25, %v1025_v61  ;;  %v1026_v6 = vadd.f32 %v995_v55, %v819_v13  ;;  %1124 = vrot.lane.b32.xlu1 %v1074_v63, %s4223_s2  ;;  %1126 = vrot.lane.b32.xlu0 %v1075_v43, %s4223_s2  ;;  %v1076_v49 = vmax.f32 %v5565_v16, 0.0  ;;  %v824_v17 = vadd.f32 %v802_v5, %v617_v15  ;;  %v3772_v16 = vld [vmem:[%s7358_s3 + $0x360] sm:$0xff] }
 0x160   :  { %v997_v36 = vpop.f32.mrf.mxu0 }
 0x161   :  { %v1077_v12 = vmax.f32 %v5571_v47, 0.0  ;;  %v5585_v46 = vadd.f32 %v5349_v37, %v1026_v6  ;;  %v1027_v2 = vadd.f32 %v997_v36, %v820_v7  ;;  %v3773_v47 = vld [vmem:[%s7358_s3 + $0x368] sm:$0xff] }
 0x162   :  { %v1001_v31 = vpop.f32.mrf.mxu0 }
 0x163   :  { %v5589_v57 = vadd.f32 %v5353_v25, %v1027_v2  ;;  %v1028_v62 = vadd.f32 %v1001_v31, %v821_v58  ;;  %1128 = vrot.lane.b32.xlu1 %v1076_v49, %s4223_s2  ;;  %1130 = vrot.lane.b32.xlu0 %v1077_v12, %s4223_s2  ;;  %v1078_v45 = vmax.f32 %v5585_v46, 0.0  ;;  %v3817_v46 = vld [vmem:[%s7358_s3 + $0x478] sm:$0xff] }
 0x164   :  { %v1003_v26 = vpop.f32.mrf.mxu0 }
 0x165   :  { %v1079_v13 = vmax.f32 %v5589_v57, 0.0  ;;  %v5600_v9 = vadd.f32 %v5349_v37, %v1028_v62  ;;  %v1029_v59 = vadd.f32 %v1003_v26, %v822_v29 }
 0x166   :  { %v1007_v52 = vpop.f32.mrf.mxu0 }
 0x167   :  { %v5603_v61 = vadd.f32 %v5353_v25, %v1029_v59  ;;  %v1030_v41 = vadd.f32 %v1007_v52, %v823_v60  ;;  %1132 = vrot.lane.b32.xlu1 %v1078_v45, %s4223_s2  ;;  %1134 = vrot.lane.b32.xlu0 %v1079_v13, %s4223_s2  ;;  %v1080_v8 = vmax.f32 %v5600_v9, 0.0  ;;  %v3766_v9 = vld [vmem:[%s7358_s3 + $0x330] sm:$0xff] }
 0x168   :  { %v1009_v51 = vpop.f32.mrf.mxu0 }
 0x169   :  { %v1081_v39 = vmax.f32 %v5603_v61, 0.0  ;;  %v5614_v55 = vadd.f32 %v5349_v37, %v1030_v41  ;;  %v1031_v7 = vadd.f32 %v1009_v51, %v824_v17  ;;  %v3814_v61 = vld [vmem:[%s7358_s3 + $0x460] sm:$0xff] }
 0x16b   :  { %v5617_v6 = vadd.f32 %v5353_v25, %v1031_v7  ;;  %1136 = vrot.lane.b32.xlu1 %v1080_v8, %s4223_s2  ;;  %1138 = vrot.lane.b32.xlu0 %v1081_v39, %s4223_s2  ;;  %v1082_v18 = vmax.f32 %v5614_v55, 0.0 }
 0x16d   :  { %v1083_v23 = vmax.f32 %v5617_v6, 0.0  ;;  %v3810_v6 = vld [vmem:[%s7358_s3 + $0x440] sm:$0xff] }
 0x16f   :  { %1140 = vrot.lane.b32.xlu1 %v1082_v18, %s4223_s2  ;;  %1142 = vrot.lane.b32.xlu0 %v1083_v23, %s4223_s2 }
 0x1bd   :  { %v1107_v37 = vpop.permute.xlu0 %1106 }
 0x1be   :  { %v1176_v25 = vmax.f32 %v1065_v54, %v1107_v37 }
 0x1c0   :  { %v1218_v36 = vrot.slane %v1176_v25, 1 }
 0x1c1   :  { %v1111_v40 = vpop.permute.xlu1 %1110  ;;  %v4192_v58 = vpop.permute.xlu0 %4191 }
 0x1c2   :  { %v1178_v53 = vmax.f32 %v1067_v42, %v1111_v40  ;;  %v4194_v33 = vunpack.i.h.bf16 %v4192_v58  ;;  %v4193_v38 = vunpack.i.l.bf16 %v4192_v58 }
 0x1c4   :  { %v1219_v2 = vrot.slane %v1178_v53, 1  ;;  %v1146_v29 = vsel %vm1144_vm6, %v4194_v33, %v1111_v40  ;;  %v1145_v31 = vsel %vm1144_vm6, %v4193_v38, %v1107_v37  ;;  %v3829_v37 = vld [vmem:[%s7358_s3 + $0x4d8] sm:$0xff] }
 0x1c5   :  { %v1177_v27 = vmax.f32 %v1066_v4, %v1146_v29  ;;  %v1175_v50 = vmax.f32 %v1064_v48, %v1145_v31  ;;  %v1113_v54 = vpop.permute.xlu1 %1112  ;;  %v1115_v15 = vpop.permute.xlu0 %1114 }
 0x1c6   :  { %v1220_v62 = vsel %vm105_vm1, %v1218_v36, %v1219_v2  ;;  %v1147_v22 = vsel %vm1144_vm6, %v1113_v54, %v1115_v15  ;;  %v1180_v42 = vmax.f32 %v1069_v3, %v1115_v15 }
 0x1c7   :  { %v1216_v60 = vrot.slane %v1177_v27, 1  ;;  %v1215_v5 = vrot.slane %v1175_v50, 1  ;;  %v1179_v26 = vmax.f32 %v1068_v56, %v1147_v22  ;;  %v5649_v10 = vmax.f32 %v1176_v25, %v1220_v62  ;;  %v3830_v56 = vld [vmem:[%s7358_s3 + $0x4e0] sm:$0xff] }
 0x1c8   :  { %v1223_v4 = vrot.slane %v1180_v42, 1  ;;  %v3826_v62 = vld [vmem:[%s7358_s3 + $0x4c0] sm:$0xff] }
 0x1c9   :  { %v1217_v20 = vsel %vm105_vm1, %v1215_v5, %v1216_v60  ;;  %v1221_v48 = vrot.slane %v1179_v26, 1  ;;  %v1117_v59 = vpop.permute.xlu1 %1116  ;;  %3740 = vmatprep.mubr.msk.f32.mxu0 %vm1434_vm7, %v5649_v10  ;;  %v1119_v52 = vpop.permute.xlu0 %1118 }
 0x1ca   :  { %v5654_v17 = vmax.f32 %v1175_v50, %v1217_v20  ;;  %v1224_v11 = vsel %vm105_vm1, %v1219_v2, %v1223_v4  ;;  %v1148_v3 = vsel %vm1144_vm6, %v1117_v59, %v1119_v52  ;;  %v1182_v30 = vmax.f32 %v1071_v28, %v1119_v52 }
 0x1cb   :  { %v1222_v41 = vsel %vm105_vm1, %v1216_v60, %v1221_v48  ;;  %v5664_v51 = vmax.f32 %v1178_v53, %v1224_v11  ;;  %v1181_v7 = vmax.f32 %v1070_v44, %v1148_v3  ;;  %v1395_v44 = vrot.slane %v5649_v10, 2  ;;  %v3776_v11 = vld [vmem:[%s7358_s3 + $0x380] sm:$0xff]  ;;  %v3823_v3 = vld [vmem:[%s7358_s3 + $0x4a8] sm:$0xff] }
 0x1cc   :  { %v5671_v25 = vmax.f32 %v1177_v27, %v1222_v41  ;;  %v1227_v40 = vrot.slane %v1182_v30, 1  ;;  %1658 = vmatmul.mubr.f32.vlgmr.msra.gmra.mxu0 %v5654_v17  ;;  %v1392_v38 = vrot.slane %v5654_v17, 2 }
 0x1cd   :  { %v1225_v28 = vrot.slane %v1181_v7, 1  ;;  %2050 = vmatpush1.msra.mxu0 %v3830_v56  ;;  %v1121_v58 = vpop.permute.xlu1 %1120  ;;  %v1123_v53 = vpop.permute.xlu0 %1122  ;;  %3741 = vmatprep.mubr.msk.f32.mxu0 %vm1434_vm7, %v5664_v51  ;;  %v1396_v33 = vrot.slane %v5664_v51, 2 }
 0x1ce   :  { %v1228_v36 = vsel %vm105_vm1, %v1223_v4, %v1227_v40  ;;  %v1149_v2 = vsel %vm1144_vm6, %v1121_v58, %v1123_v53  ;;  %v1184_v29 = vmax.f32 %v1073_v32, %v1123_v53  ;;  %2051 = vmatprep.subr.mxu0 %v3829_v37  ;;  %v1393_v31 = vrot.slane %v5671_v25, 2  ;;  %v3824_v4 = vld [vmem:[%s7358_s3 + $0x4b0] sm:$0xff] }
 0x1cf   :  { %v1226_v27 = vsel %vm105_vm1, %v1221_v48, %v1225_v28  ;;  %v5691_v50 = vmax.f32 %v1180_v42, %v1228_v36  ;;  %v5695_v54 = vmax.f32 %v1072_v24, %v1149_v2  ;;  %2052 = vmatpush1.msra.mxu0 %v3828_v21  ;;  %v1397_v15 = vsel %vm436_vm0, %v1395_v44, %v1396_v33  ;;  %v3825_v24 = vld [vmem:[%s7358_s3 + $0x4b8] sm:$0xff] }
 0x1d0   :  { %v5701_v14 = vmax.f32 %v1179_v26, %v1226_v27  ;;  %v1231_v32 = vrot.slane %v1184_v29, 1  ;;  %2053 = vmatprep.subr.mxu0 %v3827_v34  ;;  %3730 = vmatprep.mubr.msk.f32.mxu1 %vm1434_vm7, %v1397_v15  ;;  %v1394_v22 = vsel %vm436_vm0, %v1392_v38, %v1393_v31  ;;  %v3777_v26 = vld [vmem:[%s7358_s3 + $0x388] sm:$0xff]  ;;  %v3774_v38 = vld [vmem:[%s7358_s3 + $0x370] sm:$0xff]  ;;  %v3821_v36 = vld [vmem:[%s7358_s3 + $0x498] sm:$0xff] }
 0x1d1   :  { %v1229_v42 = vrot.slane %v5695_v54, 1  ;;  %1664 = vmatmul.mubr.f32.gmra.mxu0 %v5671_v25  ;;  %v1125_v60 = vpop.permute.xlu1 %1124  ;;  %v1127_v5 = vpop.permute.xlu0 %1126  ;;  %1523 = vmatmul.mubr.f32.vlgmr.msra.gmra.mxu1 %v1394_v22  ;;  %v1400_v20 = vrot.slane %v5691_v50, 2 }
 0x1d2   :  { %v1232_v48 = vsel %vm105_vm1, %v1227_v40, %v1231_v32  ;;  %2054 = vmatpush1.msra.mxu0 %v3826_v62  ;;  %v1150_v59 = vsel %vm1144_vm6, %v1125_v60, %v1127_v5  ;;  %v5724_v52 = vmax.f32 %v1075_v43, %v1127_v5  ;;  %3742 = vmatprep.mubr.msk.f32.mxu0 %vm1434_vm7, %v5691_v50  ;;  %v1398_v56 = vrot.slane %v5701_v14, 2  ;;  %v3771_v60 = vld [vmem:[%s7358_s3 + $0x358] sm:$0xff] }
 0x1d3   :  { %v1230_v41 = vsel %vm105_vm1, %v1225_v28, %v1229_v42  ;;  %v5736_v37 = vmax.f32 %v1182_v30, %v1232_v48  ;;  %v5740_v35 = vmax.f32 %v1074_v63, %v1150_v59  ;;  %1814 = vmatpush1.msra.mxu1 %v3778_v0  ;;  %2055 = vmatprep.subr.mxu0 %v3825_v24  ;;  %v3775_v28 = vld [vmem:[%s7358_s3 + $0x378] sm:$0xff] }
 0x1d4   :  { %v5742_v43 = vmax.f32 %v1181_v7, %v1230_v41  ;;  %v1235_v40 = vrot.slane %v5724_v52, 1  ;;  %1815 = vmatprep.subr.mxu1 %v3777_v26  ;;  %2056 = vmatpush1.msra.mxu0 %v3824_v4  ;;  %v1401_v21 = vsel %vm436_vm0, %v1396_v33, %v1400_v20  ;;  %v1399_v58 = vsel %vm436_vm0, %v1393_v31, %v1398_v56 }
 0x1d5   :  { %v1233_v63 = vrot.slane %v5740_v35, 1  ;;  %1816 = vmatpush1.msra.mxu1 %v3776_v11  ;;  %2057 = vmatprep.subr.mxu0 %v3823_v3  ;;  %v1129_v30 = vpop.permute.xlu1 %1128  ;;  %v1131_v7 = vpop.permute.xlu0 %1130  ;;  %v1404_v53 = vrot.slane %v5736_v37, 2  ;;  %v3769_v11 = vld [vmem:[%s7358_s3 + $0x348] sm:$0xff]  ;;  %v3816_v3 = vld [vmem:[%s7358_s3 + $0x470] sm:$0xff] }
 0x1d6   :  { %v1236_v34 = vsel %vm105_vm1, %v1231_v32, %v1235_v40  ;;  %3731 = vmatprep.mubr.msk.f32.mxu1 %vm1434_vm7, %v1401_v21  ;;  %1670 = vmatmul.mubr.f32.gmra.mxu0 %v5701_v14  ;;  %v1151_v44 = vsel %vm1144_vm6, %v1129_v30, %v1131_v7  ;;  %v5761_v33 = vmax.f32 %v1077_v12, %v1131_v7  ;;  %v3820_v12 = vld [vmem:[%s7358_s3 + $0x490] sm:$0xff]  ;;  %v1402_v15 = vrot.slane %v5742_v43, 2 }
 0x1d7   :  { %v1234_v2 = vsel %vm105_vm1, %v1229_v42, %v1233_v63  ;;  %v5770_v31 = vmax.f32 %v1184_v29, %v1236_v34  ;;  %1817 = vmatprep.subr.mxu1 %v3775_v28  ;;  %2058 = vmatpush1.msra.mxu0 %v3822_v1  ;;  %v5774_v27 = vmax.f32 %v1076_v49, %v1151_v44  ;;  %v3819_v49 = vld [vmem:[%s7358_s3 + $0x488] sm:$0xff]  ;;  %v3767_v34 = vld [vmem:[%s7358_s3 + $0x338] sm:$0xff] }
 0x1d8   :  { %v1239_v62 = vrot.slane %v5761_v33, 1  ;;  %1529 = vmatmul.mubr.f32.gmra.mxu1 %v1399_v58  ;;  %3743 = vmatprep.mubr.msk.f32.mxu0 %vm1434_vm7, %v5736_v37  ;;  %v5793_v29 = vmax.f32 %v5695_v54, %v1234_v2  ;;  %v1405_v22 = vsel %vm436_vm0, %v1400_v20, %v1404_v53  ;;  %v3818_v54 = vld [vmem:[%s7358_s3 + $0x480] sm:$0xff]  ;;  %v1403_v20 = vsel %vm436_vm0, %v1398_v56, %v1402_v15  ;;  %v3815_v28 = vld [vmem:[%s7358_s3 + $0x468] sm:$0xff] }
 0x1d9   :  { %v1237_v32 = vrot.slane %v5774_v27, 1  ;;  %1818 = vmatpush1.msra.mxu1 %v3774_v38  ;;  %2059 = vmatprep.subr.mxu0 %v3821_v36  ;;  %v1133_v0 = vpop.permute.xlu1 %1132  ;;  %v1135_v24 = vpop.permute.xlu0 %1134  ;;  %v1408_v48 = vrot.slane %v5770_v31, 2 }
 0x1da   :  { %v1240_v42 = vsel %vm105_vm1, %v1235_v40, %v1239_v62  ;;  %1819 = vmatprep.subr.mxu1 %v3773_v47  ;;  %2060 = vmatpush1.msra.mxu0 %v3820_v12  ;;  %v1152_v5 = vsel %vm1144_vm6, %v1133_v0, %v1135_v24  ;;  %v5809_v26 = vmax.f32 %v1079_v13, %v1135_v24  ;;  %v3770_v13 = vld [vmem:[%s7358_s3 + $0x350] sm:$0xff]  ;;  %v1406_v40 = vrot.slane %v5793_v29, 2 }
 0x1db   :  { %1820 = vmatpush1.msra.mxu1 %v3772_v16  ;;  %2061 = vmatprep.subr.mxu0 %v3819_v49  ;;  %v5813_v4 = vmax.f32 %v1078_v45, %v1152_v5  ;;  %v1238_v59 = vsel %vm105_vm1, %v1233_v63, %v1237_v32  ;;  %v5828_v45 = vmax.f32 %v5724_v52, %v1240_v42  ;;  %v3768_v52 = vld [vmem:[%s7358_s3 + $0x340] sm:$0xff]  ;;  %v3762_v5 = vld [vmem:[%s7358_s3 + $0x310] sm:$0xff] }
 0x1dc   :  { %3732 = vmatprep.mubr.msk.f32.mxu1 %vm1434_vm7, %v1405_v22  ;;  %1676 = vmatmul.mubr.f32.gmra.mxu0 %v5742_v43  ;;  %v1243_v57 = vrot.slane %v5809_v26, 1  ;;  %v5852_v30 = vmax.f32 %v5740_v35, %v1238_v59  ;;  %v1409_v7 = vsel %vm436_vm0, %v1404_v53, %v1408_v48  ;;  %v1407_v35 = vsel %vm436_vm0, %v1402_v15, %v1406_v40  ;;  %v3765_v15 = vld [vmem:[%s7358_s3 + $0x328] sm:$0xff] }
 0x1dd   :  { %1821 = vmatprep.subr.mxu1 %v3771_v60  ;;  %2062 = vmatpush1.msra.mxu0 %v3818_v54  ;;  %v1137_v56 = vpop.permute.xlu1 %1136  ;;  %v1139_v41 = vpop.permute.xlu0 %1138  ;;  %v1241_v21 = vrot.slane %v5813_v4, 1  ;;  %v1412_v53 = vrot.slane %v5828_v45, 2  ;;  %v3763_v54 = vld [vmem:[%s7358_s3 + $0x318] sm:$0xff] }
 0x1de   :  { %1535 = vmatmul.mubr.f32.gmra.mxu1 %v1403_v20  ;;  %3744 = vmatprep.mubr.msk.f32.mxu0 %vm1434_vm7, %v5770_v31  ;;  %v1153_v1 = vsel %vm1144_vm6, %v1137_v56, %v1139_v41  ;;  %v5849_v63 = vmax.f32 %v1081_v39, %v1139_v41  ;;  %v1244_v58 = vsel %vm105_vm1, %v1239_v62, %v1243_v57  ;;  %v3812_v62 = vld [vmem:[%s7358_s3 + $0x450] sm:$0xff]  ;;  %v1410_v16 = vrot.slane %v5852_v30, 2  ;;  %v3809_v20 = vld [vmem:[%s7358_s3 + $0x438] sm:$0xff] }
 0x1df   :  { %1822 = vmatpush1.msra.mxu1 %v3770_v13  ;;  %2063 = vmatprep.subr.mxu0 %v3817_v46  ;;  %v5866_v39 = vmax.f32 %v1080_v8, %v1153_v1  ;;  %v1242_v36 = vsel %vm105_vm1, %v1237_v32, %v1241_v21  ;;  %v3813_v8 = vld [vmem:[%s7358_s3 + $0x458] sm:$0xff]  ;;  %v5882_v12 = vmax.f32 %v5761_v33, %v1244_v58  ;;  %v3764_v33 = vld [vmem:[%s7358_s3 + $0x320] sm:$0xff]  ;;  %v3811_v32 = vld [vmem:[%s7358_s3 + $0x448] sm:$0xff] }
 0x1e0   :  { %1823 = vmatprep.subr.mxu1 %v3769_v11  ;;  %2064 = vmatpush1.msra.mxu0 %v3816_v3  ;;  %v1247_v2 = vrot.slane %v5849_v63, 1  ;;  %v5903_v0 = vmax.f32 %v5774_v27, %v1242_v36  ;;  %v1413_v24 = vsel %vm436_vm0, %v1408_v48, %v1412_v53  ;;  %v3808_v13 = vld [vmem:[%s7358_s3 + $0x430] sm:$0xff]  ;;  %v3807_v11 = vld [vmem:[%s7358_s3 + $0x428] sm:$0xff]  ;;  %v3802_v36 = vld [vmem:[%s7358_s3 + $0x400] sm:$0xff] }
 0x1e1   :  { %1824 = vmatpush1.msra.mxu1 %v3768_v52  ;;  %2065 = vmatprep.subr.mxu0 %v3815_v28  ;;  %v1141_v44 = vpop.permute.xlu1 %1140  ;;  %v1143_v38 = vpop.permute.xlu0 %1142  ;;  %v1245_v49 = vrot.slane %v5866_v39, 1  ;;  %v1416_v27 = vrot.slane %v5882_v12, 2  ;;  %v3758_v1 = vld [vmem:[%s7358_s3 + $0x2f0] sm:$0xff] }
 0x1e2   :  { %3733 = vmatprep.mubr.msk.f32.mxu1 %vm1434_vm7, %v1409_v7  ;;  %1682 = vmatmul.mubr.f32.gmra.mxu0 %v5793_v29  ;;  %v1154_v47 = vsel %vm1144_vm6, %v1141_v44, %v1143_v38  ;;  %v1194_v22 = vmax.f32 %v1083_v23, %v1143_v38  ;;  %v1248_v60 = vsel %vm105_vm1, %v1243_v57, %v1247_v2  ;;  %v3761_v57 = vld [vmem:[%s7358_s3 + $0x308] sm:$0xff]  ;;  %v1414_v46 = vrot.slane %v5903_v0, 2  ;;  %v3805_v7 = vld [vmem:[%s7358_s3 + $0x418] sm:$0xff] }
 0x1e3   :  { %1825 = vmatprep.subr.mxu1 %v3767_v34  ;;  %2066 = vmatpush1.msra.mxu0 %v3814_v61  ;;  %v1193_v42 = vmax.f32 %v1082_v18, %v1154_v47  ;;  %v1411_v23 = vsel %vm436_vm0, %v1406_v40, %v1410_v16  ;;  %v1246_v55 = vsel %vm105_vm1, %v1241_v21, %v1245_v49  ;;  %v3759_v40 = vld [vmem:[%s7358_s3 + $0x2f8] sm:$0xff]  ;;  %v3806_v21 = vld [vmem:[%s7358_s3 + $0x420] sm:$0xff]  ;;  %v3757_v34 = vld [vmem:[%s7358_s3 + $0x2e8] sm:$0xff] }
 0x1e4   :  { %1541 = vmatmul.mubr.f32.gmra.mxu1 %v1407_v35  ;;  %3745 = vmatprep.mubr.msk.f32.mxu0 %vm1434_vm7, %v5828_v45  ;;  %v1251_v18 = vrot.slane %v1194_v22, 1  ;;  %v5927_v48 = vmax.f32 %v5809_v26, %v1248_v60  ;;  %v3760_v26 = vld [vmem:[%s7358_s3 + $0x300] sm:$0xff]  ;;  %v5945_v3 = vmax.f32 %v5813_v4, %v1246_v55  ;;  %v1417_v56 = vsel %vm436_vm0, %v1412_v53, %v1416_v27  ;;  %v3804_v61 = vld [vmem:[%s7358_s3 + $0x410] sm:$0xff]  ;;  %v3803_v44 = vld [vmem:[%s7358_s3 + $0x408] sm:$0xff] }
 0x1e5   :  { %1826 = vmatpush1.msra.mxu1 %v3766_v9  ;;  %2067 = vmatprep.subr.mxu0 %v3813_v8  ;;  %v1249_v59 = vrot.slane %v1193_v42, 1  ;;  %v1415_v4 = vsel %vm436_vm0, %v1410_v16, %v1414_v46  ;;  %v3801_v8 = vld [vmem:[%s7358_s3 + $0x3f8] sm:$0xff]  ;;  %v3752_v22 = vld [vmem:[%s7358_s3 + $0x2c0] sm:$0xff]  ;;  %v3839_v55 = vld [vmem:[%s7358_s3 + $0x528] sm:$0xff] }
 0x1e6   :  { %1827 = vmatprep.subr.mxu1 %v3765_v15  ;;  %2068 = vmatpush1.msra.mxu0 %v3812_v62  ;;  %v1252_v41 = vsel %vm105_vm1, %v1247_v2, %v1251_v18  ;;  %v1420_v28 = vrot.slane %v5927_v48, 2  ;;  %v1418_v35 = vrot.slane %v5945_v3, 2  ;;  %v1989_v2 = vrot.slane %v5664_v51, 6  ;;  %v3754_v15 = vld [vmem:[%s7358_s3 + $0x2d0] sm:$0xff]  ;;  %v3751_v60 = vld [vmem:[%s7358_s3 + $0x2b8] sm:$0xff]  ;;  %v3749_v18 = vld [vmem:[%s7358_s3 + $0x2a8] sm:$0xff] }
 0x1e7   :  { %1828 = vmatpush1.msra.mxu1 %v3764_v33  ;;  %2069 = vmatprep.subr.mxu0 %v3811_v32  ;;  %v1250_v52 = vsel %vm105_vm1, %v1245_v49, %v1249_v59  ;;  %v5967_v58 = vmax.f32 %v5849_v63, %v1252_v41  ;;  %v3756_v63 = vld [vmem:[%s7358_s3 + $0x2e0] sm:$0xff]  ;;  %v1988_v62 = vrot.slane %v5649_v10, 6  ;;  %v3753_v49 = vld [vmem:[%s7358_s3 + $0x2c8] sm:$0xff]  ;;  %v3800_v33 = vld [vmem:[%s7358_s3 + $0x3f0] sm:$0xff] }
 0x1e8   :  { %3734 = vmatprep.mubr.msk.f32.mxu1 %vm1434_vm7, %v1413_v24  ;;  %1688 = vmatmul.mubr.f32.gmra.mxu0 %v5852_v30  ;;  %v5977_v53 = vmax.f32 %v5866_v39, %v1250_v52  ;;  %v1421_v38 = vsel %vm436_vm0, %v1416_v27, %v1420_v28  ;;  %v3755_v39 = vld [vmem:[%s7358_s3 + $0x2d8] sm:$0xff]  ;;  %v1419_v9 = vsel %vm436_vm0, %v1414_v46, %v1418_v35  ;;  %v3750_v27 = vld [vmem:[%s7358_s3 + $0x2b0] sm:$0xff]  ;;  %v3748_v59 = vld [vmem:[%s7358_s3 + $0x2a0] sm:$0xff] }
 0x1e9   :  { %1829 = vmatprep.subr.mxu1 %v3763_v54  ;;  %2070 = vmatpush1.msra.mxu0 %v3810_v6  ;;  %v1424_v47 = vrot.slane %v5967_v58, 2  ;;  %v1990_v32 = vsel %vm1451_vm5, %v1988_v62, %v1989_v2  ;;  %v3841_v24 = vld [vmem:[%s7358_s3 + $0x538] sm:$0x3]  ;;  %v3840_v54 = vld [vmem:[%s7358_s3 + $0x530] sm:$0x3]  ;;  %v3834_v41 = vld [vmem:[%s7358_s3 + $0x500] sm:$0xff] }
 0x1ea   :  { %1547 = vmatmul.mubr.f32.gmra.mxu1 %v1411_v23  ;;  %3746 = vmatprep.mubr.msk.f32.mxu0 %vm1434_vm7, %v5882_v12  ;;  %v1422_v16 = vrot.slane %v5977_v53, 2  ;;  %v1753_v23 = vrot.slane %v5664_v51, 4  ;;  %v3836_v46 = vld [vmem:[%s7358_s3 + $0x510] sm:$0xff]  ;;  %v3785_v52 = vld [vmem:[%s7358_s3 + $0x3c8] sm:$0xff]  ;;  %v3883_v62 = vld [vmem:[%s7358_s3 + $0x638] sm:$0xff] }
 0x1eb   :  { %1830 = vmatpush1.msra.mxu1 %v3762_v5  ;;  %2071 = vmatprep.subr.mxu0 %v3809_v20  ;;  %v1425_v42 = vsel %vm436_vm0, %v1420_v28, %v1424_v47  ;;  %v1752_v5 = vrot.slane %v5649_v10, 4  ;;  %v3838_v20 = vld [vmem:[%s7358_s3 + $0x520] sm:$0xff]  ;;  %v3837_v10 = vld [vmem:[%s7358_s3 + $0x518] sm:$0xff]  ;;  %v3832_v28 = vld [vmem:[%s7358_s3 + $0x4f0] sm:$0xff]  ;;  %v1749_v47 = vrot.slane %v5654_v17, 4 }
 0x1ec   :  { %1831 = vmatprep.subr.mxu1 %v3761_v57  ;;  %2072 = vmatpush1.msra.mxu0 %v3808_v13  ;;  %v1423_v6 = vsel %vm436_vm0, %v1418_v35, %v1422_v16  ;;  %v3789_v13 = vld [vmem:[%s7358_s3 + $0x3e8] sm:$0x3]  ;;  %v3782_v35 = vld [vmem:[%s7358_s3 + $0x3b0] sm:$0xff]  ;;  %v7398_v16 = vmov 0.0  }
 0x1ed   :  { %1832 = vmatpush1.msra.mxu1 %v3760_v26  ;;  %2073 = vmatprep.subr.mxu0 %v3807_v11  ;;  %v1754_v57 = vsel %vm850_vm2, %v1752_v5, %v1753_v23  ;;  %v3788_v26 = vld [vmem:[%s7358_s3 + $0x3e0] sm:$0x3]  ;;  %v3835_v11 = vld [vmem:[%s7358_s3 + $0x508] sm:$0xff] }
 0x1ee   :  { %3735 = vmatprep.mubr.msk.f32.mxu1 %vm1434_vm7, %v1417_v56  ;;  %1694 = vmatmul.mubr.f32.gmra.mxu0 %v5903_v0  ;;  %v3787_v56 = vld [vmem:[%s7358_s3 + $0x3d8] sm:$0xff] }
 0x1ef   :  { %1833 = vmatprep.subr.mxu1 %v3759_v40  ;;  %2074 = vmatpush1.msra.mxu0 %v3806_v21  ;;  %v3786_v40 = vld [vmem:[%s7358_s3 + $0x3d0] sm:$0xff]  ;;  %v3833_v21 = vld [vmem:[%s7358_s3 + $0x4f8] sm:$0xff] }
 0x1f0   :  { %1553 = vmatmul.mubr.f32.gmra.mxu1 %v1415_v4  ;;  %3747 = vmatprep.mubr.msk.f32.mxu0 %vm1434_vm7, %v5927_v48  ;;  %v1986_v4 = vrot.slane %v5671_v25, 6 }
 0x1f1   :  { %1834 = vmatpush1.msra.mxu1 %v3758_v1  ;;  %2075 = vmatprep.subr.mxu0 %v3805_v7  ;;  %v3784_v1 = vld [vmem:[%s7358_s3 + $0x3c0] sm:$0xff]  ;;  %v1993_v7 = vrot.slane %v5691_v50, 6 }
 0x1f2   :  { %1835 = vmatprep.subr.mxu1 %v3757_v34  ;;  %2076 = vmatpush1.msra.mxu0 %v3804_v61  ;;  %v1985_v34 = vrot.slane %v5654_v17, 6  ;;  %v3783_v61 = vld [vmem:[%s7358_s3 + $0x3b8] sm:$0xff]  ;;  %v1995_v17 = vrot.slane %v5742_v43, 6 }
 0x1f3   :  { %1836 = vmatpush1.msra.mxu1 %v3756_v63  ;;  %2077 = vmatprep.subr.mxu0 %v3803_v44  ;;  %v3781_v44 = vld [vmem:[%s7358_s3 + $0x3a8] sm:$0xff] }
 0x1f4   :  { %3736 = vmatprep.mubr.msk.f32.mxu1 %vm1434_vm7, %v1421_v38  ;;  %1700 = vmatmul.mubr.f32.gmra.mxu0 %v5945_v3  ;;  %v1987_v63 = vsel %vm1451_vm5, %v1985_v34, %v1986_v4  ;;  %v1991_v38 = vrot.slane %v5701_v14, 6  ;;  %v3872_v34 = vld [vmem:[%s7358_s3 + $0x5e0] sm:$0xff] }
 0x1f5   :  { %1837 = vmatprep.subr.mxu1 %v3755_v39  ;;  %2078 = vmatpush1.msra.mxu0 %v3802_v36  ;;  %v1750_v39 = vrot.slane %v5671_v25, 4  ;;  %v1994_v36 = vsel %vm1451_vm5, %v1989_v2, %v1993_v7 }
 0x1f6   :  { %1559 = vmatmul.mubr.f32.gmra.mxu1 %v1419_v9  ;;  %2079 = vmatprep.subr.mxu0 %v3801_v8  ;;  %v3780_v9 = vld [vmem:[%s7358_s3 + $0x3a0] sm:$0xff]  ;;  %v1997_v8 = vrot.slane %v5736_v37, 6  ;;  %v1992_v2 = vsel %vm1451_vm5, %v1986_v4, %v1991_v38 }
 0x1f7   :  { %1838 = vmatpush1.msra.mxu1 %v3754_v15  ;;  %3844 = vmatprep.mubr.msk.f32.mxu0 %vm1434_vm7, %v1990_v32  ;;  %v1757_v15 = vrot.slane %v5691_v50, 4 }
 0x1f8   :  { %1839 = vmatprep.subr.mxu1 %v3753_v49  ;;  %2080 = vmatpush1.msra.mxu0 %v3800_v33  ;;  %v1751_v49 = vsel %vm850_vm2, %v1749_v47, %v1750_v39  ;;  %v3882_v33 = vld [vmem:[%s7358_s3 + $0x630] sm:$0xff]  ;;  %v1998_v32 = vsel %vm1451_vm5, %v1993_v7, %v1997_v8  ;;  %v1767_v47 = vrot.slane %v5852_v30, 4 }
 0x1f9   :  { %1840 = vmatpush1.msra.mxu1 %v3752_v22  ;;  %3842 = vmatprep.subr.msk.mxu0 %vm1451_vm5, %v3841_v24  ;;  %v3881_v22 = vld [vmem:[%s7358_s3 + $0x628] sm:$0xff]  ;;  %v1755_v24 = vrot.slane %v5701_v14, 4 }
 0x1fa   :  { %3737 = vmatprep.mubr.msk.f32.mxu1 %vm1434_vm7, %v1425_v42  ;;  %1841 = vmatprep.subr.mxu1 %v3751_v60  ;;  %v2001_v42 = vrot.slane %v5770_v31, 6  ;;  %v1758_v60 = vsel %vm850_vm2, %v1753_v23, %v1757_v15 }
 0x1fb   :  { %3843 = vmatpush2.msk.msra.mxu0 %vm1451_vm5, %v3840_v54  ;;  %1565 = vmatmul.mubr.f32.gmra.mxu1 %v1423_v6  ;;  %v3880_v54 = vld [vmem:[%s7358_s3 + $0x620] sm:$0xff]  ;;  %v1761_v6 = vrot.slane %v5736_v37, 4  ;;  %v1756_v23 = vsel %vm850_vm2, %v1750_v39, %v1755_v24  ;;  %v3870_v39 = vld [vmem:[%s7358_s3 + $0x5d0] sm:$0xff] }
 0x1fc   :  { %1842 = vmatpush1.msra.mxu1 %v3750_v27  ;;  %2105 = vmatprep.subr.mxu0 %v3839_v55  ;;  %v1996_v27 = vsel %vm1451_vm5, %v1991_v38, %v1995_v17  ;;  %v3879_v55 = vld [vmem:[%s7358_s3 + $0x618] sm:$0xff]  ;;  %v2002_v5 = vsel %vm1451_vm5, %v1997_v8, %v2001_v42  ;;  %v3869_v8 = vld [vmem:[%s7358_s3 + $0x5c8] sm:$0xff] }
 0x1fd   :  { %1843 = vmatprep.subr.mxu1 %v3749_v18  ;;  %3792 = vmatprep.mubr.msk.f32.mxu1 %vm1434_vm7, %v1754_v57  ;;  %v1999_v18 = vrot.slane %v5793_v29, 6  ;;  %v1762_v57 = vsel %vm850_vm2, %v1757_v15, %v1761_v6 }
 0x1fe   :  { %2106 = vmatpush2.msra.mxu0 %v3838_v20  ;;  %1844 = vmatpush1.msra.mxu1 %v3748_v59  ;;  %v3878_v20 = vld [vmem:[%s7358_s3 + $0x610] sm:$0xff]  ;;  %v2005_v59 = vrot.slane %v5828_v45, 6 }
 0x1ff   :  { %2107 = vmatprep.subr.mxu0 %v3837_v10  ;;  %3790 = vmatprep.subr.msk.mxu1 %vm1451_vm5, %v3789_v13  ;;  %v3877_v10 = vld [vmem:[%s7358_s3 + $0x608] sm:$0xff]  ;;  %v1759_v13 = vrot.slane %v5742_v43, 4 }
 0x200   :  { %2108 = vmatpush2.msra.mxu0 %v3836_v46  ;;  %3791 = vmatpush2.msk.msra.mxu1 %vm1451_vm5, %v3788_v26  ;;  %v3876_v46 = vld [vmem:[%s7358_s3 + $0x600] sm:$0xff]  ;;  %v1765_v26 = vrot.slane %v5770_v31, 4 }
 0x201   :  { %2109 = vmatprep.subr.mxu0 %v3835_v11  ;;  %1869 = vmatprep.subr.mxu1 %v3787_v56  ;;  %v2000_v11 = vsel %vm1451_vm5, %v1995_v17, %v1999_v18  ;;  %v3875_v56 = vld [vmem:[%s7358_s3 + $0x5f8] sm:$0xff]  ;;  %v1760_v4 = vsel %vm850_vm2, %v1755_v24, %v1759_v13  ;;  %v2011_v17 = vrot.slane %v5945_v3, 6  ;;  %v2017_v24 = vrot.slane %v5967_v58, 6 }
 0x202   :  { %2110 = vmatpush2.msra.mxu0 %v3834_v41  ;;  %1870 = vmatpush2.msra.mxu1 %v3786_v40  ;;  %v2003_v41 = vrot.slane %v5852_v30, 6  ;;  %v2006_v40 = vsel %vm1451_vm5, %v2001_v42, %v2005_v59  ;;  %v1766_v7 = vsel %vm850_vm2, %v1761_v6, %v1765_v26 }
 0x203   :  { %2111 = vmatprep.subr.mxu0 %v3833_v21  ;;  %1871 = vmatprep.subr.mxu1 %v3785_v52  ;;  %v3874_v21 = vld [vmem:[%s7358_s3 + $0x5f0] sm:$0xff]  ;;  %v2009_v52 = vrot.slane %v5882_v12, 6 }
 0x204   :  { %2112 = vmatpush2.msra.mxu0 %v3832_v28  ;;  %1872 = vmatpush2.msra.mxu1 %v3784_v1  ;;  %v3873_v28 = vld [vmem:[%s7358_s3 + $0x5e8] sm:$0xff]  ;;  %v1763_v1 = vrot.slane %v5793_v29, 4 }
 0x205   :  { %2114 = vmatmul.mubr.f32.vlgmr.msra.gmra.mxu0 %v1987_v63  ;;  %1873 = vmatprep.subr.mxu1 %v3783_v61  ;;  %v1769_v61 = vrot.slane %v5828_v45, 4  ;;  %v3871_v63 = vld [vmem:[%s7358_s3 + $0x5d8] sm:$0xff]  ;;  %v2010_v38 = vsel %vm1451_vm5, %v2005_v59, %v2009_v52  ;;  %v3862_v59 = vld [vmem:[%s7358_s3 + $0x590] sm:$0xff] }
 0x206   :  { %3845 = vmatprep.mubr.msk.f32.mxu0 %vm1434_vm7, %v1994_v36  ;;  %1874 = vmatpush2.msra.mxu1 %v3782_v35  ;;  %v2004_v35 = vsel %vm1451_vm5, %v1999_v18, %v2003_v41  ;;  %v2013_v36 = vrot.slane %v5927_v48, 6  ;;  %v1768_v42 = vsel %vm850_vm2, %v1763_v1, %v1767_v47 }
 0x207   :  { %1875 = vmatprep.subr.mxu1 %v3781_v44  ;;  %2652 = vmatprep.subr.mxu0 %v7398_v16  ;;  %v2007_v44 = vrot.slane %v5903_v0, 6  ;;  %v1770_v15 = vsel %vm850_vm2, %v1765_v26, %v1769_v61  ;;  %v3860_v26 = vld [vmem:[%s7358_s3 + $0x580] sm:$0xff] }
 0x208   :  { %1876 = vmatpush2.msra.mxu1 %v3780_v9  ;;  %v1764_v9 = vsel %vm850_vm2, %v1759_v13, %v1763_v1  ;;  %v1775_v13 = vrot.slane %v5945_v3, 4  ;;  %v3856_v1 = vld [vmem:[%s7358_s3 + $0x560] sm:$0xff] }
 0x209   :  { %2120 = vmatmul.mubr.f32.gmra.mxu0 %v1992_v2  ;;  %1878 = vmatmul.mubr.f32.vlgmr.msra.gmra.mxu1 %v1751_v49  ;;  %v1773_v2 = vrot.slane %v5882_v12, 4  ;;  %v2008_v49 = vsel %vm1451_vm5, %v2003_v41, %v2007_v44  ;;  %v2012_v18 = vsel %vm1451_vm5, %v2007_v44, %v2011_v17  ;;  %v3859_v41 = vld [vmem:[%s7358_s3 + $0x578] sm:$0xff]  ;;  %v3893_v44 = vld [vmem:[%s7358_s3 + $0x688] sm:$0x3] }
 0x20a   :  { %3846 = vmatprep.mubr.msk.f32.mxu0 %vm1434_vm7, %v1998_v32  ;;  %2229 = vmatprep.subr.mxu1 %v3883_v62  ;;  %v3868_v62 = vld [vmem:[%s7358_s3 + $0x5c0] sm:$0xff]  ;;  %v2014_v32 = vsel %vm1451_vm5, %v2009_v52, %v2013_v36  ;;  %v3857_v52 = vld [vmem:[%s7358_s3 + $0x568] sm:$0xff] }
 0x20b   :  { %3793 = vmatprep.mubr.msk.f32.mxu1 %vm1434_vm7, %v1758_v60  ;;  %2230 = vmatpush1.msra.mxu1 %v3882_v33  ;;  %v3867_v33 = vld [vmem:[%s7358_s3 + $0x5b8] sm:$0xff]  ;;  %v3865_v60 = vld [vmem:[%s7358_s3 + $0x5a8] sm:$0xff]  ;;  %v1774_v6 = vsel %vm850_vm2, %v1769_v61, %v1773_v2 }
 0x20c   :  { %2231 = vmatprep.subr.mxu1 %v3881_v22  ;;  %v3866_v22 = vld [vmem:[%s7358_s3 + $0x5b0] sm:$0xff] }
 0x20d   :  { %2126 = vmatmul.mubr.f32.gmra.mxu0 %v1996_v27  ;;  %2232 = vmatpush1.msra.mxu1 %v3880_v54  ;;  %v1771_v54 = vrot.slane %v5903_v0, 4  ;;  %v3864_v27 = vld [vmem:[%s7358_s3 + $0x5a0] sm:$0xff] }
 0x20e   :  { %1884 = vmatmul.mubr.f32.gmra.mxu1 %v1756_v23  ;;  %3847 = vmatprep.mubr.msk.f32.mxu0 %vm1434_vm7, %v2002_v5  ;;  %v3863_v23 = vld [vmem:[%s7358_s3 + $0x598] sm:$0xff]  ;;  %v2015_v5 = vrot.slane %v5977_v53, 6 }
 0x20f   :  { %2233 = vmatprep.subr.mxu1 %v3879_v55  ;;  %3794 = vmatprep.mubr.msk.f32.mxu1 %vm1434_vm7, %v1762_v57  ;;  %v1777_v55 = vrot.slane %v5927_v48, 4  ;;  %v1772_v57 = vsel %vm850_vm2, %v1767_v47, %v1771_v54  ;;  %v3886_v47 = vld [vmem:[%s7358_s3 + $0x650] sm:$0xff] }
 0x210   :  { %2234 = vmatpush1.msra.mxu1 %v3878_v20  ;;  %v2018_v20 = vsel %vm1451_vm5, %v2013_v36, %v2017_v24  ;;  %v3889_v36 = vld [vmem:[%s7358_s3 + $0x668] sm:$0xff]  ;;  %v2575_v24 = vld [vmem:[%s7360_s5 + $0x50] sm:$0xff] }
 0x211   :  { %2235 = vmatprep.subr.mxu1 %v3877_v10  ;;  %2132 = vmatmul.mubr.f32.gmra.mxu0 %v2000_v11  ;;  %v3861_v10 = vld [vmem:[%s7358_s3 + $0x588] sm:$0xff]  ;;  %v1781_v11 = vrot.slane %v5967_v58, 4 }
 0x212   :  { %2236 = vmatpush1.msra.mxu1 %v3876_v46  ;;  %3848 = vmatprep.mubr.msk.f32.mxu0 %vm1434_vm7, %v2006_v40  ;;  %v1778_v46 = vsel %vm850_vm2, %v1773_v2, %v1777_v55  ;;  %v3858_v40 = vld [vmem:[%s7358_s3 + $0x570] sm:$0xff]  ;;  %v2577_v2 = vld [vmem:[%s7360_s5 + $0x60] sm:$0xff] }
 0x213   :  { %1890 = vmatmul.mubr.f32.gmra.mxu1 %v1760_v4  ;;  %2237 = vmatprep.subr.mxu1 %v3875_v56  ;;  %v2016_v56 = vsel %vm1451_vm5, %v2011_v17, %v2015_v5  ;;  %v1779_v4 = vrot.slane %v5977_v53, 4  ;;  %v2572_v5 = vld [vmem:[%s7360_s5 + $0x38] sm:$0xff] }
 0x214   :  { %3795 = vmatprep.mubr.msk.f32.mxu1 %vm1434_vm7, %v1766_v7  ;;  %2238 = vmatpush1.msra.mxu1 %v3874_v21  ;;  %v1776_v21 = vsel %vm850_vm2, %v1771_v54, %v1775_v13  ;;  %v3855_v7 = vld [vmem:[%s7358_s3 + $0x558] sm:$0xff]  ;;  %v3914_v54 = vld [vmem:[%s7360_s5 + $0xe0] sm:$0xff] }
 0x215   :  { %2239 = vmatprep.subr.mxu1 %v3873_v28  ;;  %2138 = vmatmul.mubr.f32.gmra.mxu0 %v2004_v35  ;;  %v1782_v28 = vsel %vm850_vm2, %v1777_v55, %v1781_v11  ;;  %v1780_v61 = vsel %vm850_vm2, %v1775_v13, %v1779_v4  ;;  %v3853_v35 = vld [vmem:[%s7358_s3 + $0x548] sm:$0xff]  ;;  %v2573_v55 = vld [vmem:[%s7360_s5 + $0x40] sm:$0xff] }
 0x216   :  { %2240 = vmatpush1.msra.mxu1 %v3872_v34  ;;  %3849 = vmatprep.mubr.msk.f32.mxu0 %vm1434_vm7, %v2010_v38  ;;  %v3854_v34 = vld [vmem:[%s7358_s3 + $0x550] sm:$0xff]  ;;  %v3892_v38 = vld [vmem:[%s7358_s3 + $0x680] sm:$0x3] }
 0x217   :  { %1896 = vmatmul.mubr.f32.gmra.mxu1 %v1764_v9  ;;  %2241 = vmatprep.subr.mxu1 %v3871_v63  ;;  %v3852_v63 = vld [vmem:[%s7358_s3 + $0x540] sm:$0xff] }
 0x218   :  { %3796 = vmatprep.mubr.msk.f32.mxu1 %vm1434_vm7, %v1770_v15  ;;  %2242 = vmatpush1.msra.mxu1 %v3870_v39  ;;  %v3891_v39 = vld [vmem:[%s7358_s3 + $0x678] sm:$0xff]  ;;  %v3888_v9 = vld [vmem:[%s7358_s3 + $0x660] sm:$0xff]  ;;  %v3885_v15 = vld [vmem:[%s7358_s3 + $0x648] sm:$0xff] }
 0x219   :  { %2243 = vmatprep.subr.mxu1 %v3869_v8  ;;  %2144 = vmatmul.mubr.f32.gmra.mxu0 %v2008_v49  ;;  %v3887_v8 = vld [vmem:[%s7358_s3 + $0x658] sm:$0xff] }
 0x21a   :  { %2244 = vmatpush1.msra.mxu1 %v3868_v62  ;;  %3850 = vmatprep.mubr.msk.f32.mxu0 %vm1434_vm7, %v2014_v32  ;;  %v3884_v62 = vld [vmem:[%s7358_s3 + $0x640] sm:$0xff]  ;;  %v2576_v32 = vld [vmem:[%s7360_s5 + $0x58] sm:$0xff] }
 0x21b   :  { %1902 = vmatmul.mubr.f32.gmra.mxu1 %v1768_v42  ;;  %2245 = vmatprep.subr.mxu1 %v3867_v33  ;;  %v3916_v33 = vld [vmem:[%s7360_s5 + $0xf0] sm:$0xff] }
 0x21c   :  { %3797 = vmatprep.mubr.msk.f32.mxu1 %vm1434_vm7, %v1774_v6  ;;  %2246 = vmatpush1.msra.mxu1 %v3866_v22  ;;  %v3915_v22 = vld [vmem:[%s7360_s5 + $0xe8] sm:$0xff] }
 0x21d   :  { %2247 = vmatprep.subr.mxu1 %v3865_v60  ;;  %2150 = vmatmul.mubr.f32.gmra.mxu0 %v2012_v18  ;;  %v2574_v6 = vld [vmem:[%s7360_s5 + $0x48] sm:$0xff] }
 0x21e   :  { %2248 = vmatpush1.msra.mxu1 %v3864_v27  ;;  %3851 = vmatprep.mubr.msk.f32.mxu0 %vm1434_vm7, %v2018_v20  ;;  %v3913_v27 = vld [vmem:[%s7360_s5 + $0xd8] sm:$0xff]  ;;  %v2571_v20 = vld [vmem:[%s7360_s5 + $0x30] sm:$0xff] }
 0x21f   :  { %1908 = vmatmul.mubr.f32.gmra.mxu1 %v1772_v57  ;;  %2249 = vmatprep.subr.mxu1 %v3863_v23 }
 0x220   :  { %3798 = vmatprep.mubr.msk.f32.mxu1 %vm1434_vm7, %v1778_v46  ;;  %2250 = vmatpush1.msra.mxu1 %v3862_v59 }
 0x221   :  { %2251 = vmatprep.subr.mxu1 %v3861_v10  ;;  %2156 = vmatmul.mubr.f32.gmra.mxu0 %v2016_v56 }
 0x222   :  { %2252 = vmatpush1.msra.mxu1 %v3860_v26 }
 0x223   :  { %1914 = vmatmul.mubr.f32.gmra.mxu1 %v1776_v21  ;;  %2253 = vmatprep.subr.mxu1 %v3859_v41 }
 0x224   :  { %3799 = vmatprep.mubr.msk.f32.mxu1 %vm1434_vm7, %v1782_v28  ;;  %2254 = vmatpush1.msra.mxu1 %v3858_v40 }
 0x225   :  { %2255 = vmatprep.subr.mxu1 %v3857_v52 }
 0x226   :  { %2256 = vmatpush1.msra.mxu1 %v3856_v1 }
 0x227   :  { %1920 = vmatmul.mubr.f32.gmra.mxu1 %v1780_v61  ;;  %2257 = vmatprep.subr.mxu1 %v3855_v7 }
 0x228   :  { %2258 = vmatpush1.msra.mxu1 %v3854_v34  ;;  %3896 = vmatprep.mubr.msk.f32.mxu1 %vm1434_vm7, %v5664_v51  ;;  %v3890_v51 = vld [vmem:[%s7358_s3 + $0x670] sm:$0xff] }
 0x229   :  { %2259 = vmatprep.subr.mxu1 %v3853_v35 }
 0x22a   :  { %2260 = vmatpush1.msra.mxu1 %v3852_v63 }
 0x22b   :  { %3894 = vmatprep.subr.msk.mxu1 %vm1451_vm5, %v3893_v44 }
 0x22c   :  { %3895 = vmatpush2.msk.msra.mxu1 %vm1451_vm5, %v3892_v38 }
 0x22d   :  { %2285 = vmatprep.subr.mxu1 %v3891_v39 }
 0x22e   :  { %2286 = vmatpush2.msra.mxu1 %v3890_v51 }
 0x22f   :  { %2287 = vmatprep.subr.mxu1 %v3889_v36 }
 0x230   :  { %2288 = vmatpush2.msra.mxu1 %v3888_v9 }
 0x231   :  { %2289 = vmatprep.subr.mxu1 %v3887_v8 }
 0x232   :  { %2290 = vmatpush2.msra.mxu1 %v3886_v47 }
 0x233   :  { %2291 = vmatprep.subr.mxu1 %v3885_v15 }
 0x234   :  { %2292 = vmatpush2.msra.mxu1 %v3884_v62 }
 0x235   :  { %2294 = vmatmul.mubr.f32.vlgmr.msra.gmra.mxu1 %v5671_v25  ;;  %2752 = vmatprep.subr.mxu1 %v7398_v16 }
 0x236   :  { %3897 = vmatprep.mubr.msk.f32.mxu1 %vm1434_vm7, %v5691_v50 }
 0x239   :  { %2300 = vmatmul.mubr.f32.gmra.mxu1 %v5701_v14 }
 0x23a   :  { %3898 = vmatprep.mubr.msk.f32.mxu1 %vm1434_vm7, %v5736_v37 }
 0x23d   :  { %2306 = vmatmul.mubr.f32.gmra.mxu1 %v5742_v43 }
 0x23e   :  { %3899 = vmatprep.mubr.msk.f32.mxu1 %vm1434_vm7, %v5770_v31 }
 0x241   :  { %2312 = vmatmul.mubr.f32.gmra.mxu1 %v5793_v29 }
 0x242   :  { %3900 = vmatprep.mubr.msk.f32.mxu1 %vm1434_vm7, %v5828_v45  ;;  %v2580_v45 = vld [vmem:[%s7360_s5 + $0x78] sm:$0xff] }
 0x243   :  { %2753 = vmatpush1.msra.mxu1 %v2580_v45 }
 0x244   :  { %2754 = vmatprep.subr.mxu1 %v7398_v16 }
 0x245   :  { %2318 = vmatmul.mubr.f32.gmra.mxu1 %v5852_v30  ;;  %v2579_v30 = vld [vmem:[%s7360_s5 + $0x70] sm:$0xff] }
 0x246   :  { %3901 = vmatprep.mubr.msk.f32.mxu1 %vm1434_vm7, %v5882_v12  ;;  %2755 = vmatpush1.msra.mxu1 %v2579_v30 }
 0x247   :  { %2756 = vmatprep.subr.mxu1 %v7398_v16 }
 0x249   :  { %2324 = vmatmul.mubr.f32.gmra.mxu1 %v5903_v0  ;;  %v3919_v0 = vld [vmem:[%s7360_s5 + $0x108] sm:$0xff] }
 0x24a   :  { %3902 = vmatprep.mubr.msk.f32.mxu1 %vm1434_vm7, %v5927_v48  ;;  %2653 = vmatpush1.msra.mxu0 %v3919_v0 }
 0x24b   :  { %2654 = vmatprep.subr.mxu0 %v7398_v16 }
 0x24d   :  { %2330 = vmatmul.mubr.f32.gmra.mxu1 %v5945_v3  ;;  %v2578_v3 = vld [vmem:[%s7360_s5 + $0x68] sm:$0xff] }
 0x24e   :  { %3903 = vmatprep.mubr.msk.f32.mxu1 %vm1434_vm7, %v5967_v58  ;;  %v3918_v58 = vld [vmem:[%s7360_s5 + $0x100] sm:$0xff]  ;;  %2757 = vmatpush1.msra.mxu1 %v2578_v3 }
 0x24f   :  { %2655 = vmatpush1.msra.mxu0 %v3918_v58  ;;  %2758 = vmatprep.subr.mxu1 %v7398_v16 }
 0x250   :  { %2656 = vmatprep.subr.mxu0 %v7398_v16  ;;  %2759 = vmatpush1.msra.mxu1 %v2577_v2 }
 0x251   :  { %2336 = vmatmul.mubr.f32.gmra.mxu1 %v5977_v53  ;;  %v3917_v53 = vld [vmem:[%s7360_s5 + $0xf8] sm:$0xff]  ;;  %2760 = vmatprep.subr.mxu1 %v7398_v16 }
 0x252   :  { %2657 = vmatpush1.msra.mxu0 %v3917_v53  ;;  %2761 = vmatpush1.msra.mxu1 %v2576_v32 }
 0x253   :  { %2658 = vmatprep.subr.mxu0 %v7398_v16  ;;  %2762 = vmatprep.subr.mxu1 %v7398_v16 }
 0x254   :  { %2659 = vmatpush1.msra.mxu0 %v3916_v33  ;;  %2763 = vmatpush1.msra.mxu1 %v2575_v24 }
 0x255   :  { %2660 = vmatprep.subr.mxu0 %v7398_v16  ;;  %2764 = vmatprep.subr.mxu1 %v7398_v16 }
 0x256   :  { %2661 = vmatpush1.msra.mxu0 %v3915_v22  ;;  %2765 = vmatpush1.msra.mxu1 %v2574_v6 }
 0x257   :  { %2662 = vmatprep.subr.mxu0 %v7398_v16  ;;  %2766 = vmatprep.subr.mxu1 %v7398_v16 }
 0x258   :  { %2663 = vmatpush1.msra.mxu0 %v3914_v54  ;;  %2767 = vmatpush1.msra.mxu1 %v2573_v55 }
 0x259   :  { %2664 = vmatprep.subr.mxu0 %v7398_v16  ;;  %2768 = vmatprep.subr.mxu1 %v7398_v16 }
 0x25a   :  { %2665 = vmatpush1.msra.mxu0 %v3913_v27  ;;  %2769 = vmatpush1.msra.mxu1 %v2572_v5  ;;  %v2358_v5 = vld [vmem:[%s7359_s4] sm:$0x3] }
 0x25b   :  { %2666 = vmatprep.subr.mxu0 %v7398_v16  ;;  %2770 = vmatprep.subr.mxu1 %v7398_v16 }
 0x25c   :  { %2771 = vmatpush1.msra.mxu1 %v2571_v20 }
 0x25d   :  { %2772 = vmatprep.subr.mxu1 %v7398_v16 }
 0x28c   :  { %v6343_v14 = vpop.f32.mrf.mxu0 }
 0x28e   :  { %v6349_v31 = vpop.f32.mrf.mxu0 }
 0x291   :  { %v6339_v25 = vpop.f32.mrf.mxu1  ;;  %v6359_v12 = vpop.f32.mrf.mxu0 }
 0x292   :  { %v1660_v32 = vadd.f32 %v6343_v14, %v6339_v25  ;;  %v3912_v14 = vld [vmem:[%s7360_s5 + $0xd0] sm:$0xff] }
 0x293   :  { %v6341_v50 = vpop.f32.mrf.mxu1  ;;  %v6381_v49 = vpop.f32.mrf.mxu0  ;;  %2667 = vmatpush1.msra.mxu0 %v3912_v14 }
 0x294   :  { %v1662_v24 = vadd.f32 %v6349_v31, %v6341_v50  ;;  %v2570_v50 = vld [vmem:[%s7360_s5 + $0x28] sm:$0xff]  ;;  %2668 = vmatprep.subr.mxu0 %v7398_v16 }
 0x295   :  { %2773 = vmatpush1.msra.mxu1 %v2570_v50 }
 0x296   :  { %v6401_v42 = vpop.f32.mrf.mxu0  ;;  %2774 = vmatprep.subr.mxu1 %v7398_v16 }
 0x298   :  { %v6345_v37 = vpop.f32.mrf.mxu1  ;;  %v6421_v18 = vpop.f32.mrf.mxu0 }
 0x299   :  { %v1666_v27 = vadd.f32 %v6359_v12, %v6345_v37  ;;  %v2569_v37 = vld [vmem:[%s7360_s5 + $0x20] sm:$0xff] }
 0x29a   :  { %v6347_v43 = vpop.f32.mrf.mxu1  ;;  %2775 = vmatpush1.msra.mxu1 %v2569_v37 }
 0x29b   :  { %v1668_v20 = vadd.f32 %v6381_v49, %v6347_v43  ;;  %v3911_v43 = vld [vmem:[%s7360_s5 + $0xc8] sm:$0xff]  ;;  %2776 = vmatprep.subr.mxu1 %v7398_v16 }
 0x29c   :  { %v6435_v59 = vpop.f32.mrf.mxu0  ;;  %2669 = vmatpush1.msra.mxu0 %v3911_v43 }
 0x29d   :  { %2670 = vmatprep.subr.mxu0 %v7398_v16 }
 0x29e   :  { %v6351_v29 = vpop.f32.mrf.mxu1  ;;  %v6441_v10 = vpop.f32.mrf.mxu0 }
 0x2a0   :  { %v6364_v48 = vpop.f32.mrf.mxu1 }
 0x2a2   :  { %v6445_v46 = vpop.f32.mrf.mxu0 }
 0x2a4   :  { %v6387_v17 = vpop.f32.mrf.mxu1  ;;  %v6449_v11 = vpop.f32.mrf.mxu0 }
 0x2a6   :  { %v6403_v60 = vpop.f32.mrf.mxu1 }
 0x2a8   :  { %v6453_v41 = vpop.f32.mrf.mxu0 }
 0x2aa   :  { %v6423_v23 = vpop.f32.mrf.mxu1  ;;  %v6457_v21 = vpop.f32.mrf.mxu0 }
 0x2ac   :  { %v6437_v57 = vpop.f32.mrf.mxu1 }
 0x2ae   :  { %v6461_v4 = vpop.f32.mrf.mxu0 }
 0x2b0   :  { %v6443_v13 = vpop.f32.mrf.mxu1  ;;  %v6465_v7 = vpop.f32.mrf.mxu0 }
 0x2b2   :  { %v6447_v26 = vpop.f32.mrf.mxu1 }
 0x2b4   :  { %v6467_v35 = vpop.f32.mrf.mxu0 }
 0x2b6   :  { %v6451_v56 = vpop.f32.mrf.mxu1  ;;  %v6469_v44 = vpop.f32.mrf.mxu0 }
 0x2b8   :  { %v6455_v40 = vpop.f32.mrf.mxu1 }
 0x2bb   :  { %v6459_v52 = vpop.f32.mrf.mxu1 }
 0x2bd   :  { %v6463_v28 = vpop.f32.mrf.mxu1 }
 0x2c5   :  { %v2115_v39 = vpop.f32.mrf.mxu0 }
 0x2c7   :  { %v2117_v9 = vpop.f32.mrf.mxu0 }
 0x2c9   :  { %v1879_v1 = vpop.f32.mrf.mxu1  ;;  %v2121_v15 = vpop.f32.mrf.mxu0 }
 0x2ca   :  { %v1926_v54 = vadd.f32 %v1879_v1, %v1660_v32  ;;  %v7401_v32 = vsub.s32 0, %v5291_v19 }
 0x2cb   :  { %v1881_v34 = vpop.f32.mrf.mxu1  ;;  %v2123_v30 = vpop.f32.mrf.mxu0 }
 0x2cc   :  { %v1927_v55 = vadd.f32 %v1881_v34, %v1662_v24  ;;  %v2162_v12 = vadd.f32 %v2115_v39, %v1926_v54  ;;  %v6526_v24 = vrot.slane %v2358_v5, %v7401_v32  ;;  %v1674_v54 = vadd.f32 %v6421_v18, %v6364_v48 }
 0x2cd   :  { %v6483_v3 = vpop.f32.mrf.mxu0  ;;  %v1678_v48 = vadd.f32 %v6435_v59, %v6387_v17  ;;  %v3909_v17 = vld [vmem:[%s7360_s5 + $0xb8] sm:$0xff]  ;;  %v1680_v59 = vadd.f32 %v6441_v10, %v6403_v60  ;;  %v3908_v60 = vld [vmem:[%s7360_s5 + $0xb0] sm:$0xff]  ;;  %v1684_v10 = vadd.f32 %v6445_v46, %v6423_v23 }
 0x2ce   :  { %v1885_v61 = vpop.f32.mrf.mxu1 }
 0x2cf   :  { %v6487_v53 = vpop.f32.mrf.mxu0  ;;  %v1928_v31 = vadd.f32 %v1885_v61, %v1666_v27  ;;  %v1672_v61 = vadd.f32 %v6401_v42, %v6351_v29  ;;  %v3910_v29 = vld [vmem:[%s7360_s5 + $0xc0] sm:$0xff] }
 0x2d0   :  { %v1887_v63 = vpop.f32.mrf.mxu1  ;;  %2671 = vmatpush1.msra.mxu0 %v3910_v29 }
 0x2d1   :  { %v6491_v33 = vpop.f32.mrf.mxu0  ;;  %v1929_v49 = vadd.f32 %v1887_v63, %v1668_v20  ;;  %v2163_v63 = vadd.f32 %v2117_v9, %v1927_v55  ;;  %v2164_v50 = vadd.f32 %v2121_v15, %v1928_v31  ;;  %2672 = vmatprep.subr.mxu0 %v7398_v16  ;;  %v2566_v31 = vld [vmem:[%s7360_s5 + $0x8] sm:$0xff] }
 0x2d2   :  { %2673 = vmatpush1.msra.mxu0 %v3909_v17 }
 0x2d3   :  { %v1891_v38 = vpop.f32.mrf.mxu1  ;;  %v6499_v6 = vpop.f32.mrf.mxu0  ;;  %v2165_v55 = vadd.f32 %v2123_v30, %v1929_v49  ;;  %2674 = vmatprep.subr.mxu0 %v7398_v16 }
 0x2d4   :  { %v1930_v20 = vadd.f32 %v1891_v38, %v1672_v61  ;;  %v2567_v38 = vld [vmem:[%s7360_s5 + $0x10] sm:$0xff]  ;;  %2675 = vmatpush1.msra.mxu0 %v3908_v60 }
 0x2d5   :  { %v1893_v51 = vpop.f32.mrf.mxu1  ;;  %v6522_v1 = vpop.f32.mrf.mxu0  ;;  %2676 = vmatprep.subr.mxu0 %v7398_v16 }
 0x2d6   :  { %v1931_v42 = vadd.f32 %v1893_v51, %v1674_v54 }
 0x2d7   :  { %v6471_v36 = vpop.f32.mrf.mxu1  ;;  %v6548_v18 = vpop.f32.mrf.mxu0 }
 0x2d8   :  { %v1932_v51 = vadd.f32 %v6471_v36, %v1678_v48  ;;  %v1686_v36 = vadd.f32 %v6449_v11, %v6437_v57  ;;  %v3907_v57 = vld [vmem:[%s7360_s5 + $0xa8] sm:$0xff] }
 0x2d9   :  { %v6473_v8 = vpop.f32.mrf.mxu1  ;;  %v6584_v32 = vpop.f32.mrf.mxu0  ;;  %2677 = vmatpush1.msra.mxu0 %v3907_v57 }
 0x2da   :  { %2678 = vmatprep.subr.mxu0 %v7398_v16 }
 0x2db   :  { %v6475_v47 = vpop.f32.mrf.mxu1  ;;  %v2147_v29 = vpop.f32.mrf.mxu0 }
 0x2dc   :  { %v1934_v11 = vadd.f32 %v6475_v47, %v1684_v10 }
 0x2dd   :  { %v6477_v62 = vpop.f32.mrf.mxu1 }
 0x2df   :  { %v6479_v45 = vpop.f32.mrf.mxu1 }
 0x2e1   :  { %v6481_v0 = vpop.f32.mrf.mxu1 }
 0x2e3   :  { %v6485_v58 = vpop.f32.mrf.mxu1 }
 0x2e5   :  { %v6489_v2 = vpop.f32.mrf.mxu1 }
 0x2e7   :  { %v6495_v22 = vpop.f32.mrf.mxu1 }
 0x2e8   :  { %7399 = vst [vmem:[#allocation13_spill] sm:$0xff] %v6495_v22 }
 0x2e9   :  { %v6508_v25 = vpop.f32.mrf.mxu1 }
 0x2ea   :  { %7400 = vst [vmem:[#allocation5_spill] sm:$0xff] %v6508_v25  ;;  %v7402_v25 = vsub.s32 1, %v5291_v19 }
 0x2ec   :  { %v6530_v22 = vrot.slane %v2358_v5, %v7402_v25  ;;  %v2568_v5 = vld [vmem:[%s7360_s5 + $0x18] sm:$0xff] }
 0x2ed   :  { %2777 = vmatpush1.msra.mxu1 %v2568_v5  ;;  %v2582_v5 = vld [vmem:[%s7360_s5 + $0x88] sm:$0xff] }
 0x2ee   :  { %2778 = vmatprep.subr.mxu1 %v7398_v16 }
 0x2ef   :  { %2779 = vmatpush1.msra.mxu1 %v2567_v38 }
 0x2f0   :  { %2780 = vmatprep.subr.mxu1 %v7398_v16 }
 0x2f1   :  { %2781 = vmatpush1.msra.mxu1 %v2566_v31 }
 0x2f2   :  { %2782 = vmatprep.subr.mxu1 %v7398_v16 }
 0x2f5   :  { %v2295_v34 = vpop.f32.mrf.mxu1 }
 0x2f6   :  { %v2342_v39 = vadd.f32 %v2295_v34, %v2162_v12  ;;  %v2166_v34 = vadd.f32 %v6483_v3, %v1930_v20  ;;  %v2565_v3 = vld [vmem:[%s7360_s5] sm:$0xff] }
 0x2f7   :  { %v2297_v27 = vpop.f32.mrf.mxu1  ;;  %2783 = vmatpush1.msra.mxu1 %v2565_v3 }
 0x2f8   :  { %v2343_v25 = vadd.f32 %v2297_v27, %v2163_v63  ;;  %v6555_v15 = vadd.f32 %v6526_v24, %v2342_v39  ;;  %v2167_v39 = vadd.f32 %v6487_v53, %v1931_v42  ;;  %v1933_v63 = vadd.f32 %v6473_v8, %v1680_v59  ;;  %2812 = vmatprep.subr.mxu1 %v7398_v16  ;;  %v2581_v42 = vld [vmem:[%s7360_s5 + $0x80] sm:$0xff] }
 0x2f9   :  { %v2301_v9 = vpop.f32.mrf.mxu1  ;;  %v2168_v27 = vadd.f32 %v6491_v33, %v1932_v51  ;;  %v3906_v33 = vld [vmem:[%s7360_s5 + $0xa0] sm:$0xff]  ;;  %2813 = vmatpush2.msra.mxu1 %v2582_v5  ;;  %v2170_v51 = vadd.f32 %v6522_v1, %v1934_v11 }
 0x2fa   :  { %v6558_v14 = vadd.f32 %v6530_v22, %v2343_v25  ;;  %v2344_v37 = vadd.f32 %v2301_v9, %v2164_v50  ;;  %v2386_v54 = vmax.f32 %v6555_v15, 0.0  ;;  %v1690_v50 = vadd.f32 %v6453_v41, %v6443_v13  ;;  %2679 = vmatpush1.msra.mxu0 %v3906_v33  ;;  %v3905_v9 = vld [vmem:[%s7360_s5 + $0x98] sm:$0xff]  ;;  %2814 = vmatprep.subr.mxu1 %v7398_v16  ;;  %v7403_v5 = vld [vmem:[#allocation13_spill] sm:$0xff] }
 0x2fb   :  { %v2303_v30 = vpop.f32.mrf.mxu1  ;;  %v2169_v13 = vadd.f32 %v6499_v6, %v1933_v63  ;;  %v1692_v41 = vadd.f32 %v6457_v21, %v6447_v26  ;;  %2680 = vmatprep.subr.mxu0 %v7398_v16  ;;  %2815 = vmatpush2.msra.mxu1 %v2581_v42  ;;  %v3904_v26 = vld [vmem:[%s7360_s5 + $0x90] sm:$0xff]  ;;  %v1696_v21 = vadd.f32 %v6461_v4, %v6451_v56 }
 0x2fc   :  { %v2387_v12 = vmax.f32 %v6558_v14, 0.0  ;;  %v6573_v43 = vadd.f32 %v6526_v24, %v2344_v37  ;;  %v2345_v49 = vadd.f32 %v2303_v30, %v2165_v55  ;;  %v1935_v55 = vadd.f32 %v6477_v62, %v1686_v36  ;;  %2681 = vmatpush1.msra.mxu0 %v3905_v9  ;;  %2986 = vmatprep.subr.mxu1 %v7398_v16 }
 0x2fd   :  { %v2307_v61 = vpop.f32.mrf.mxu1  ;;  %v1936_v17 = vadd.f32 %v6479_v45, %v1690_v50  ;;  %v2151_v45 = vpop.f32.mrf.mxu0  ;;  %2682 = vmatprep.subr.mxu0 %v7398_v16  ;;  %v1698_v4 = vadd.f32 %v6465_v7, %v6455_v40  ;;  %v1938_v36 = vadd.f32 %v6485_v58, %v1696_v21  ;;  %v3920_v40 = vld [vmem:[%s7360_s5 + $0x110] sm:$0xff]  ;;  %v1702_v7 = vadd.f32 %v6467_v35, %v6459_v52 }
 0x2fe   :  { %v2388_v23 = vmax.f32 %v6573_v43, 0.0  ;;  %v2346_v46 = vadd.f32 %v2307_v61, %v2166_v34  ;;  %2420 = vrot.lane.b32.xlu0 %v2387_v12, %s4224_s16  ;;  %v6603_v8 = vadd.f32 %v6530_v22, %v2345_v49  ;;  %v3921_v49 = vld [vmem:[%s7360_s5 + $0x118] sm:$0xff]  ;;  %v1937_v34 = vadd.f32 %v6481_v0, %v1692_v41  ;;  %2683 = vmatpush1.msra.mxu0 %v3904_v26 }
 0x2ff   :  { %v2309_v53 = vpop.f32.mrf.mxu1  ;;  %v2171_v56 = vadd.f32 %v6548_v18, %v1935_v55  ;;  %2712 = vmatprep.subr.mxu0 %v7398_v16  ;;  %v2153_v58 = vpop.f32.mrf.mxu0  ;;  %v1940_v52 = vadd.f32 %v7403_v5, %v1702_v7 }
 0x300   :  { %v6610_v20 = vadd.f32 %v6526_v24, %v2346_v46  ;;  %v2347_v25 = vadd.f32 %v2309_v53, %v2167_v39  ;;  %v4195_v47 = vpack.i.bf16 %v2388_v23, %v2386_v54  ;;  %v2389_v62 = vmax.f32 %v6603_v8, 0.0  ;;  %2713 = vmatpush2.msra.mxu0 %v3921_v49 }
 0x301   :  { %v2313_v48 = vpop.f32.mrf.mxu1  ;;  %v2172_v39 = vadd.f32 %v6584_v32, %v1936_v17  ;;  %2714 = vmatprep.subr.mxu0 %v7398_v16  ;;  %v1939_v46 = vadd.f32 %v6489_v2, %v1698_v4  ;;  %v2173_v53 = vadd.f32 %v2147_v29, %v1937_v34  ;;  %v7404_v29 = vld [vmem:[#allocation5_spill] sm:$0xff] }
 0x302   :  { %v2390_v38 = vmax.f32 %v6610_v20, 0.0  ;;  %v2348_v37 = vadd.f32 %v2313_v48, %v2168_v27  ;;  %4196 = vrot.lane.b32.xlu1 %v4195_v47, %s4224_s16  ;;  %v6641_v30 = vadd.f32 %v6530_v22, %v2347_v25  ;;  %2715 = vmatpush2.msra.mxu0 %v3920_v40  ;;  %v1704_v27 = vadd.f32 %v6469_v44, %v6463_v28  ;;  %v2157_v28 = vpop.f32.mrf.mxu0 }
 0x303   :  { %v2315_v59 = vpop.f32.mrf.mxu1  ;;  %v2174_v25 = vadd.f32 %v2151_v45, %v1938_v36  ;;  %2863 = vmatprep.subr.mxu0 %v7398_v16  ;;  %v2175_v55 = vadd.f32 %v2153_v58, %v1939_v46 }
 0x304   :  { %v6644_v6 = vadd.f32 %v6526_v24, %v2348_v37  ;;  %v2349_v31 = vadd.f32 %v2315_v59, %v2169_v13  ;;  %2426 = vrot.lane.b32.xlu0 %v2390_v38, %s4224_s16  ;;  %v2391_v0 = vmax.f32 %v6641_v30, 0.0  ;;  %v1941_v48 = vadd.f32 %v7404_v29, %v1704_v27 }
 0x305   :  { %v2319_v1 = vpop.f32.mrf.mxu1  ;;  %v2176_v13 = vadd.f32 %v2157_v28, %v1940_v52 }
 0x306   :  { %v2392_v60 = vmax.f32 %v6644_v6, 0.0  ;;  %v2350_v10 = vadd.f32 %v2319_v1, %v2170_v51  ;;  %2424 = vrot.lane.b32.xlu1 %v2389_v62, %s4224_s16  ;;  %v6672_v3 = vadd.f32 %v6530_v22, %v2349_v31  ;;  %v2159_v31 = vpop.f32.mrf.mxu0 }
 0x307   :  { %v2321_v61 = vpop.f32.mrf.mxu1  ;;  %v2177_v1 = vadd.f32 %v2159_v31, %v1941_v48  ;;  %v3970_v48 = vld [vmem:[%s7360_s5 + $0x228] sm:$0xff] }
 0x308   :  { %v6675_v63 = vadd.f32 %v6526_v24, %v2350_v10  ;;  %v2351_v18 = vadd.f32 %v2321_v61, %v2171_v56  ;;  %2430 = vrot.lane.b32.xlu0 %v2392_v60, %s4224_s16  ;;  %v2393_v2 = vmax.f32 %v6672_v3, 0.0  ;;  %v3968_v3 = vld [vmem:[%s7360_s5 + $0x218] sm:$0xff] }
 0x309   :  { %v2325_v32 = vpop.f32.mrf.mxu1 }
 0x30a   :  { %v2394_v57 = vmax.f32 %v6675_v63, 0.0  ;;  %v2352_v11 = vadd.f32 %v2325_v32, %v2172_v39  ;;  %2428 = vrot.lane.b32.xlu1 %v2391_v0, %s4224_s16  ;;  %v6697_v47 = vadd.f32 %v6530_v22, %v2351_v18 }
 0x30b   :  { %v2327_v35 = vpop.f32.mrf.mxu1 }
 0x30c   :  { %v6700_v33 = vadd.f32 %v6526_v24, %v2352_v11  ;;  %v2353_v50 = vadd.f32 %v2327_v35, %v2173_v53  ;;  %2434 = vrot.lane.b32.xlu0 %v2394_v57, %s4224_s16  ;;  %v2395_v41 = vmax.f32 %v6697_v47, 0.0  ;;  %v3947_v47 = vld [vmem:[%s7360_s5 + $0x198] sm:$0xff] }
 0x30d   :  { %v2331_v44 = vpop.f32.mrf.mxu1 }
 0x30e   :  { %v2396_v42 = vmax.f32 %v6700_v33, 0.0  ;;  %v2354_v9 = vadd.f32 %v2331_v44, %v2174_v25  ;;  %2432 = vrot.lane.b32.xlu1 %v2393_v2, %s4224_s16  ;;  %v6712_v17 = vadd.f32 %v6530_v22, %v2353_v50 }
 0x30f   :  { %v2333_v37 = vpop.f32.mrf.mxu1 }
 0x310   :  { %v6715_v59 = vadd.f32 %v6526_v24, %v2354_v9  ;;  %v2355_v51 = vadd.f32 %v2333_v37, %v2175_v55  ;;  %2438 = vrot.lane.b32.xlu0 %v2396_v42, %s4224_s16  ;;  %v2397_v34 = vmax.f32 %v6712_v17, 0.0 }
 0x311   :  { %v2337_v26 = vpop.f32.mrf.mxu1 }
 0x312   :  { %v2398_v21 = vmax.f32 %v6715_v59, 0.0  ;;  %v2356_v45 = vadd.f32 %v2337_v26, %v2176_v13  ;;  %2436 = vrot.lane.b32.xlu1 %v2395_v41, %s4224_s16  ;;  %v6726_v10 = vadd.f32 %v6530_v22, %v2355_v51  ;;  %v3944_v59 = vld [vmem:[%s7360_s5 + $0x180] sm:$0xff] }
 0x313   :  { %v2339_v49 = vpop.f32.mrf.mxu1 }
 0x314   :  { %v6729_v56 = vadd.f32 %v6526_v24, %v2356_v45  ;;  %v2357_v4 = vadd.f32 %v2339_v49, %v2177_v1  ;;  %2442 = vrot.lane.b32.xlu0 %v2398_v21, %s4224_s16  ;;  %v2399_v61 = vmax.f32 %v6726_v10, 0.0 }
 0x316   :  { %v2400_v36 = vmax.f32 %v6729_v56, 0.0  ;;  %2440 = vrot.lane.b32.xlu1 %v2397_v34, %s4224_s16  ;;  %v6740_v39 = vadd.f32 %v6530_v22, %v2357_v4  ;;  %v3949_v56 = vld [vmem:[%s7360_s5 + $0x1a8] sm:$0xff] }
 0x318   :  { %2446 = vrot.lane.b32.xlu0 %v2400_v36, %s4224_s16  ;;  %v2401_v24 = vmax.f32 %v6740_v39, 0.0  ;;  %v3971_v39 = vld [vmem:[%s7360_s5 + $0x230] sm:$0xff] }
 0x31a   :  { %2444 = vrot.lane.b32.xlu1 %v2399_v61, %s4224_s16 }
 0x31e   :  { %2448 = vrot.lane.b32.xlu1 %v2401_v24, %s4224_s16 }
 0x370   :  { %v2421_v18 = vpop.permute.xlu0 %2420 }
 0x371   :  { %v2476_v58 = vmax.f32 %v2387_v12, %v2421_v18 }
 0x373   :  { %v2510_v25 = vrot.slane %v2476_v58, 2 }
 0x374   :  { %v4197_v40 = vpop.permute.xlu1 %4196 }
 0x375   :  { %v4198_v7 = vunpack.i.l.bf16 %v4197_v40  ;;  %v4199_v32 = vunpack.i.h.bf16 %v4197_v40 }
 0x376   :  { %v2427_v22 = vpop.permute.xlu0 %2426 }
 0x377   :  { %v2451_v46 = vsel %vm2450_vm8, %v4198_v7, %v2421_v18 }
 0x378   :  { %v2475_v11 = vmax.f32 %v2386_v54, %v2451_v46  ;;  %v2425_v53 = vpop.permute.xlu1 %2424 }
 0x379   :  { %v2452_v27 = vsel %vm2450_vm8, %v4199_v32, %v2425_v53  ;;  %v2478_v5 = vmax.f32 %v2389_v62, %v2425_v53 }
 0x37a   :  { %v2477_v52 = vmax.f32 %v2388_v23, %v2452_v27  ;;  %v2431_v35 = vpop.permute.xlu0 %2430  ;;  %v2507_v14 = vrot.slane %v2475_v11, 2 }
 0x37b   :  { %v2511_v50 = vrot.slane %v2478_v5, 2 }
 0x37c   :  { %v2508_v12 = vrot.slane %v2477_v52, 2  ;;  %v2429_v28 = vpop.permute.xlu1 %2428 }
 0x37d   :  { %v2512_v44 = vsel %vm436_vm0, %v2510_v25, %v2511_v50  ;;  %v2453_v15 = vsel %vm2450_vm8, %v2427_v22, %v2429_v28  ;;  %v2480_v54 = vmax.f32 %v2391_v0, %v2429_v28  ;;  %v3967_v22 = vld [vmem:[%s7360_s5 + $0x210] sm:$0xff] }
 0x37e   :  { %v2509_v8 = vsel %vm436_vm0, %v2507_v14, %v2508_v12  ;;  %v2479_v43 = vmax.f32 %v2390_v38, %v2453_v15  ;;  %v2552_v23 = vmax.f32 %v2476_v58, %v2512_v44  ;;  %v2435_v55 = vpop.permute.xlu0 %2434  ;;  %v3969_v38 = vld [vmem:[%s7360_s5 + $0x220] sm:$0xff] }
 0x37f   :  { %v2551_v62 = vmax.f32 %v2475_v11, %v2509_v8  ;;  %v2515_v29 = vrot.slane %v2480_v54, 2 }
 0x380   :  { %v2513_v9 = vrot.slane %v2479_v43, 2  ;;  %3927 = vmatprep.mubr.msk.f32.mxu1 %vm2641_vm9, %v2552_v23  ;;  %v2433_v37 = vpop.permute.xlu1 %2432 }
 0x381   :  { %v2516_v30 = vsel %vm436_vm0, %v2511_v50, %v2515_v29  ;;  %v2454_v0 = vsel %vm2450_vm8, %v2431_v35, %v2433_v37  ;;  %v2482_v20 = vmax.f32 %v2393_v2, %v2433_v37  ;;  %2817 = vmatmul.mubr.f32.vlgmr.msra.gmra.mxu1 %v2551_v62  ;;  %v2614_v49 = vrot.slane %v2551_v62, 4 }
 0x382   :  { %v6782_v13 = vmax.f32 %v2392_v60, %v2454_v0  ;;  %2987 = vmatpush1.msra.mxu1 %v3970_v48  ;;  %v6784_v51 = vmax.f32 %v2478_v5, %v2516_v30  ;;  %v2514_v31 = vsel %vm436_vm0, %v2508_v12, %v2513_v9  ;;  %v2617_v60 = vrot.slane %v2552_v23, 4  ;;  %v2439_v58 = vpop.permute.xlu0 %2438  ;;  %v3946_v12 = vld [vmem:[%s7360_s5 + $0x190] sm:$0xff]  ;;  %v3945_v23 = vld [vmem:[%s7360_s5 + $0x188] sm:$0xff]  ;;  %v3964_v0 = vld [vmem:[%s7360_s5 + $0x1f8] sm:$0xff] }
 0x383   :  { %v2519_v26 = vrot.slane %v2482_v20, 2  ;;  %2988 = vmatprep.subr.mxu1 %v7398_v16  ;;  %v6788_v45 = vmax.f32 %v2477_v52, %v2514_v31  ;;  %v3966_v52 = vld [vmem:[%s7360_s5 + $0x208] sm:$0xff] }
 0x384   :  { %v2517_v2 = vrot.slane %v6782_v13, 2  ;;  %2989 = vmatpush1.msra.mxu1 %v3969_v38  ;;  %3928 = vmatprep.mubr.msk.f32.mxu1 %vm2641_vm9, %v6784_v51  ;;  %v2437_v6 = vpop.permute.xlu1 %2436  ;;  %v2618_v1 = vrot.slane %v6784_v51, 4 }
 0x385   :  { %v2520_v4 = vsel %vm436_vm0, %v2515_v29, %v2519_v26  ;;  %2990 = vmatprep.subr.mxu1 %v7398_v16  ;;  %v2455_v18 = vsel %vm2450_vm8, %v2435_v55, %v2437_v6  ;;  %v2484_v40 = vmax.f32 %v2395_v41, %v2437_v6  ;;  %v2615_v7 = vrot.slane %v6788_v45, 4  ;;  %2822 = vmatmul.mubr.f32.gmra.mxu1 %v6788_v45 }
 0x386   :  { %v6809_v32 = vmax.f32 %v2394_v57, %v2455_v18  ;;  %2991 = vmatpush1.msra.mxu1 %v3968_v3  ;;  %v2619_v46 = vsel %vm850_vm2, %v2617_v60, %v2618_v1  ;;  %v6812_v11 = vmax.f32 %v2480_v54, %v2520_v4  ;;  %v2518_v41 = vsel %vm436_vm0, %v2513_v9, %v2517_v2  ;;  %v3963_v3 = vld [vmem:[%s7360_s5 + $0x1f0] sm:$0xff]  ;;  %v3943_v60 = vld [vmem:[%s7360_s5 + $0x178] sm:$0xff]  ;;  %v3962_v4 = vld [vmem:[%s7360_s5 + $0x1e8] sm:$0xff] }
 0x387   :  { %v2523_v53 = vrot.slane %v2484_v40, 2  ;;  %2992 = vmatprep.subr.mxu1 %v7398_v16  ;;  %3922 = vmatprep.mubr.msk.f32.mxu0 %vm2641_vm9, %v2619_v46  ;;  %v2616_v63 = vsel %vm850_vm2, %v2614_v49, %v2615_v7  ;;  %v6821_v57 = vmax.f32 %v2479_v43, %v2518_v41  ;;  %v3960_v41 = vld [vmem:[%s7360_s5 + $0x1d8] sm:$0xff] }
 0x388   :  { %v2521_v27 = vrot.slane %v6809_v32, 2  ;;  %2993 = vmatpush1.msra.mxu1 %v3967_v22  ;;  %2717 = vmatmul.mubr.f32.vlgmr.msra.gmra.mxu0 %v2616_v63  ;;  %v2441_v5 = vpop.permute.xlu1 %2440  ;;  %v2622_v35 = vrot.slane %v6812_v11, 4  ;;  %v3940_v63 = vld [vmem:[%s7360_s5 + $0x160] sm:$0xff] }
 0x389   :  { %v2524_v25 = vsel %vm436_vm0, %v2519_v26, %v2523_v53  ;;  %3929 = vmatprep.mubr.msk.f32.mxu1 %vm2641_vm9, %v6812_v11  ;;  %2864 = vmatpush1.msra.mxu0 %v3947_v47  ;;  %v2456_v50 = vsel %vm2450_vm8, %v2439_v58, %v2441_v5  ;;  %v2486_v14 = vmax.f32 %v2397_v34, %v2441_v5  ;;  %v2620_v28 = vrot.slane %v6821_v57, 4  ;;  %v3965_v34 = vld [vmem:[%s7360_s5 + $0x200] sm:$0xff]  ;;  %v3941_v47 = vld [vmem:[%s7360_s5 + $0x168] sm:$0xff]  ;;  %v3959_v5 = vld [vmem:[%s7360_s5 + $0x1d0] sm:$0xff] }
 0x38a   :  { %2994 = vmatprep.subr.mxu1 %v7398_v16  ;;  %v2485_v44 = vmax.f32 %v2396_v42, %v2456_v50  ;;  %2827 = vmatmul.mubr.f32.gmra.mxu1 %v6821_v57  ;;  %v6843_v15 = vsel %vm850_vm2, %v2618_v1, %v2622_v35  ;;  %v6845_v54 = vmax.f32 %v2482_v20, %v2524_v25  ;;  %v2443_v42 = vpop.permute.xlu0 %2442  ;;  %v3961_v58 = vld [vmem:[%s7360_s5 + $0x1e0] sm:$0xff]  ;;  %v3958_v25 = vld [vmem:[%s7360_s5 + $0x1c8] sm:$0xff]  ;;  %v3938_v50 = vld [vmem:[%s7360_s5 + $0x150] sm:$0xff] }
 0x38b   :  { %v2527_v17 = vrot.slane %v2486_v14, 2  ;;  %2865 = vmatprep.subr.mxu0 %v7398_v16  ;;  %2995 = vmatpush1.msra.mxu1 %v3966_v52  ;;  %v6852_v8 = vsel %vm850_vm2, %v2615_v7, %v2620_v28  ;;  %v2522_v33 = vsel %vm436_vm0, %v2517_v2, %v2521_v27  ;;  %v3942_v7 = vld [vmem:[%s7360_s5 + $0x170] sm:$0xff] }
 0x38c   :  { %v2525_v43 = vrot.slane %v2485_v44, 2  ;;  %2866 = vmatpush1.msra.mxu0 %v3946_v12  ;;  %2996 = vmatprep.subr.mxu1 %v7398_v16  ;;  %v2445_v62 = vpop.permute.xlu1 %2444  ;;  %v6860_v29 = vmax.f32 %v6782_v13, %v2522_v33  ;;  %v2626_v48 = vrot.slane %v6845_v54, 4  ;;  %v3937_v12 = vld [vmem:[%s7360_s5 + $0x148] sm:$0xff] }
 0x38d   :  { %v2528_v9 = vsel %vm436_vm0, %v2523_v53, %v2527_v17  ;;  %3923 = vmatprep.mubr.msk.f32.mxu0 %vm2641_vm9, %v6843_v15  ;;  %2867 = vmatprep.subr.mxu0 %v7398_v16  ;;  %v2457_v55 = vsel %vm2450_vm8, %v2443_v42, %v2445_v62  ;;  %v6870_v37 = vmax.f32 %v2399_v61, %v2445_v62  ;;  %v3972_v42 = vld [vmem:[%s7360_s5 + $0x238] sm:$0xff] }
 0x38e   :  { %2997 = vmatpush1.msra.mxu1 %v3965_v34  ;;  %2722 = vmatmul.mubr.f32.gmra.mxu0 %v6852_v8  ;;  %v6875_v30 = vmax.f32 %v2398_v21, %v2457_v55  ;;  %v2624_v20 = vrot.slane %v6860_v29, 4  ;;  %v6881_v38 = vmax.f32 %v2484_v40, %v2528_v9  ;;  %v2526_v21 = vsel %vm436_vm0, %v2521_v27, %v2525_v43  ;;  %v2447_v34 = vpop.permute.xlu0 %2446  ;;  %v3932_v9 = vld [vmem:[%s7360_s5 + $0x120] sm:$0xff] }
 0x38f   :  { %3930 = vmatprep.mubr.msk.f32.mxu1 %vm2641_vm9, %v6845_v54  ;;  %2868 = vmatpush1.msra.mxu0 %v3945_v23  ;;  %v2531_v10 = vrot.slane %v6870_v37, 2  ;;  %v6894_v13 = vsel %vm850_vm2, %v2622_v35, %v2626_v48  ;;  %v6897_v31 = vmax.f32 %v6809_v32, %v2526_v21  ;;  %v3939_v35 = vld [vmem:[%s7360_s5 + $0x158] sm:$0xff]  ;;  %v3934_v23 = vld [vmem:[%s7360_s5 + $0x130] sm:$0xff] }
 0x390   :  { %2998 = vmatprep.subr.mxu1 %v7398_v16  ;;  %v2529_v61 = vrot.slane %v6875_v30, 2  ;;  %2832 = vmatmul.mubr.f32.gmra.mxu1 %v6860_v29  ;;  %v6907_v2 = vsel %vm850_vm2, %v2620_v28, %v2624_v20  ;;  %v2630_v1 = vrot.slane %v6881_v38, 4  ;;  %v3956_v28 = vld [vmem:[%s7360_s5 + $0x1b8] sm:$0xff] }
 0x391   :  { %v2532_v26 = vsel %vm436_vm0, %v2527_v17, %v2531_v10  ;;  %2869 = vmatprep.subr.mxu0 %v7398_v16  ;;  %2999 = vmatpush1.msra.mxu1 %v3964_v0  ;;  %v2628_v18 = vrot.slane %v6897_v31, 4  ;;  %v3935_v17 = vld [vmem:[%s7360_s5 + $0x138] sm:$0xff] }
 0x392   :  { %v2530_v6 = vsel %vm436_vm0, %v2525_v43, %v2529_v61  ;;  %2870 = vmatpush1.msra.mxu0 %v3944_v59  ;;  %3000 = vmatprep.subr.mxu1 %v7398_v16  ;;  %v6917_v49 = vmax.f32 %v2486_v14, %v2532_v26  ;;  %v6937_v22 = vsel %vm850_vm2, %v2626_v48, %v2630_v1  ;;  %v3957_v14 = vld [vmem:[%s7360_s5 + $0x1c0] sm:$0xff]  ;;  %v3989_v26 = vld [vmem:[%s7360_s5 + $0x298] sm:$0xff] }
 0x393   :  { %3924 = vmatprep.mubr.msk.f32.mxu0 %vm2641_vm9, %v6894_v13  ;;  %2871 = vmatprep.subr.mxu0 %v7398_v16  ;;  %v6927_v40 = vmax.f32 %v2485_v44, %v2530_v6  ;;  %v6946_v46 = vsel %vm850_vm2, %v2624_v20, %v2628_v18  ;;  %v2449_v44 = vpop.permute.xlu1 %2448  ;;  %v3987_v6 = vld [vmem:[%s7360_s5 + $0x288] sm:$0xff] }
 0x394   :  { %3001 = vmatpush1.msra.mxu1 %v3963_v3  ;;  %2727 = vmatmul.mubr.f32.gmra.mxu0 %v6907_v2  ;;  %v2634_v32 = vrot.slane %v6917_v49, 4  ;;  %v2490_v33 = vmax.f32 %v2401_v24, %v2449_v44  ;;  %v2458_v43 = vsel %vm2450_vm8, %v2447_v34, %v2449_v44  ;;  %v3933_v24 = vld [vmem:[%s7360_s5 + $0x128] sm:$0xff] }
 0x395   :  { %3931 = vmatprep.mubr.msk.f32.mxu1 %vm2641_vm9, %v6881_v38  ;;  %2872 = vmatpush1.msra.mxu0 %v3943_v60  ;;  %v2632_v53 = vrot.slane %v6927_v40, 4  ;;  %v2489_v62 = vmax.f32 %v2400_v36, %v2458_v43  ;;  %v3986_v60 = vld [vmem:[%s7360_s5 + $0x280] sm:$0xff] }
 0x396   :  { %3002 = vmatprep.subr.mxu1 %v7398_v16  ;;  %2837 = vmatmul.mubr.f32.gmra.mxu1 %v6897_v31  ;;  %v6968_v27 = vsel %vm850_vm2, %v2630_v1, %v2634_v32  ;;  %v2535_v48 = vrot.slane %v2490_v33, 2  ;;  %v3985_v1 = vld [vmem:[%s7360_s5 + $0x278] sm:$0xff] }
 0x397   :  { %2873 = vmatprep.subr.mxu0 %v7398_v16  ;;  %3003 = vmatpush1.msra.mxu1 %v3962_v4  ;;  %v6978_v52 = vsel %vm850_vm2, %v2628_v18, %v2632_v53  ;;  %v2533_v36 = vrot.slane %v2489_v62, 2  ;;  %v3984_v4 = vld [vmem:[%s7360_s5 + $0x270] sm:$0xff]  ;;  %v3983_v18 = vld [vmem:[%s7360_s5 + $0x268] sm:$0xff] }
 0x398   :  { %2874 = vmatpush1.msra.mxu0 %v3942_v7  ;;  %3004 = vmatprep.subr.mxu1 %v7398_v16  ;;  %v2536_v55 = vsel %vm436_vm0, %v2531_v10, %v2535_v48  ;;  %v3993_v10 = vld [vmem:[%s7360_s5 + $0x2b8] sm:$0xff]  ;;  %v3982_v7 = vld [vmem:[%s7360_s5 + $0x260] sm:$0xff] }
 0x399   :  { %3973 = vmatprep.mubr.msk.f32.mxu1 %vm2641_vm9, %v6843_v15  ;;  %3925 = vmatprep.mubr.msk.f32.mxu0 %vm2641_vm9, %v6937_v22  ;;  %v3955_v15 = vld [vmem:[%s7360_s5 + $0x1b0] sm:$0xff]  ;;  %v7062_v0 = vmax.f32 %v6870_v37, %v2536_v55  ;;  %v2534_v20 = vsel %vm436_vm0, %v2529_v61, %v2533_v36  ;;  %v3990_v61 = vld [vmem:[%s7360_s5 + $0x2a0] sm:$0xff] }
 0x39a   :  { %2875 = vmatprep.subr.mxu0 %v7398_v16  ;;  %3005 = vmatpush1.msra.mxu1 %v3961_v58  ;;  %v3992_v37 = vld [vmem:[%s7360_s5 + $0x2b0] sm:$0xff]  ;;  %v7085_v21 = vmax.f32 %v6875_v30, %v2534_v20  ;;  %v3979_v58 = vld [vmem:[%s7360_s5 + $0x248] sm:$0xff] }
 0x39b   :  { %2732 = vmatmul.mubr.f32.gmra.mxu0 %v6946_v46  ;;  %3006 = vmatprep.subr.mxu1 %v7398_v16  ;;  %v2981_v59 = vrot.slane %v7062_v0, 4 }
 0x39c   :  { %2876 = vmatpush1.msra.mxu0 %v3941_v47  ;;  %3007 = vmatpush1.msra.mxu1 %v3960_v41  ;;  %v3994_v47 = vld [vmem:[%s7360_s5 + $0x2c0] sm:$0xff] }
 0x39d   :  { %2877 = vmatprep.subr.mxu0 %v7398_v16  ;;  %3008 = vmatprep.subr.mxu1 %v7398_v16  ;;  %v2982_v30 = vsel %vm850_vm2, %v2634_v32, %v2981_v59  ;;  %v3978_v32 = vld [vmem:[%s7360_s5 + $0x240] sm:$0xff] }
 0x39e   :  { %2878 = vmatpush1.msra.mxu0 %v3940_v63  ;;  %3926 = vmatprep.mubr.msk.f32.mxu0 %vm2641_vm9, %v6968_v27  ;;  %v3222_v41 = vld [vmem:[%s7362_s7 + $0x40] sm:$0xff]  ;;  %v3220_v63 = vld [vmem:[%s7362_s7 + $0x30] sm:$0xff] }
 0x39f   :  { %2879 = vmatprep.subr.mxu0 %v7398_v16  ;;  %3009 = vmatpush1.msra.mxu1 %v3959_v5  ;;  %v3218_v5 = vld [vmem:[%s7362_s7 + $0x20] sm:$0xff] }
 0x3a0   :  { %2737 = vmatmul.mubr.f32.gmra.mxu0 %v6978_v52  ;;  %3010 = vmatprep.subr.mxu1 %v7398_v16 }
 0x3a1   :  { %2880 = vmatpush1.msra.mxu0 %v3939_v35  ;;  %3950 = vmatprep.mubr.msk.f32.mxu0 %vm2641_vm9, %v6784_v51  ;;  %v3936_v51 = vld [vmem:[%s7360_s5 + $0x140] sm:$0xff]  ;;  %v3216_v35 = vld [vmem:[%s7362_s7 + $0x10] sm:$0xff] }
 0x3a2   :  { %2881 = vmatprep.subr.mxu0 %v7398_v16  ;;  %3011 = vmatpush1.msra.mxu1 %v3958_v25  ;;  %v3215_v25 = vld [vmem:[%s7362_s7 + $0x8] sm:$0xff] }
 0x3a3   :  { %2882 = vmatpush1.msra.mxu0 %v3938_v50  ;;  %3012 = vmatprep.subr.mxu1 %v7398_v16  ;;  %v3214_v50 = vld [vmem:[%s7362_s7] sm:$0xff] }
 0x3a4   :  { %2883 = vmatprep.subr.mxu0 %v7398_v16  ;;  %3013 = vmatpush1.msra.mxu1 %v3957_v14 }
 0x3a5   :  { %2884 = vmatpush1.msra.mxu0 %v3937_v12  ;;  %3014 = vmatprep.subr.mxu1 %v7398_v16 }
 0x3a6   :  { %2885 = vmatprep.subr.mxu0 %v7398_v16  ;;  %3015 = vmatpush1.msra.mxu1 %v3956_v28 }
 0x3a7   :  { %2886 = vmatpush1.msra.mxu0 %v3936_v51  ;;  %3016 = vmatprep.subr.mxu1 %v7398_v16 }
 0x3a8   :  { %2887 = vmatprep.subr.mxu0 %v7398_v16  ;;  %3017 = vmatpush1.msra.mxu1 %v3955_v15 }
 0x3a9   :  { %2888 = vmatpush1.msra.mxu0 %v3935_v17  ;;  %3046 = vmatprep.subr.mxu1 %v7398_v16 }
 0x3aa   :  { %2889 = vmatprep.subr.mxu0 %v7398_v16  ;;  %3047 = vmatpush2.msra.mxu1 %v3972_v42 }
 0x3ab   :  { %2890 = vmatpush1.msra.mxu0 %v3934_v23  ;;  %3048 = vmatprep.subr.mxu1 %v7398_v16 }
 0x3ac   :  { %2891 = vmatprep.subr.mxu0 %v7398_v16  ;;  %3049 = vmatpush2.msra.mxu1 %v3971_v39 }
 0x3ad   :  { %2892 = vmatpush1.msra.mxu0 %v3933_v24  ;;  %3051 = vmatmul.mubr.f32.vlgmr.msra.gmra.mxu1 %v6852_v8  ;;  %v3948_v8 = vld [vmem:[%s7360_s5 + $0x1a0] sm:$0xff] }
 0x3ae   :  { %2893 = vmatprep.subr.mxu0 %v7398_v16  ;;  %3974 = vmatprep.mubr.msk.f32.mxu1 %vm2641_vm9, %v6894_v13  ;;  %v2979_v13 = vrot.slane %v7085_v21, 4 }
 0x3af   :  { %2894 = vmatpush1.msra.mxu0 %v3932_v9  ;;  %4054 = vmatprep.subr.mxu1 %v7398_v16 }
 0x3b0   :  { %2923 = vmatprep.subr.mxu0 %v7398_v16  ;;  %v2980_v3 = vsel %vm850_vm2, %v2632_v53, %v2979_v13  ;;  %v3221_v53 = vld [vmem:[%s7362_s7 + $0x38] sm:$0xff] }
 0x3b1   :  { %2924 = vmatpush2.msra.mxu0 %v3949_v56  ;;  %3056 = vmatmul.mubr.f32.gmra.mxu1 %v6907_v2  ;;  %v3988_v2 = vld [vmem:[%s7360_s5 + $0x290] sm:$0xff] }
 0x3b2   :  { %2925 = vmatprep.subr.mxu0 %v7398_v16  ;;  %3975 = vmatprep.mubr.msk.f32.mxu1 %vm2641_vm9, %v6937_v22  ;;  %v3980_v22 = vld [vmem:[%s7360_s5 + $0x250] sm:$0xff] }
 0x3b3   :  { %2926 = vmatpush2.msra.mxu0 %v3948_v8 }
 0x3b4   :  { %2928 = vmatmul.mubr.f32.vlgmr.msra.gmra.mxu0 %v6788_v45  ;;  %3102 = vmatprep.subr.mxu0 %v7398_v16  ;;  %v3991_v45 = vld [vmem:[%s7360_s5 + $0x2a8] sm:$0xff] }
 0x3b5   :  { %3951 = vmatprep.mubr.msk.f32.mxu0 %vm2641_vm9, %v6812_v11  ;;  %3061 = vmatmul.mubr.f32.gmra.mxu1 %v6946_v46  ;;  %v3995_v46 = vld [vmem:[%s7360_s5 + $0x2c8] sm:$0xff] }
 0x3b6   :  { %3103 = vmatpush1.msra.mxu0 %v3993_v10  ;;  %3976 = vmatprep.mubr.msk.f32.mxu1 %vm2641_vm9, %v6968_v27  ;;  %v3219_v27 = vld [vmem:[%s7362_s7 + $0x28] sm:$0xff] }
 0x3b7   :  { %3104 = vmatprep.subr.mxu0 %v7398_v16 }
 0x3b8   :  { %3105 = vmatpush1.msra.mxu0 %v3992_v37 }
 0x3b9   :  { %2933 = vmatmul.mubr.f32.gmra.mxu0 %v6821_v57  ;;  %3106 = vmatprep.subr.mxu0 %v7398_v16 }
 0x3ba   :  { %3952 = vmatprep.mubr.msk.f32.mxu0 %vm2641_vm9, %v6845_v54  ;;  %3066 = vmatmul.mubr.f32.gmra.mxu1 %v6978_v52  ;;  %v3217_v52 = vld [vmem:[%s7362_s7 + $0x18] sm:$0xff] }
 0x3bb   :  { %3107 = vmatpush1.msra.mxu0 %v3991_v45  ;;  %3977 = vmatprep.mubr.msk.f32.mxu1 %vm2641_vm9, %v2982_v30 }
 0x3bc   :  { %3108 = vmatprep.subr.mxu0 %v7398_v16 }
 0x3bd   :  { %3109 = vmatpush1.msra.mxu0 %v3990_v61 }
 0x3be   :  { %2938 = vmatmul.mubr.f32.gmra.mxu0 %v6860_v29  ;;  %3110 = vmatprep.subr.mxu0 %v7398_v16 }
 0x3bf   :  { %3953 = vmatprep.mubr.msk.f32.mxu0 %vm2641_vm9, %v6881_v38  ;;  %3071 = vmatmul.mubr.f32.gmra.mxu1 %v2980_v3 }
 0x3c0   :  { %3111 = vmatpush1.msra.mxu0 %v3989_v26  ;;  %4086 = vmatprep.mubr.msk.f32.mxu1 %vm4225_vm10, %v7398_v16 }
 0x3c1   :  { %3112 = vmatprep.subr.mxu0 %v7398_v16 }
 0x3c2   :  { %3113 = vmatpush1.msra.mxu0 %v3988_v2 }
 0x3c3   :  { %2943 = vmatmul.mubr.f32.gmra.mxu0 %v6897_v31  ;;  %3114 = vmatprep.subr.mxu0 %v7398_v16 }
 0x3c4   :  { %3954 = vmatprep.mubr.msk.f32.mxu0 %vm2641_vm9, %v6917_v49  ;;  %3115 = vmatpush1.msra.mxu0 %v3987_v6 }
 0x3c5   :  { %3116 = vmatprep.subr.mxu0 %v7398_v16 }
 0x3c6   :  { %3117 = vmatpush1.msra.mxu0 %v3986_v60 }
 0x3c7   :  { %2948 = vmatmul.mubr.f32.gmra.mxu0 %v6927_v40  ;;  %3118 = vmatprep.subr.mxu0 %v7398_v16 }
 0x3c8   :  { %3119 = vmatpush1.msra.mxu0 %v3985_v1  ;;  %3996 = vmatprep.mubr.msk.f32.mxu0 %vm2641_vm9, %v6812_v11  ;;  %v3981_v11 = vld [vmem:[%s7360_s5 + $0x258] sm:$0xff] }
 0x3c9   :  { %3120 = vmatprep.subr.mxu0 %v7398_v16 }
 0x3ca   :  { %3121 = vmatpush1.msra.mxu0 %v3984_v4 }
 0x3cb   :  { %3122 = vmatprep.subr.mxu0 %v7398_v16 }
 0x3cc   :  { %3123 = vmatpush1.msra.mxu0 %v3983_v18 }
 0x3cd   :  { %3124 = vmatprep.subr.mxu0 %v7398_v16 }
 0x3ce   :  { %3125 = vmatpush1.msra.mxu0 %v3982_v7 }
 0x3cf   :  { %3126 = vmatprep.subr.mxu0 %v7398_v16 }
 0x3d0   :  { %3127 = vmatpush1.msra.mxu0 %v3981_v11 }
 0x3d1   :  { %3128 = vmatprep.subr.mxu0 %v7398_v16 }
 0x3d2   :  { %3129 = vmatpush1.msra.mxu0 %v3980_v22 }
 0x3d3   :  { %3130 = vmatprep.subr.mxu0 %v7398_v16 }
 0x3d4   :  { %3131 = vmatpush1.msra.mxu0 %v3979_v58 }
 0x3d5   :  { %3132 = vmatprep.subr.mxu0 %v7398_v16 }
 0x3d6   :  { %3133 = vmatpush1.msra.mxu0 %v3978_v32 }
 0x3d7   :  { %3162 = vmatprep.subr.mxu0 %v7398_v16 }
 0x3d8   :  { %3163 = vmatpush2.msra.mxu0 %v3995_v46 }
 0x3d9   :  { %3164 = vmatprep.subr.mxu0 %v7398_v16 }
 0x3da   :  { %3165 = vmatpush2.msra.mxu0 %v3994_v47 }
 0x3db   :  { %3167 = vmatmul.mubr.f32.vlgmr.msra.gmra.mxu0 %v6821_v57  ;;  %v3229_v57 = vld [vmem:[%s7362_s7 + $0x78] sm:$0xff] }
 0x3dc   :  { %3997 = vmatprep.mubr.msk.f32.mxu0 %vm2641_vm9, %v6845_v54  ;;  %4055 = vmatpush3.msra.mxu1 %v3229_v57  ;;  %v3228_v54 = vld [vmem:[%s7362_s7 + $0x70] sm:$0xff] }
 0x3dd   :  { %4056 = vmatprep.subr.mxu1 %v7398_v16 }
 0x3de   :  { %4057 = vmatpush3.msra.mxu1 %v3228_v54 }
 0x3df   :  { %3172 = vmatmul.mubr.f32.gmra.mxu0 %v6860_v29  ;;  %4058 = vmatprep.subr.mxu1 %v7398_v16  ;;  %v3227_v29 = vld [vmem:[%s7362_s7 + $0x68] sm:$0xff] }
 0x3e0   :  { %3998 = vmatprep.mubr.msk.f32.mxu0 %vm2641_vm9, %v6881_v38  ;;  %4059 = vmatpush3.msra.mxu1 %v3227_v29  ;;  %v3226_v38 = vld [vmem:[%s7362_s7 + $0x60] sm:$0xff] }
 0x3e1   :  { %4060 = vmatprep.subr.mxu1 %v7398_v16 }
 0x3e2   :  { %4061 = vmatpush3.msra.mxu1 %v3226_v38  ;;  %v4001_v38 = vld [vmem:[%s7361_s6] ss:$0 sm:$0xff] }
 0x3e3   :  { %3177 = vmatmul.mubr.f32.gmra.mxu0 %v6897_v31  ;;  %v3225_v31 = vld [vmem:[%s7362_s7 + $0x58] sm:$0xff]  ;;  %4062 = vmatprep.subr.mxu1 %v7398_v16 }
 0x3e4   :  { %3999 = vmatprep.mubr.msk.f32.mxu0 %vm2641_vm9, %v6917_v49  ;;  %v3224_v49 = vld [vmem:[%s7362_s7 + $0x50] sm:$0xff]  ;;  %4063 = vmatpush3.msra.mxu1 %v3225_v31 }
 0x3e5   :  { %4064 = vmatprep.subr.mxu1 %v7398_v16 }
 0x3e6   :  { %4065 = vmatpush3.msra.mxu1 %v3224_v49 }
 0x3e7   :  { %3182 = vmatmul.mubr.f32.gmra.mxu0 %v6927_v40  ;;  %v3223_v40 = vld [vmem:[%s7362_s7 + $0x48] sm:$0xff]  ;;  %4066 = vmatprep.subr.mxu1 %v7398_v16 }
 0x3e8   :  { %4000 = vmatprep.mubr.msk.f32.mxu0 %vm2641_vm9, %v7062_v0  ;;  %4067 = vmatpush3.msra.mxu1 %v3223_v40 }
 0x3e9   :  { %4068 = vmatprep.subr.mxu1 %v7398_v16 }
 0x3ea   :  { %4069 = vmatpush3.msra.mxu1 %v3222_v41 }
 0x3eb   :  { %3187 = vmatmul.mubr.f32.gmra.mxu0 %v7085_v21  ;;  %4070 = vmatprep.subr.mxu1 %v7398_v16 }
 0x3ec   :  { %4071 = vmatpush3.msra.mxu1 %v3221_v53 }
 0x3ed   :  { %4072 = vmatprep.subr.mxu1 %v7398_v16 }
 0x3ee   :  { %4073 = vmatpush3.msra.mxu1 %v3220_v63 }
 0x3ef   :  { %4074 = vmatprep.subr.mxu1 %v7398_v16 }
 0x3f0   :  { %4075 = vmatpush3.msra.mxu1 %v3219_v27 }
 0x3f1   :  { %4076 = vmatprep.subr.mxu1 %v7398_v16 }
 0x3f2   :  { %4077 = vmatpush3.msra.mxu1 %v3218_v5 }
 0x3f3   :  { %4078 = vmatprep.subr.mxu1 %v7398_v16 }
 0x3f4   :  { %4079 = vmatpush3.msra.mxu1 %v3217_v52  ;;  %v3347_v52 = vld [vmem:[%s7364_s9 + $0x78] sm:$0xff] }
 0x3f5   :  { %4080 = vmatprep.subr.mxu1 %v7398_v16 }
 0x3f6   :  { %4081 = vmatpush3.msra.mxu1 %v3216_v35 }
 0x3f7   :  { %4082 = vmatprep.subr.mxu1 %v7398_v16 }
 0x3f8   :  { %4083 = vmatpush3.msra.mxu1 %v3215_v25 }
 0x3f9   :  { %4084 = vmatprep.subr.mxu1 %v7398_v16 }
 0x3fa   :  { %4085 = vmatpush3.msra.mxu1 %v3214_v50 }
 0x3fb   :  { %4101 = vmatprep.subr.mxu1 %v7398_v16 }
 0x441   :  { %v2818_v14 = vpop.f32.mrf.mxu1 }
 0x443   :  { %v2820_v12 = vpop.f32.mrf.mxu1 }
 0x444   :  { %v3346_v12 = vld [vmem:[%s7364_s9 + $0x70] sm:$0xff] }
 0x445   :  { %v2823_v28 = vpop.f32.mrf.mxu1 }
 0x447   :  { %v2825_v44 = vpop.f32.mrf.mxu1 }
 0x448   :  { %v2718_v51 = vpop.f32.mrf.mxu0 }
 0x449   :  { %v2819_v15 = vadd.f32 %v2818_v14, %v2718_v51 }
 0x44a   :  { %v2828_v17 = vpop.f32.mrf.mxu1  ;;  %v2720_v34 = vpop.f32.mrf.mxu0 }
 0x44c   :  { %v2830_v33 = vpop.f32.mrf.mxu1 }
 0x44e   :  { %v2723_v42 = vpop.f32.mrf.mxu0 }
 0x44f   :  { %v2824_v43 = vadd.f32 %v2823_v28, %v2723_v42 }
 0x450   :  { %v2833_v23 = vpop.f32.mrf.mxu1  ;;  %v2725_v39 = vpop.f32.mrf.mxu0 }
 0x452   :  { %v2835_v24 = vpop.f32.mrf.mxu1 }
 0x454   :  { %v2728_v62 = vpop.f32.mrf.mxu0 }
 0x455   :  { %v2829_v48 = vadd.f32 %v2828_v17, %v2728_v62  ;;  %v3343_v62 = vld [vmem:[%s7364_s9 + $0x58] sm:$0xff] }
 0x456   :  { %v2838_v9 = vpop.f32.mrf.mxu1  ;;  %v2730_v56 = vpop.f32.mrf.mxu0 }
 0x458   :  { %v2840_v36 = vpop.f32.mrf.mxu1 }
 0x459   :  { %v3342_v36 = vld [vmem:[%s7364_s9 + $0x50] sm:$0xff] }
 0x45b   :  { %v2733_v55 = vpop.f32.mrf.mxu0 }
 0x45c   :  { %v2834_v8 = vadd.f32 %v2833_v23, %v2733_v55 }
 0x45d   :  { %v2735_v0 = vpop.f32.mrf.mxu0 }
 0x460   :  { %v2738_v20 = vpop.f32.mrf.mxu0 }
 0x461   :  { %v2839_v10 = vadd.f32 %v2838_v9, %v2738_v20  ;;  %v3341_v20 = vld [vmem:[%s7364_s9 + $0x48] sm:$0xff] }
 0x462   :  { %v2740_v37 = vpop.f32.mrf.mxu0 }
 0x46d   :  { %v3052_v59 = vpop.f32.mrf.mxu1 }
 0x46f   :  { %v3054_v21 = vpop.f32.mrf.mxu1 }
 0x471   :  { %v3057_v45 = vpop.f32.mrf.mxu1 }
 0x473   :  { %v3059_v30 = vpop.f32.mrf.mxu1 }
 0x474   :  { %v2929_v61 = vpop.f32.mrf.mxu0  ;;  %v3338_v30 = vld [vmem:[%s7364_s9 + $0x30] sm:$0xff] }
 0x475   :  { %v3062_v13 = vpop.f32.mrf.mxu1  ;;  %v2953_v47 = vadd.f32 %v2929_v61, %v2819_v15  ;;  %v3345_v15 = vld [vmem:[%s7364_s9 + $0x68] sm:$0xff] }
 0x476   :  { %v2931_v26 = vpop.f32.mrf.mxu0  ;;  %v3337_v61 = vld [vmem:[%s7364_s9 + $0x28] sm:$0xff] }
 0x477   :  { %v3064_v3 = vpop.f32.mrf.mxu1  ;;  %v3076_v54 = vadd.f32 %v3052_v59, %v2953_v47  ;;  %v3340_v59 = vld [vmem:[%s7364_s9 + $0x40] sm:$0xff]  ;;  %v3335_v26 = vld [vmem:[%s7364_s9 + $0x18] sm:$0xff] }
 0x478   :  { %v3334_v3 = vld [vmem:[%s7364_s9 + $0x10] sm:$0xff] }
 0x479   :  { %v2934_v2 = vpop.f32.mrf.mxu0 }
 0x47a   :  { %v3067_v6 = vpop.f32.mrf.mxu1  ;;  %v2954_v57 = vadd.f32 %v2934_v2, %v2824_v43  ;;  %v3344_v43 = vld [vmem:[%s7364_s9 + $0x60] sm:$0xff]  ;;  %v3333_v2 = vld [vmem:[%s7364_s9 + $0x8] sm:$0xff] }
 0x47b   :  { %v2936_v60 = vpop.f32.mrf.mxu0 }
 0x47c   :  { %v3069_v1 = vpop.f32.mrf.mxu1  ;;  %v3077_v53 = vadd.f32 %v3057_v45, %v2954_v57  ;;  %v3339_v45 = vld [vmem:[%s7364_s9 + $0x38] sm:$0xff]  ;;  %v4002_v60 = vld [vmem:[%s7363_s8] ss:$0 sm:$0xff] }
 0x47e   :  { %v2939_v4 = vpop.f32.mrf.mxu0 }
 0x47f   :  { %v3072_v18 = vpop.f32.mrf.mxu1  ;;  %v2955_v40 = vadd.f32 %v2939_v4, %v2829_v48 }
 0x480   :  { %v2941_v7 = vpop.f32.mrf.mxu0 }
 0x481   :  { %v3074_v11 = vpop.f32.mrf.mxu1  ;;  %v3078_v14 = vadd.f32 %v3062_v13, %v2955_v40  ;;  %v3336_v13 = vld [vmem:[%s7364_s9 + $0x20] sm:$0xff] }
 0x483   :  { %v2944_v22 = vpop.f32.mrf.mxu0 }
 0x484   :  { %v2956_v25 = vadd.f32 %v2944_v22, %v2834_v8 }
 0x485   :  { %v2946_v58 = vpop.f32.mrf.mxu0 }
 0x486   :  { %v3079_v42 = vadd.f32 %v3067_v6, %v2956_v25  ;;  %v3332_v6 = vld [vmem:[%s7364_s9] sm:$0xff] }
 0x487   :  { %v2949_v32 = vpop.f32.mrf.mxu0 }
 0x488   :  { %v2957_v34 = vadd.f32 %v2949_v32, %v2839_v10 }
 0x489   :  { %v2951_v46 = vpop.f32.mrf.mxu0 }
 0x48a   :  { %v3080_v56 = vadd.f32 %v3072_v18, %v2957_v34 }
 0x49b   :  { %v3168_v29 = vpop.f32.mrf.mxu0 }
 0x49c   :  { %v3192_v31 = vadd.f32 %v3168_v29, %v3076_v54 }
 0x49d   :  { %v3170_v49 = vpop.f32.mrf.mxu0 }
 0x49e   :  { %v3204_v41 = vadd.f32 %v4001_v38, %v3192_v31 }
 0x49f   :  { %v3173_v63 = vpop.f32.mrf.mxu0 }
 0x4a0   :  { %v3209_v27 = vmax.f32 %v3204_v41, 0.0  ;;  %v3193_v5 = vadd.f32 %v3173_v63, %v3077_v53 }
 0x4a1   :  { %v3175_v35 = vpop.f32.mrf.mxu0 }
 0x4a2   :  { %v3205_v50 = vadd.f32 %v4001_v38, %v3193_v5  ;;  %4087 = vmatmul.mubr.f32.vlgmr.msra.gmra.mxu1 %v3209_v27 }
 0x4a3   :  { %v3178_v28 = vpop.f32.mrf.mxu0  ;;  %4089 = vmatprep.mubr.msk.f32.mxu1 %vm4225_vm10, %v7398_v16  ;;  %4102 = vmatpush3.msra.mxu1 %v3347_v52 }
 0x4a4   :  { %v3210_v44 = vmax.f32 %v3205_v50, 0.0  ;;  %v3194_v51 = vadd.f32 %v3178_v28, %v3078_v14  ;;  %4103 = vmatprep.subr.mxu1 %v7398_v16  ;;  %v4003_v28 = vld [vmem:[%s7365_s10] ss:$0 sm:$0xff]  ;;  %s4226_s10 = smov [#allocation2]  }
 0x4a5   :  { %v3180_v17 = vpop.f32.mrf.mxu0  ;;  %4104 = vmatpush3.msra.mxu1 %v3346_v12  ;;  %s3534_s30 = sshll.u32 %s4226_s10, 4  ;;  %s3535_s30 = int_to_ptr.vmem [resolvable:$true] %s3534_s30 }
 0x4a6   :  { %v3206_v33 = vadd.f32 %v4001_v38, %v3194_v51  ;;  %4090 = vmatmul.mubr.f32.gmra.mxu1 %v3210_v44  ;;  %4105 = vmatprep.subr.mxu1 %v7398_v16  ;;  %v7405_v17 = vlaneseq  ;;  %s4200_s2 = scalar_lea.vmem %s3535_s30, 32  ;;  %p4205_p1 = scmp.lt.s32.totalorder %s3535_s30, %s3535_s30 }
 0x4a7   :  { %v3183_v23 = vpop.f32.mrf.mxu0  ;;  %4092 = vmatprep.mubr.msk.f32.mxu1 %vm4225_vm10, %v7398_v16  ;;  %4106 = vmatpush3.msra.mxu1 %v3345_v15  ;;  %p4201_p0 = scmp.ne.s32.totalorder %s3535_s30, %s4200_s2  ;;  %p4206_p2 = scmp.lt.s32.totalorder %s4200_s2, %s4200_s2 }
 0x4a8   :  { %v3211_v39 = vmax.f32 %v3206_v33, 0.0  ;;  %v3195_v24 = vadd.f32 %v3183_v23, %v3079_v42  ;;  %4107 = vmatprep.subr.mxu1 %v7398_v16  ;;  %v3448_v34 = vand.u32 127, %v7405_v17  ;;  %v3449_v33 = vmul.u32 32, %v5291_v19 }
 0x4a9   :  { %v3185_v48 = vpop.f32.mrf.mxu0  ;;  %4108 = vmatpush3.msra.mxu1 %v3344_v43  ;;  %p4207_p3 = por %p4206_p2, %p4205_p1 }
 0x4aa   :  { %v3207_v9 = vadd.f32 %v4001_v38, %v3195_v24  ;;  %4093 = vmatmul.mubr.f32.gmra.mxu1 %v3211_v39  ;;  %4109 = vmatprep.subr.mxu1 %v7398_v16  ;;  %vm3450_vm11 = vcmp.eq.s32.totalorder %v3448_v34, %v3449_v33 }
 0x4ab   :  { %v3188_v55 = vpop.f32.mrf.mxu0  ;;  %4095 = vmatprep.mubr.msk.f32.mxu1 %vm4225_vm10, %v7398_v16  ;;  %4110 = vmatpush3.msra.mxu1 %v3343_v62  ;;  %v4004_v24 = vsel %vm3450_vm11, 1.0, %v7398_v16  ;;  %p4208_p4 = pnand %p4207_p3, %p4201_p0 }
 0x4ac   :  { %v3212_v8 = vmax.f32 %v3207_v9, 0.0  ;;  %v3196_v0 = vadd.f32 %v3188_v55, %v3080_v56  ;;  %4111 = vmatprep.subr.mxu1 %v7398_v16 }
 0x4ad   :  { %v3190_v10 = vpop.f32.mrf.mxu0  ;;  %4112 = vmatpush3.msra.mxu1 %v3342_v36 }
 0x4ae   :  { %v3208_v37 = vadd.f32 %v4001_v38, %v3196_v0  ;;  %4096 = vmatmul.mubr.f32.gmra.mxu1 %v3212_v8  ;;  %4113 = vmatprep.subr.mxu1 %v7398_v16 }
 0x4af   :  { %4098 = vmatprep.mubr.msk.f32.mxu1 %vm4225_vm10, %v7398_v16  ;;  %4114 = vmatpush3.msra.mxu1 %v3341_v20 }
 0x4b0   :  { %v3213_v21 = vmax.f32 %v3208_v37, 0.0  ;;  %4115 = vmatprep.subr.mxu1 %v7398_v16 }
 0x4b1   :  { %4116 = vmatpush3.msra.mxu1 %v3340_v59 }
 0x4b2   :  { %4099 = vmatmul.mubr.f32.gmra.mxu1 %v3213_v21  ;;  %4117 = vmatprep.subr.mxu1 %v7398_v16 }
 0x4b3   :  { %4118 = vmatpush3.msra.mxu1 %v3339_v45  ;;  %4133 = vmatprep.mubr.msk.f32.mxu1 %vm4225_vm10, %v7398_v16 }
 0x4b4   :  { %4119 = vmatprep.subr.mxu1 %v7398_v16 }
 0x4b5   :  { %4120 = vmatpush3.msra.mxu1 %v3338_v30 }
 0x4b6   :  { %4121 = vmatprep.subr.mxu1 %v7398_v16 }
 0x4b7   :  { %4122 = vmatpush3.msra.mxu1 %v3337_v61 }
 0x4b8   :  { %4123 = vmatprep.subr.mxu1 %v7398_v16 }
 0x4b9   :  { %4124 = vmatpush3.msra.mxu1 %v3336_v13 }
 0x4ba   :  { %4125 = vmatprep.subr.mxu1 %v7398_v16 }
 0x4bb   :  { %4126 = vmatpush3.msra.mxu1 %v3335_v26 }
 0x4bc   :  { %4127 = vmatprep.subr.mxu1 %v7398_v16 }
 0x4bd   :  { %4128 = vmatpush3.msra.mxu1 %v3334_v3 }
 0x4be   :  { %4129 = vmatprep.subr.mxu1 %v7398_v16 }
 0x4bf   :  { %4130 = vmatpush3.msra.mxu1 %v3333_v2 }
 0x4c0   :  { %4131 = vmatprep.subr.mxu1 %v7398_v16 }
 0x4c1   :  { %4132 = vmatpush3.msra.mxu1 %v3332_v6 }
 0x4c2   :  { %4148 = vmatprep.subr.mxu1 %v7398_v16 }
 0x562   :  { %v3303_v1 = vpop.f32.mrf.mxu1 }
 0x563   :  { %v3304_v4 = vadd.f32 %v4002_v60, %v3303_v1 }
 0x564   :  { %v4088_v18 = vpop.f32.mrf.mxu1 }
 0x565   :  { %v3327_v7 = vmax.f32 %v3304_v4, 0.0 }
 0x566   :  { %v3308_v11 = vpop.f32.mrf.mxu1 }
 0x567   :  { %v3309_v22 = vadd.f32 %v4002_v60, %v3308_v11  ;;  %4134 = vmatmul.mubr.f32.vlgmr.msra.gmra.mxu1 %v3327_v7 }
 0x568   :  { %v4091_v58 = vpop.f32.mrf.mxu1  ;;  %4136 = vmatprep.mubr.msk.f32.mxu1 %vm4225_vm10, %v7398_v16 }
 0x569   :  { %v3328_v32 = vmax.f32 %v3309_v22, 0.0 }
 0x56a   :  { %v3313_v46 = vpop.f32.mrf.mxu1 }
 0x56b   :  { %v3314_v47 = vadd.f32 %v4002_v60, %v3313_v46  ;;  %4137 = vmatmul.mubr.f32.gmra.mxu1 %v3328_v32 }
 0x56c   :  { %v4094_v57 = vpop.f32.mrf.mxu1  ;;  %4139 = vmatprep.mubr.msk.f32.mxu1 %vm4225_vm10, %v7398_v16 }
 0x56d   :  { %v3329_v54 = vmax.f32 %v3314_v47, 0.0 }
 0x56e   :  { %v3318_v29 = vpop.f32.mrf.mxu1 }
 0x56f   :  { %v3319_v38 = vadd.f32 %v4002_v60, %v3318_v29  ;;  %4140 = vmatmul.mubr.f32.gmra.mxu1 %v3329_v54 }
 0x570   :  { %v4097_v31 = vpop.f32.mrf.mxu1  ;;  %4142 = vmatprep.mubr.msk.f32.mxu1 %vm4225_vm10, %v7398_v16 }
 0x571   :  { %v3330_v49 = vmax.f32 %v3319_v38, 0.0 }
 0x572   :  { %v3323_v40 = vpop.f32.mrf.mxu1 }
 0x573   :  { %v3324_v41 = vadd.f32 %v4002_v60, %v3323_v40  ;;  %4143 = vmatmul.mubr.f32.gmra.mxu1 %v3330_v49 }
 0x574   :  { %v4100_v53 = vpop.f32.mrf.mxu1  ;;  %4145 = vmatprep.mubr.msk.f32.mxu1 %vm4225_vm10, %v7398_v16 }
 0x575   :  { %v3331_v63 = vmax.f32 %v3324_v41, 0.0 }
 0x577   :  { %4146 = vmatmul.mubr.f32.gmra.mxu1 %v3331_v63 }
 0x578   :  { %4158 = vmatprep.mubr.msk.f32.mxu1 %vm4225_vm10, %v7398_v16 }
 0x627   :  { %v3421_v27 = vpop.f32.mrf.mxu1 }
 0x628   :  { %v3422_v39 = vadd.f32 %v4003_v28, %v3421_v27 }
 0x629   :  { %v4135_v5 = vpop.f32.mrf.mxu1 }
 0x62b   :  { %v3426_v52 = vpop.f32.mrf.mxu1 }
 0x62c   :  { %v3427_v23 = vadd.f32 %v4003_v28, %v3426_v52 }
 0x62d   :  { %v4138_v35 = vpop.f32.mrf.mxu1 }
 0x62f   :  { %v3431_v25 = vpop.f32.mrf.mxu1 }
 0x630   :  { %v3432_v43 = vadd.f32 %v4003_v28, %v3431_v25 }
 0x631   :  { %v4141_v50 = vpop.f32.mrf.mxu1 }
 0x633   :  { %v3436_v14 = vpop.f32.mrf.mxu1 }
 0x634   :  { %v3437_v42 = vadd.f32 %v4003_v28, %v3436_v14 }
 0x635   :  { %v4144_v12 = vpop.f32.mrf.mxu1 }
 0x637   :  { %v3441_v44 = vpop.f32.mrf.mxu1 }
 0x638   :  { %v3442_v51 = vadd.f32 %v4003_v28, %v3441_v44 }
 0x639   :  { %v4147_v15 = vpop.f32.mrf.mxu1 }
 0x63a   :  { %4149 = vmatpush3.msra.mxu1 %v3442_v51 }
 0x63b   :  { %4150 = vmatprep.subr.mxu1 %v7398_v16 }
 0x63c   :  { %4151 = vmatpush3.msra.mxu1 %v3437_v42 }
 0x63d   :  { %4152 = vmatprep.subr.mxu1 %v7398_v16 }
 0x63e   :  { %4153 = vmatpush3.msra.mxu1 %v3432_v43 }
 0x63f   :  { %4154 = vmatprep.subr.mxu1 %v7398_v16 }
 0x640   :  { %4155 = vmatpush3.msra.mxu1 %v3427_v23 }
 0x641   :  { %4156 = vmatprep.subr.mxu1 %v7398_v16 }
 0x642   :  { %4157 = vmatpush3.msra.mxu1 %v3422_v39 }
 0x643   :  { %4159 = vmatmul.mubr.msk.f32.vlgmr.msra.gmra.mxu1 %vm3453_vm12, %v4004_v24 }
 0x703   :  { %v3523_v19 = vpop.f32.mrf.mxu1 }
 0x704   :  { %3527 = vst [vmem:[#allocation2] sm:$0x3] %v3523_v19 }
 0x705   :  { %v4160_v62 = vpop.f32.mrf.mxu1 }
 0x706   :  { %4211 = shalt.err (!%p4208_p4)
}
 0x707   :  { %3537 = dma.vmem_to_hbm [thread:$0]  %s3535_s30, 32, %s7366_s11, [#allocation3]  }
 0x708   :  { %4220 = dma.done.wait [#allocation3], 32  }
 0x709   :  { %4221 = vsyncadd [#allocation3], 4294967264 }
 0x70a   :  { %3541 = vsyncpa [#allocation3], 1 }

</bundles_post_ra>
